<compile_context>
chip_gen: v7x
topology: tpu7x:2x2x1
jax: 0.10.0
libtpu: 0.0.40
codegen_flags: <defaults>
</compile_context>

<pallas_src>
import functools

import jax
import jax.numpy as jnp
from jax.experimental import pallas as pl
from jax.experimental.pallas import tpu as pltpu

_MXU_DTYPE = jnp.bfloat16              # matmul input dtype (f32 accumulation)
_ACT_DTYPE = jnp.bfloat16              # inter-kernel activation storage dtype
_VMEM_LIMIT_BYTES = 32 * 1024 * 1024   # safe on v5e/v6e/v7x scoped VMEM
_GN_EPS = 1e-5

_GELU_K0 = 0.7978845608028654          # sqrt(2/pi)
_GELU_K1 = 0.044715


def _gelu(x):
    # tanh-approx GELU (EUP transcendental -> essentially free next to the MXU).
    return 0.5 * x * (1.0 + jnp.tanh(_GELU_K0 * (x + _GELU_K1 * x * x * x)))


def _round_up(x, m):
    return (x + m - 1) // m * m


def _pick_tile(dim, candidates):
    for c in candidates:
        if dim >= c and dim % c == 0:
            return c
    return dim


# ----------------------------- tiled matmul (+bias/GELU/residual) -----------------------------

def _matmul_k1_kernel(*refs, act, has_res):
    # Single K step: no accumulator scratch, straight dot -> epilogue -> store.
    if has_res:
        x_ref, w_ref, b_ref, r_ref, o_ref = refs
    else:
        x_ref, w_ref, b_ref, o_ref = refs
        r_ref = None
    x = x_ref[...]
    if x.dtype != w_ref.dtype:
        x = x.astype(w_ref.dtype)
    y = jnp.dot(x, w_ref[...], preferred_element_type=jnp.float32) + b_ref[...]
    if act:
        y = _gelu(y)
    if r_ref is not None:
        y = y + r_ref[...].astype(jnp.float32)
    o_ref[...] = y.astype(o_ref.dtype)


def _matmul_kloop_kernel(*refs, act, has_res):
    if has_res:
        x_ref, w_ref, b_ref, r_ref, o_ref, acc_ref = refs
    else:
        x_ref, w_ref, b_ref, o_ref, acc_ref = refs
        r_ref = None

    @pl.when(pl.program_id(2) == 0)
    def _():
        acc_ref[...] = jnp.zeros_like(acc_ref)

    x = x_ref[...]
    if x.dtype != w_ref.dtype:
        x = x.astype(w_ref.dtype)
    acc_ref[...] += jnp.dot(x, w_ref[...], preferred_element_type=jnp.float32)

    @pl.when(pl.program_id(2) == pl.num_programs(2) - 1)
    def _():
        y = acc_ref[...] + b_ref[...]
        if act:
            y = _gelu(y)
        if r_ref is not None:
            y = y + r_ref[...].astype(jnp.float32)
        o_ref[...] = y.astype(o_ref.dtype)


def matmul_bias(x2d, w, b, act=False, residual=None, out_dtype=None):
    """(M, K) @ (K, N) + b [, GELU] [, + residual].  w is pre-transposed (K=Cin, N=Cout)."""
    M, K = x2d.shape
    Kw, N = w.shape
    assert K == Kw
    out_dtype = x2d.dtype if out_dtype is None else out_dtype

    Mp = _round_up(M, 8)
    if Mp != M:
        x2d = jnp.pad(x2d, ((0, Mp - M), (0, 0)))
        if residual is not None:
            residual = jnp.pad(residual, ((0, Mp - M), (0, 0)))

    tm = _pick_tile(Mp, (512, 256, 128, 64, 32, 16, 8))
    tn = _pick_tile(N, (512, 256, 128))
    tk = _pick_tile(K, (512, 256, 128))
    # Keep >= 2 steps on a parallel axis when shapes allow it (v7x has 2 TensorCores that
    # split "parallel" grid axes; a 1-step parallel grid leaves half the chip idle).
    if Mp // tm == 1 and N // tn == 1:
        if tm >= 16:
            tm //= 2
        elif tn >= 256:
            tn //= 2
    grid = (Mp // tm, N // tn, K // tk)

    in_specs = [
        pl.BlockSpec((tm, tk), lambda i, j, k: (i, k)),
        pl.BlockSpec((tk, tn), lambda i, j, k: (k, j)),
        pl.BlockSpec((1, tn), lambda i, j, k: (0, j)),
    ]
    operands = [x2d, w, b]
    if residual is not None:
        in_specs.append(pl.BlockSpec((tm, tn), lambda i, j, k: (i, j)))
        operands.append(residual)

    if grid[2] == 1:
        kernel = functools.partial(_matmul_k1_kernel, act=act, has_res=residual is not None)
        scratch = []
    else:
        kernel = functools.partial(_matmul_kloop_kernel, act=act, has_res=residual is not None)
        scratch = [pltpu.VMEM((tm, tn), jnp.float32)]

    out = pl.pallas_call(
        kernel,
        out_shape=jax.ShapeDtypeStruct((Mp, N), out_dtype),
        grid=grid,
        in_specs=in_specs,
        out_specs=pl.BlockSpec((tm, tn), lambda i, j, k: (i, j)),
        scratch_shapes=scratch,
        compiler_params=pltpu.CompilerParams(
            dimension_semantics=("parallel", "parallel", "arbitrary"),
            vmem_limit_bytes=_VMEM_LIMIT_BYTES),
    )(*operands)
    return out[:M] if Mp != M else out


# ----------------------------- GroupNorm(1, C) (patch-embed norm only) -----------------------------

def _groupnorm_kernel(x_ref, w_ref, b_ref, o_ref, *, eps, inv_n):
    x = x_ref[...].astype(jnp.float32)
    mean = jnp.sum(x) * inv_n
    xc = x - mean
    var = jnp.sum(xc * xc) * inv_n                 # two-pass: no cancellation issues
    y = xc * jax.lax.rsqrt(var + eps) * w_ref[...] + b_ref[...]
    o_ref[...] = y.astype(o_ref.dtype)


def groupnorm(x_bhwc, w, b, eps=_GN_EPS):
    B, H, W, C = x_bhwc.shape
    xr = x_bhwc.reshape(B, H * W, C)
    out = pl.pallas_call(
        functools.partial(_groupnorm_kernel, eps=eps, inv_n=1.0 / (H * W * C)),
        out_shape=jax.ShapeDtypeStruct((B, H * W, C), _ACT_DTYPE),
        grid=(B,),
        in_specs=[
            pl.BlockSpec((1, H * W, C), lambda i: (i, 0, 0)),
            pl.BlockSpec((1, 1, C), lambda i: (0, 0, 0)),
            pl.BlockSpec((1, 1, C), lambda i: (0, 0, 0)),
        ],
        out_specs=pl.BlockSpec((1, H * W, C), lambda i: (i, 0, 0)),
        compiler_params=pltpu.CompilerParams(
            dimension_semantics=("parallel",),
            vmem_limit_bytes=_VMEM_LIMIT_BYTES),
    )(xr, w.reshape(1, 1, C), b.reshape(1, 1, C))
    return out.reshape(B, H, W, C)


# ---------------- fused AxialShift block: norm1 + conv1 + gn1 + shifts + conv2 + gn2 + conv3 ----------------

def _axial_core_kernel(x_ref, w1_ref, b1_ref, w2_ref, b2_ref, w3_ref, b3_ref, gnp_ref,
                       xo_ref, zo_ref, *, H, W, shift_size, eps):
    # One sample per grid step.  x_ref: (1, H*W, C) bf16 input (also the block shortcut).
    # w*: 1x1-conv weights pre-transposed (Cin, Cout) bf16; b*: (1, C) f32 biases.
    # gnp_ref: (8, C) f32 = [norm1_w, norm1_b, gn1_w, gn1_b, gn2_w, gn2_b, norm2_w, norm2_b].
    # Outputs: xo = shortcut + conv3(gn2(sum_r gelu(conv2(shift_r(gelu(gn1(conv1(norm1(x))))))))),
    #          zo = norm2(xo)   (feeds the following MLP matmuls -> no standalone GN passes).
    HW = H * W
    C = x_ref.shape[2]
    inv_n = 1.0 / (HW * C)
    gnp = gnp_ref[...]

    def gn(v, row):  # GroupNorm(1, C) over one sample, two-pass statistics
        mean = jnp.sum(v) * inv_n
        vc = v - mean
        var = jnp.sum(vc * vc) * inv_n
        return vc * jax.lax.rsqrt(var + eps) * gnp[row:row + 1] + gnp[row + 1:row + 2]

    def conv(v, w_ref_, bias):
        return jnp.dot(v.astype(w_ref_.dtype), w_ref_[...],
                       preferred_element_type=jnp.float32) + bias

    x_in = x_ref[0].astype(jnp.float32)                           # (HW, C)
    h = _gelu(gn(conv(gn(x_in, 0), w1_ref, b1_ref[...]), 2))      # norm1 -> conv1 -> gn1 -> GELU

    # Four axial zero-fill shifts, done in-register.  pltpu.roll on the flattened spatial
    # axis follows the np.roll convention: rolled[p] == h[(p - amt) % HW]; wrap-around and
    # out-of-image reads are zeroed by the row/column masks below.
    pad = shift_size // 2
    chunk = -(-C // shift_size)                  # torch.chunk split size
    n_chunks = -(-C // chunk)                    # may be < shift_size (zip truncation)
    shifts = list(range(-pad, pad + 1))[:n_chunks]

    pos = jax.lax.broadcasted_iota(jnp.int32, (HW, 1), 0)         # flattened index h*W + w
    wcol = pos % W                                                # w coordinate
    lane = jax.lax.broadcasted_iota(jnp.int32, (1, C), 1)         # channel index
    chn_ok = [(lane >= i * chunk) & (lane < (i + 1) * chunk) for i in range(n_chunks)]

    def shifted(offsets):
        # offsets[c] = (dh, dw) for channel chunk c; out[h, w] = h_act[h - dh, w - dw],
        # zero outside the image (matches torch_shift / torch_shift_reverse composition).
        out = jnp.zeros((HW, C), jnp.float32)
        for idx, (dh, dw) in enumerate(offsets):
            if dh == 0 and dw == 0:
                out = jnp.where(chn_ok[idx], h, out)
                continue
            amt = (dh * W + dw) % HW
            rolled = pltpu.roll(h, amt, axis=0) if amt else h
            ok = chn_ok[idx]
            if dh != 0:
                ok = ok & (pos >= dh * W) & (pos < (H + dh) * W)
            if dw != 0:
                ok = ok & (wcol >= dw) & (wcol < W + dw)
            out = jnp.where(ok, rolled, out)
        return out

    xs_lr = shifted([(0, s) for s in shifts])      # torch_shift dim=3
    xs_ld = shifted([(s, s) for s in shifts])      # then torch_shift dim=2
    xs_td = shifted([(s, 0) for s in shifts])      # torch_shift dim=2
    xs_rd = shifted([(s, -s) for s in shifts])     # then torch_shift_reverse dim=3

    # conv2_1 / conv2_2: the two branches sharing a weight are stacked into one MXU dot
    # (doubles MXU row fill, halves push/epilogue count).
    def conv2_pair(a, bb, widx):
        y = jnp.dot(jnp.concatenate([a, bb], axis=0).astype(w2_ref.dtype), w2_ref[widx],
                    preferred_element_type=jnp.float32) + b2_ref[widx]
        y = _gelu(y)
        return y[:HW] + y[HW:]

    acc = conv2_pair(xs_lr, xs_ld, 0) + conv2_pair(xs_td, xs_rd, 1)

    x_out = conv(gn(acc, 4), w3_ref, b3_ref[...]) + x_in          # gn2 -> conv3 -> +shortcut
    xo_ref[0] = x_out.astype(xo_ref.dtype)
    zo_ref[0] = gn(x_out, 6).astype(zo_ref.dtype)                 # norm2 for the MLP


def axial_core(x_bhwc, p, shift_size):
    # TODO(synk): for production resolutions on v7x (64 MiB VMEM) tile the spatial axis
    # with a shift-halo and process multiple samples per grid step.
    B, H, W, C = x_bhwc.shape
    HW = H * W
    xr = x_bhwc.reshape(B, HW, C)
    xo, zo = pl.pallas_call(
        functools.partial(_axial_core_kernel, H=H, W=W, shift_size=shift_size, eps=_GN_EPS),
        out_shape=(jax.ShapeDtypeStruct((B, HW, C), _ACT_DTYPE),
                   jax.ShapeDtypeStruct((B, HW, C), _ACT_DTYPE)),
        grid=(B,),
        in_specs=[
            pl.BlockSpec((1, HW, C), lambda i: (i, 0, 0)),
            pl.BlockSpec((C, C), lambda i: (0, 0)),
            pl.BlockSpec((1, C), lambda i: (0, 0)),
            pl.BlockSpec((2, C, C), lambda i: (0, 0, 0)),
            pl.BlockSpec((2, 1, C), lambda i: (0, 0, 0)),
            pl.BlockSpec((C, C), lambda i: (0, 0)),
            pl.BlockSpec((1, C), lambda i: (0, 0)),
            pl.BlockSpec((8, C), lambda i: (0, 0)),
        ],
        out_specs=(pl.BlockSpec((1, HW, C), lambda i: (i, 0, 0)),
                   pl.BlockSpec((1, HW, C), lambda i: (i, 0, 0))),
        compiler_params=pltpu.CompilerParams(
            dimension_semantics=("parallel",),
            vmem_limit_bytes=_VMEM_LIMIT_BYTES),
    )(xr, p["w1"], p["b1"], p["w2"], p["b2"], p["w3"], p["b3"], p["gnp"])
    return xo.reshape(B, H, W, C), zo.reshape(B, H, W, C)


# ----------------------------- model -----------------------------

def axial_block(x_bhwc, p, shift_size):
    B, H, W, C = x_bhwc.shape
    M = B * H * W
    x2, z2 = axial_core(x_bhwc, p, shift_size)                       # 1 fused pallas_call
    hmid = matmul_bias(z2.reshape(M, C), p["fc1"]["w"], p["fc1"]["b"], act=True)
    out = matmul_bias(hmid, p["fc2"]["w"], p["fc2"]["b"], residual=x2.reshape(M, C))
    return out.reshape(B, H, W, C)


def _patch_tokens(x_nchw, ps, k_padded):
    B, Cin, H, W = x_nchw.shape
    Ho, Wo = H // ps, W // ps
    xp = (x_nchw.reshape(B, Cin, Ho, ps, Wo, ps)
          .transpose(0, 2, 4, 1, 3, 5)
          .reshape(B * Ho * Wo, Cin * ps * ps))
    if k_padded > xp.shape[1]:
        xp = jnp.pad(xp, ((0, 0), (0, k_padded - xp.shape[1])))
    return xp, Ho, Wo


def aspmlp_forward(params, x_nchw, *, patch_size, shift_size):
    B = x_nchw.shape[0]
    pe = params["patch_embed"]
    embed_dim = pe["w"].shape[1]

    # PatchEmbed: Conv2d(kernel=ps, stride=ps) == patch flatten + matmul (K zero-padded to 128).
    xp, Ho, Wo = _patch_tokens(x_nchw, patch_size, pe["w"].shape[0])
    x = matmul_bias(xp, pe["w"], pe["b"], out_dtype=_ACT_DTYPE).reshape(B, Ho, Wo, embed_dim)
    x = groupnorm(x, pe["norm_w"], pe["norm_b"])
    # pos_drop(p=0), DropPath (eval) are identities.

    for blk in params["blocks"]:
        x = axial_block(x, blk, shift_size)

    x = matmul_bias(x.reshape(B * Ho * Wo, embed_dim), params["head"]["w"],
                    params["head"]["b"], out_dtype=jnp.float32)
    return x.reshape(B, Ho, Wo, -1).transpose(0, 3, 1, 2)            # back to NCHW


# ----------------------------- deterministic parameter init -----------------------------

def _conv_p(key, cin, cout):
    kw, kb = jax.random.split(key)
    w = 0.05 * jax.random.normal(kw, (cout, cin), jnp.float32)       # PyTorch (Cout, Cin)
    b = 0.01 * jax.random.normal(kb, (cout,), jnp.float32)
    return {"w": w.T.astype(_MXU_DTYPE), "b": b.reshape(1, cout)}    # stored (Cin, Cout) bf16


def _gn_p(key, c):
    kw, kb = jax.random.split(key)
    return (jnp.ones((c,), jnp.float32) + 0.02 * jax.random.normal(kw, (c,), jnp.float32),
            0.02 * jax.random.normal(kb, (c,), jnp.float32))


def init_params(key, *, in_chans, embed_dim, patch_size, depth, mlp_ratio):
    hidden = int(embed_dim * mlp_ratio)
    keys = jax.random.split(key, depth + 2)

    kpe_w, kpe_b, kpe_n = jax.random.split(keys[0], 3)
    nw, nb = _gn_p(kpe_n, embed_dim)
    k_raw = in_chans * patch_size * patch_size
    k_pad = _round_up(k_raw, 128)
    w_pe = 0.05 * jax.random.normal(kpe_w, (embed_dim, k_raw), jnp.float32)
    patch_embed = {
        "w": jnp.pad(w_pe.T, ((0, k_pad - k_raw), (0, 0))).astype(_MXU_DTYPE),  # (k_pad, E)
        "b": (0.01 * jax.random.normal(kpe_b, (embed_dim,), jnp.float32)).reshape(1, embed_dim),
        "norm_w": nw, "norm_b": nb,
    }

    blocks = []
    for d in range(depth):
        ks = jax.random.split(keys[1 + d], 10)
        n1w, n1b = _gn_p(ks[0], embed_dim)
        n2w, n2b = _gn_p(ks[1], embed_dim)
        g1w, g1b = _gn_p(ks[2], embed_dim)
        g2w, g2b = _gn_p(ks[3], embed_dim)
        c1 = _conv_p(ks[4], embed_dim, embed_dim)
        c21 = _conv_p(ks[5], embed_dim, embed_dim)
        c22 = _conv_p(ks[6], embed_dim, embed_dim)
        c3 = _conv_p(ks[7], embed_dim, embed_dim)
        blocks.append({
            "w1": c1["w"], "b1": c1["b"],
            "w2": jnp.stack([c21["w"], c22["w"]], axis=0),           # (2, C, C)
            "b2": jnp.stack([c21["b"], c22["b"]], axis=0),           # (2, 1, C)
            "w3": c3["w"], "b3": c3["b"],
            "gnp": jnp.stack([n1w, n1b, g1w, g1b, g2w, g2b, n2w, n2b], axis=0),  # (8, C)
            "fc1": _conv_p(ks[8], embed_dim, hidden),
            "fc2": _conv_p(ks[9], hidden, embed_dim),
        })

    head = _conv_p(keys[1 + depth], embed_dim, in_chans)
    return {"patch_embed": patch_embed, "blocks": blocks, "head": head}


# ----------------------------- pure-JAX reference (self-check) -----------------------------

def _ref_zero_shift(x, s, axis):
    if s == 0:
        return x
    L = x.shape[axis]
    pad_cfg = [(0, 0)] * x.ndim
    if s > 0:
        pad_cfg[axis] = (s, 0)
        return jax.lax.slice_in_dim(jnp.pad(x, pad_cfg), 0, L, axis=axis)
    pad_cfg[axis] = (0, -s)
    return jax.lax.slice_in_dim(jnp.pad(x, pad_cfg), -s, -s + L, axis=axis)


def _ref_axial_shift(x, shift_size, axis, reverse=False):
    C = x.shape[-1]
    pad = shift_size // 2
    chunk = -(-C // shift_size)
    splits = [x[..., i:i + chunk] for i in range(0, C, chunk)]
    outs = []
    for xc, s in zip(splits, range(-pad, pad + 1)):
        outs.append(_ref_zero_shift(xc, -s if reverse else s, axis))
    return jnp.concatenate(outs, axis=-1)


def _ref_conv(x, w, b, act=False):
    y = jnp.einsum("bhwc,cd->bhwd", x, w.astype(jnp.float32)) + b[0]
    return _gelu(y) if act else y


def _ref_gn(x, w, b, act=False, eps=_GN_EPS):
    B = x.shape[0]
    mean = x.reshape(B, -1).mean(axis=1).reshape(B, 1, 1, 1)
    var = ((x - mean) ** 2).reshape(B, -1).mean(axis=1).reshape(B, 1, 1, 1)
    y = (x - mean) * jax.lax.rsqrt(var + eps) * w + b
    return _gelu(y) if act else y


def aspmlp_reference(params, x_nchw, *, patch_size, shift_size):
    B = x_nchw.shape[0]
    pe = params["patch_embed"]
    xp, Ho, Wo = _patch_tokens(x_nchw, patch_size, pe["w"].shape[0])
    xp = xp.reshape(B, Ho, Wo, -1)
    x = jnp.einsum("bhwc,cd->bhwd", xp, pe["w"].astype(jnp.float32)) + pe["b"][0]
    x = _ref_gn(x, pe["norm_w"], pe["norm_b"])
    for p in params["blocks"]:
        gnp = p["gnp"]
        sc = x
        y = _ref_gn(x, gnp[0], gnp[1])
        y = _ref_conv(y, p["w1"], p["b1"])
        y = _ref_gn(y, gnp[2], gnp[3], act=True)
        x_lr = _ref_axial_shift(y, shift_size, axis=2)
        x_ld = _ref_axial_shift(x_lr, shift_size, axis=1)
        x_td = _ref_axial_shift(y, shift_size, axis=1)
        x_rd = _ref_axial_shift(x_td, shift_size, axis=2, reverse=True)
        y = (_ref_conv(x_lr, p["w2"][0], p["b2"][0], act=True)
             + _ref_conv(x_ld, p["w2"][0], p["b2"][0], act=True)
             + _ref_conv(x_td, p["w2"][1], p["b2"][1], act=True)
             + _ref_conv(x_rd, p["w2"][1], p["b2"][1], act=True))
        y = _ref_gn(y, gnp[4], gnp[5])
        y = _ref_conv(y, p["w3"], p["b3"])
        x = sc + y
        z = _ref_gn(x, gnp[6], gnp[7])
        z = _ref_conv(z, p["fc1"]["w"], p["fc1"]["b"], act=True)
        x = x + _ref_conv(z, p["fc2"]["w"], p["fc2"]["b"])
    x = _ref_conv(x, params["head"]["w"], params["head"]["b"])
    return x.transpose(0, 3, 1, 2)


# ----------------------------- main -----------------------------

if __name__ == "__main__":
    B, Cin, H, W = 2, 3, 16, 16
    patch_size, embed_dim, shift_size, depth, mlp_ratio = 4, 128, 5, 2, 4.0
    # Single stage (depths=[2]): ASPMLP with downsample=None keeps the channel count fixed
    # across stages, so a single depth-2 BasicLayer is the consistent configuration.
    # embed_dim=128 keeps every internal channel dim lane-dense (multiple of 128).

    key = jax.random.PRNGKey(0)
    k_in, k_p = jax.random.split(key)
    x = jax.random.normal(k_in, (B, Cin, H, W), jnp.float32)
    params = init_params(k_p, in_chans=Cin, embed_dim=embed_dim,
                         patch_size=patch_size, depth=depth, mlp_ratio=mlp_ratio)

    fwd = jax.jit(functools.partial(aspmlp_forward, patch_size=patch_size,
                                    shift_size=shift_size))
    out = fwd(params, x)
    jax.block_until_ready(out)

    assert out.shape == (B, Cin, H // patch_size, W // patch_size), out.shape
    assert out.dtype == jnp.float32
    assert bool(jnp.isfinite(out).all())

    # self-check against a pure-JAX f32 reference (bf16 MXU inputs + bf16 activation
    # storage in the Pallas path -> loose tolerance)
    ref = jax.jit(functools.partial(aspmlp_reference, patch_size=patch_size,
                                    shift_size=shift_size))(params, x)
    max_err = float(jnp.max(jnp.abs(out - ref)))
    assert bool(jnp.allclose(out, ref, rtol=1e-1, atol=1e-1)), max_err

    print("KERNEL_OK")
</pallas_src>

<mosaic_0001>
module attributes {stable_mosaic.version = 11 : i64} {
  func.func @_groupnorm_kernel(%arg0: i32, %arg1: memref<1x16x128xbf16, #tpu.memory_space<vmem>>, %arg2: memref<1x1x128xf32, #tpu.memory_space<vmem>>, %arg3: memref<1x1x128xf32, #tpu.memory_space<vmem>>, %arg4: memref<1x16x128xbf16, #tpu.memory_space<vmem>>) attributes {dimension_semantics = [#tpu.dimension_semantics<parallel>], iteration_bounds = array<i64: 2>, scalar_prefetch = 0 : i64, scratch_operands = 0 : i64, tpu.core_type = #tpu.core_type<tc>, window_params = [{transform_indices = @transform_0, window_bounds = array<i64: 1, 16, 128>}, {pipeline_mode = #tpu.pipeline_mode<synchronous>, transform_indices = @transform_1, window_bounds = array<i64: 1, 1, 128>}, {pipeline_mode = #tpu.pipeline_mode<synchronous>, transform_indices = @transform_2, window_bounds = array<i64: 1, 1, 128>}, {transform_indices = @transform_3, window_bounds = array<i64: 1, 16, 128>}]} {
    %c0 = arith.constant 0 : index
    %c0_0 = arith.constant 0 : index
    %c0_1 = arith.constant 0 : index
    %0 = vector.load %arg1[%c0, %c0_0, %c0_1] : memref<1x16x128xbf16, #tpu.memory_space<vmem>>, vector<1x16x128xbf16>
    %1 = arith.extf %0 : vector<1x16x128xbf16> to vector<1x16x128xf32>
    %2 = vector.shape_cast %1 : vector<1x16x128xf32> to vector<1x1x16x128xf32>
    %cst = arith.constant dense<0.000000e+00> : vector<1xf32>
    %3 = vector.multi_reduction <add>, %2, %cst [1, 2, 3] : vector<1x1x16x128xf32> to vector<1xf32>
    %4 = vector.shape_cast %3 : vector<1xf32> to vector<1x1x1x1xf32>
    %5 = vector.extract %4[0, 0, 0, 0] : f32 from vector<1x1x1x1xf32>
    %cst_2 = arith.constant 4.8828125E-4 : f32
    %6 = arith.mulf %5, %cst_2 : f32
    %7 = vector.broadcast %6 : f32 to vector<1x16x128xf32>
    %8 = arith.subf %1, %7 : vector<1x16x128xf32>
    %9 = arith.mulf %8, %8 : vector<1x16x128xf32>
    %10 = vector.shape_cast %9 : vector<1x16x128xf32> to vector<1x1x16x128xf32>
    %cst_3 = arith.constant dense<0.000000e+00> : vector<1xf32>
    %11 = vector.multi_reduction <add>, %10, %cst_3 [1, 2, 3] : vector<1x1x16x128xf32> to vector<1xf32>
    %12 = vector.shape_cast %11 : vector<1xf32> to vector<1x1x1x1xf32>
    %13 = vector.extract %12[0, 0, 0, 0] : f32 from vector<1x1x1x1xf32>
    %cst_4 = arith.constant 4.8828125E-4 : f32
    %14 = arith.mulf %13, %cst_4 : f32
    %cst_5 = arith.constant 9.99999974E-6 : f32
    %15 = arith.addf %14, %cst_5 : f32
    %16 = math.rsqrt %15 : f32
    %17 = vector.broadcast %16 : f32 to vector<1x16x128xf32>
    %18 = arith.mulf %8, %17 : vector<1x16x128xf32>
    %c0_6 = arith.constant 0 : index
    %c0_7 = arith.constant 0 : index
    %c0_8 = arith.constant 0 : index
    %19 = vector.load %arg2[%c0_6, %c0_7, %c0_8] : memref<1x1x128xf32, #tpu.memory_space<vmem>>, vector<1x1x128xf32>
    %20 = vector.broadcast %19 : vector<1x1x128xf32> to vector<1x16x128xf32>
    %21 = arith.mulf %18, %20 : vector<1x16x128xf32>
    %c0_9 = arith.constant 0 : index
    %c0_10 = arith.constant 0 : index
    %c0_11 = arith.constant 0 : index
    %22 = vector.load %arg3[%c0_9, %c0_10, %c0_11] : memref<1x1x128xf32, #tpu.memory_space<vmem>>, vector<1x1x128xf32>
    %23 = vector.broadcast %22 : vector<1x1x128xf32> to vector<1x16x128xf32>
    %24 = arith.addf %21, %23 : vector<1x16x128xf32>
    %25 = arith.truncf %24 : vector<1x16x128xf32> to vector<1x16x128xbf16>
    %c0_12 = arith.constant 0 : index
    %c0_13 = arith.constant 0 : index
    %c0_14 = arith.constant 0 : index
    %26 = vector.load %arg4[%c0_12, %c0_13, %c0_14] : memref<1x16x128xbf16, #tpu.memory_space<vmem>>, vector<1x16x128xbf16>
    tpu.vector_store %arg4[%c0_12, %c0_13, %c0_14], %25 {strides = array<i32>} : memref<1x16x128xbf16, #tpu.memory_space<vmem>>, vector<1x16x128xbf16>,
    return
  }
  func.func @transform_0(%arg0: i32) -> (i32, i32, i32) {
    %c0_i32 = arith.constant 0 : i32
    %c0_i32_0 = arith.constant 0 : i32
    %c0_i32_1 = arith.constant 0 : i32
    return %arg0, %c0_i32, %c0_i32_0 : i32, i32, i32
  }
  func.func @transform_1(%arg0: i32) -> (i32, i32, i32) {
    %c0_i32 = arith.constant 0 : i32
    %c0_i32_0 = arith.constant 0 : i32
    %c0_i32_1 = arith.constant 0 : i32
    %c0_i32_2 = arith.constant 0 : i32
    return %c0_i32, %c0_i32_0, %c0_i32_1 : i32, i32, i32
  }
  func.func @transform_2(%arg0: i32) -> (i32, i32, i32) {
    %c0_i32 = arith.constant 0 : i32
    %c0_i32_0 = arith.constant 0 : i32
    %c0_i32_1 = arith.constant 0 : i32
    %c0_i32_2 = arith.constant 0 : i32
    return %c0_i32, %c0_i32_0, %c0_i32_1 : i32, i32, i32
  }
  func.func @transform_3(%arg0: i32) -> (i32, i32, i32) {
    %c0_i32 = arith.constant 0 : i32
    %c0_i32_0 = arith.constant 0 : i32
    %c0_i32_1 = arith.constant 0 : i32
    return %arg0, %c0_i32, %c0_i32_0 : i32, i32, i32
  }
}

module attributes {stable_mosaic.version = 11 : i64} {
  func.func @_matmul_k1_kernel(%arg0: i32, %arg1: i32, %arg2: i32, %arg3: memref<16x128xf32, #tpu.memory_space<vmem>>, %arg4: memref<128x128xbf16, #tpu.memory_space<vmem>>, %arg5: memref<1x128xf32, #tpu.memory_space<vmem>>, %arg6: memref<16x128xbf16, #tpu.memory_space<vmem>>) attributes {dimension_semantics = [#tpu.dimension_semantics<parallel>, #tpu.dimension_semantics<parallel>, #tpu.dimension_semantics<arbitrary>], iteration_bounds = array<i64: 2, 1, 1>, scalar_prefetch = 0 : i64, scratch_operands = 0 : i64, tpu.core_type = #tpu.core_type<tc>, window_params = [{transform_indices = @transform_0, window_bounds = array<i64: 16, 128>}, {transform_indices = @transform_1, window_bounds = array<i64: 128, 128>}, {transform_indices = @transform_2, window_bounds = array<i64: 1, 128>}, {transform_indices = @transform_3, window_bounds = array<i64: 16, 128>}]} {
    %c0 = arith.constant 0 : index
    %c0_0 = arith.constant 0 : index
    %0 = vector.load %arg3[%c0, %c0_0] : memref<16x128xf32, #tpu.memory_space<vmem>>, vector<16x128xf32>
    %1 = arith.truncf %0 : vector<16x128xf32> to vector<16x128xbf16>
    %c0_1 = arith.constant 0 : index
    %c0_2 = arith.constant 0 : index
    %2 = vector.load %arg4[%c0_1, %c0_2] : memref<128x128xbf16, #tpu.memory_space<vmem>>, vector<128x128xbf16>
    %cst = arith.constant dense<0.000000e+00> : vector<16x128xf32>
    %3 = tpu.matmul %1, %2, %cst {dimension_numbers = #tpu.dot_dimension_numbers<[1], [0], [0], [1], [0, 0, 1, 1], [], []>} : vector<16x128xbf16>, vector<128x128xbf16>, vector<16x128xf32> -> vector<16x128xf32>
    %c0_3 = arith.constant 0 : index
    %c0_4 = arith.constant 0 : index
    %4 = vector.load %arg5[%c0_3, %c0_4] : memref<1x128xf32, #tpu.memory_space<vmem>>, vector<1x128xf32>
    %5 = vector.broadcast %4 : vector<1x128xf32> to vector<16x128xf32>
    %6 = arith.addf %3, %5 : vector<16x128xf32>
    %7 = arith.truncf %6 : vector<16x128xf32> to vector<16x128xbf16>
    %c0_5 = arith.constant 0 : index
    %c0_6 = arith.constant 0 : index
    %8 = vector.load %arg6[%c0_5, %c0_6] : memref<16x128xbf16, #tpu.memory_space<vmem>>, vector<16x128xbf16>
    tpu.vector_store %arg6[%c0_5, %c0_6], %7 {strides = array<i32>} : memref<16x128xbf16, #tpu.memory_space<vmem>>, vector<16x128xbf16>,
    return
  }
  func.func @transform_0(%arg0: i32, %arg1: i32, %arg2: i32) -> (i32, i32) {
    %c0_i32 = arith.constant 0 : i32
    return %arg0, %arg2 : i32, i32
  }
  func.func @transform_1(%arg0: i32, %arg1: i32, %arg2: i32) -> (i32, i32) {
    %c0_i32 = arith.constant 0 : i32
    return %arg2, %arg1 : i32, i32
  }
  func.func @transform_2(%arg0: i32, %arg1: i32, %arg2: i32) -> (i32, i32) {
    %c0_i32 = arith.constant 0 : i32
    %c0_i32_0 = arith.constant 0 : i32
    return %c0_i32, %arg1 : i32, i32
  }
  func.func @transform_3(%arg0: i32, %arg1: i32, %arg2: i32) -> (i32, i32) {
    %c0_i32 = arith.constant 0 : i32
    return %arg0, %arg1 : i32, i32
  }
}

module attributes {stable_mosaic.version = 11 : i64} {
  func.func @_matmul_k1_kernel(%arg0: i32, %arg1: i32, %arg2: i32, %arg3: memref<16x128xbf16, #tpu.memory_space<vmem>>, %arg4: memref<128x512xbf16, #tpu.memory_space<vmem>>, %arg5: memref<1x512xf32, #tpu.memory_space<vmem>>, %arg6: memref<16x512xbf16, #tpu.memory_space<vmem>>) attributes {dimension_semantics = [#tpu.dimension_semantics<parallel>, #tpu.dimension_semantics<parallel>, #tpu.dimension_semantics<arbitrary>], iteration_bounds = array<i64: 2, 1, 1>, scalar_prefetch = 0 : i64, scratch_operands = 0 : i64, tpu.core_type = #tpu.core_type<tc>, window_params = [{transform_indices = @transform_0, window_bounds = array<i64: 16, 128>}, {transform_indices = @transform_1, window_bounds = array<i64: 128, 512>}, {transform_indices = @transform_2, window_bounds = array<i64: 1, 512>}, {transform_indices = @transform_3, window_bounds = array<i64: 16, 512>}]} {
    %c0 = arith.constant 0 : index
    %c0_0 = arith.constant 0 : index
    %0 = vector.load %arg3[%c0, %c0_0] : memref<16x128xbf16, #tpu.memory_space<vmem>>, vector<16x128xbf16>
    %c0_1 = arith.constant 0 : index
    %c0_2 = arith.constant 0 : index
    %1 = vector.load %arg4[%c0_1, %c0_2] : memref<128x512xbf16, #tpu.memory_space<vmem>>, vector<128x512xbf16>
    %cst = arith.constant dense<0.000000e+00> : vector<16x512xf32>
    %2 = tpu.matmul %0, %1, %cst {dimension_numbers = #tpu.dot_dimension_numbers<[1], [0], [0], [1], [0, 0, 1, 1], [], []>} : vector<16x128xbf16>, vector<128x512xbf16>, vector<16x512xf32> -> vector<16x512xf32>
    %c0_3 = arith.constant 0 : index
    %c0_4 = arith.constant 0 : index
    %3 = vector.load %arg5[%c0_3, %c0_4] : memref<1x512xf32, #tpu.memory_space<vmem>>, vector<1x512xf32>
    %4 = vector.broadcast %3 : vector<1x512xf32> to vector<16x512xf32>
    %5 = arith.addf %2, %4 : vector<16x512xf32>
    %cst_5 = arith.constant 5.000000e-01 : f32
    %6 = vector.broadcast %cst_5 : f32 to vector<16x512xf32>
    %7 = arith.mulf %6, %5 : vector<16x512xf32>
    %cst_6 = arith.constant 4.471500e-02 : f32
    %8 = vector.broadcast %cst_6 : f32 to vector<16x512xf32>
    %9 = arith.mulf %8, %5 : vector<16x512xf32>
    %10 = arith.mulf %9, %5 : vector<16x512xf32>
    %11 = arith.mulf %10, %5 : vector<16x512xf32>
    %12 = arith.addf %5, %11 : vector<16x512xf32>
    %cst_7 = arith.constant 0.797884583 : f32
    %13 = vector.broadcast %cst_7 : f32 to vector<16x512xf32>
    %14 = arith.mulf %13, %12 : vector<16x512xf32>
    %15 = math.tanh %14 : vector<16x512xf32>
    %cst_8 = arith.constant 1.000000e+00 : f32
    %16 = vector.broadcast %cst_8 : f32 to vector<16x512xf32>
    %17 = arith.addf %16, %15 : vector<16x512xf32>
    %18 = arith.mulf %7, %17 : vector<16x512xf32>
    %19 = arith.truncf %18 : vector<16x512xf32> to vector<16x512xbf16>
    %c0_9 = arith.constant 0 : index
    %c0_10 = arith.constant 0 : index
    %20 = vector.load %arg6[%c0_9, %c0_10] : memref<16x512xbf16, #tpu.memory_space<vmem>>, vector<16x512xbf16>
    tpu.vector_store %arg6[%c0_9, %c0_10], %19 {strides = array<i32>} : memref<16x512xbf16, #tpu.memory_space<vmem>>, vector<16x512xbf16>,
    return
  }
  func.func @transform_0(%arg0: i32, %arg1: i32, %arg2: i32) -> (i32, i32) {
    %c0_i32 = arith.constant 0 : i32
    return %arg0, %arg2 : i32, i32
  }
  func.func @transform_1(%arg0: i32, %arg1: i32, %arg2: i32) -> (i32, i32) {
    %c0_i32 = arith.constant 0 : i32
    return %arg2, %arg1 : i32, i32
  }
  func.func @transform_2(%arg0: i32, %arg1: i32, %arg2: i32) -> (i32, i32) {
    %c0_i32 = arith.constant 0 : i32
    %c0_i32_0 = arith.constant 0 : i32
    return %c0_i32, %arg1 : i32, i32
  }
  func.func @transform_3(%arg0: i32, %arg1: i32, %arg2: i32) -> (i32, i32) {
    %c0_i32 = arith.constant 0 : i32
    return %arg0, %arg1 : i32, i32
  }
}

module attributes {stable_mosaic.version = 11 : i64} {
  func.func @_axial_core_kernel(%arg0: i32, %arg1: memref<1x16x128xbf16, #tpu.memory_space<vmem>>, %arg2: memref<128x128xbf16, #tpu.memory_space<vmem>>, %arg3: memref<1x128xf32, #tpu.memory_space<vmem>>, %arg4: memref<2x128x128xbf16, #tpu.memory_space<vmem>>, %arg5: memref<2x1x128xf32, #tpu.memory_space<vmem>>, %arg6: memref<128x128xbf16, #tpu.memory_space<vmem>>, %arg7: memref<1x128xf32, #tpu.memory_space<vmem>>, %arg8: memref<8x128xf32, #tpu.memory_space<vmem>>, %arg9: memref<1x16x128xbf16, #tpu.memory_space<vmem>>, %arg10: memref<1x16x128xbf16, #tpu.memory_space<vmem>>) attributes {dimension_semantics = [#tpu.dimension_semantics<parallel>], iteration_bounds = array<i64: 2>, scalar_prefetch = 0 : i64, scratch_operands = 0 : i64, tpu.core_type = #tpu.core_type<tc>, window_params = [{transform_indices = @transform_0, window_bounds = array<i64: 1, 16, 128>}, {pipeline_mode = #tpu.pipeline_mode<synchronous>, transform_indices = @transform_1, window_bounds = array<i64: 128, 128>}, {pipeline_mode = #tpu.pipeline_mode<synchronous>, transform_indices = @transform_2, window_bounds = array<i64: 1, 128>}, {pipeline_mode = #tpu.pipeline_mode<synchronous>, transform_indices = @transform_3, window_bounds = array<i64: 2, 128, 128>}, {pipeline_mode = #tpu.pipeline_mode<synchronous>, transform_indices = @transform_4, window_bounds = array<i64: 2, 1, 128>}, {pipeline_mode = #tpu.pipeline_mode<synchronous>, transform_indices = @transform_5, window_bounds = array<i64: 128, 128>}, {pipeline_mode = #tpu.pipeline_mode<synchronous>, transform_indices = @transform_6, window_bounds = array<i64: 1, 128>}, {pipeline_mode = #tpu.pipeline_mode<synchronous>, transform_indices = @transform_7, window_bounds = array<i64: 8, 128>}, {transform_indices = @transform_8, window_bounds = array<i64: 1, 16, 128>}, {transform_indices = @transform_9, window_bounds = array<i64: 1, 16, 128>}]} {
    %c0 = arith.constant 0 : index
    %c0_0 = arith.constant 0 : index
    %0 = vector.load %arg8[%c0, %c0_0] : memref<8x128xf32, #tpu.memory_space<vmem>>, vector<8x128xf32>
    %c0_1 = arith.constant 0 : index
    %c0_2 = arith.constant 0 : index
    %c0_3 = arith.constant 0 : index
    %1 = vector.load %arg1[%c0_1, %c0_2, %c0_3] : memref<1x16x128xbf16, #tpu.memory_space<vmem>>, vector<1x16x128xbf16>
    %2 = vector.shape_cast %1 : vector<1x16x128xbf16> to vector<16x128xbf16>
    %3 = arith.extf %2 : vector<16x128xbf16> to vector<16x128xf32>
    %4 = vector.shape_cast %3 : vector<16x128xf32> to vector<1x16x128xf32>
    %cst = arith.constant dense<0.000000e+00> : vector<1xf32>
    %5 = vector.multi_reduction <add>, %4, %cst [1, 2] : vector<1x16x128xf32> to vector<1xf32>
    %6 = vector.shape_cast %5 : vector<1xf32> to vector<1x1x1xf32>
    %7 = vector.extract %6[0, 0, 0] : f32 from vector<1x1x1xf32>
    %cst_4 = arith.constant 4.8828125E-4 : f32
    %8 = arith.mulf %7, %cst_4 : f32
    %9 = vector.broadcast %8 : f32 to vector<16x128xf32>
    %10 = arith.subf %3, %9 : vector<16x128xf32>
    %11 = arith.mulf %10, %10 : vector<16x128xf32>
    %12 = vector.shape_cast %11 : vector<16x128xf32> to vector<1x16x128xf32>
    %cst_5 = arith.constant dense<0.000000e+00> : vector<1xf32>
    %13 = vector.multi_reduction <add>, %12, %cst_5 [1, 2] : vector<1x16x128xf32> to vector<1xf32>
    %14 = vector.shape_cast %13 : vector<1xf32> to vector<1x1x1xf32>
    %15 = vector.extract %14[0, 0, 0] : f32 from vector<1x1x1xf32>
    %cst_6 = arith.constant 4.8828125E-4 : f32
    %16 = arith.mulf %15, %cst_6 : f32
    %cst_7 = arith.constant 9.99999974E-6 : f32
    %17 = arith.addf %16, %cst_7 : f32
    %18 = math.rsqrt %17 : f32
    %19 = vector.broadcast %18 : f32 to vector<16x128xf32>
    %20 = arith.mulf %10, %19 : vector<16x128xf32>
    %21 = vector.extract_strided_slice %0 {offsets = [0, 0], sizes = [1, 128], strides = [1, 1]} : vector<8x128xf32> to vector<1x128xf32>
    %22 = vector.broadcast %21 : vector<1x128xf32> to vector<16x128xf32>
    %23 = arith.mulf %20, %22 : vector<16x128xf32>
    %24 = vector.extract_strided_slice %0 {offsets = [1, 0], sizes = [1, 128], strides = [1, 1]} : vector<8x128xf32> to vector<1x128xf32>
    %25 = vector.broadcast %24 : vector<1x128xf32> to vector<16x128xf32>
    %26 = arith.addf %23, %25 : vector<16x128xf32>
    %c0_8 = arith.constant 0 : index
    %c0_9 = arith.constant 0 : index
    %27 = vector.load %arg3[%c0_8, %c0_9] : memref<1x128xf32, #tpu.memory_space<vmem>>, vector<1x128xf32>
    %28 = arith.truncf %26 : vector<16x128xf32> to vector<16x128xbf16>
    %c0_10 = arith.constant 0 : index
    %c0_11 = arith.constant 0 : index
    %29 = vector.load %arg2[%c0_10, %c0_11] : memref<128x128xbf16, #tpu.memory_space<vmem>>, vector<128x128xbf16>
    %cst_12 = arith.constant dense<0.000000e+00> : vector<16x128xf32>
    %30 = tpu.matmul %28, %29, %cst_12 {dimension_numbers = #tpu.dot_dimension_numbers<[1], [0], [0], [1], [0, 0, 1, 1], [], []>} : vector<16x128xbf16>, vector<128x128xbf16>, vector<16x128xf32> -> vector<16x128xf32>
    %31 = vector.broadcast %27 : vector<1x128xf32> to vector<16x128xf32>
    %32 = arith.addf %30, %31 : vector<16x128xf32>
    %33 = vector.shape_cast %32 : vector<16x128xf32> to vector<1x16x128xf32>
    %cst_13 = arith.constant dense<0.000000e+00> : vector<1xf32>
    %34 = vector.multi_reduction <add>, %33, %cst_13 [1, 2] : vector<1x16x128xf32> to vector<1xf32>
    %35 = vector.shape_cast %34 : vector<1xf32> to vector<1x1x1xf32>
    %36 = vector.extract %35[0, 0, 0] : f32 from vector<1x1x1xf32>
    %cst_14 = arith.constant 4.8828125E-4 : f32
    %37 = arith.mulf %36, %cst_14 : f32
    %38 = vector.broadcast %37 : f32 to vector<16x128xf32>
    %39 = arith.subf %32, %38 : vector<16x128xf32>
    %40 = arith.mulf %39, %39 : vector<16x128xf32>
    %41 = vector.shape_cast %40 : vector<16x128xf32> to vector<1x16x128xf32>
    %cst_15 = arith.constant dense<0.000000e+00> : vector<1xf32>
    %42 = vector.multi_reduction <add>, %41, %cst_15 [1, 2] : vector<1x16x128xf32> to vector<1xf32>
    %43 = vector.shape_cast %42 : vector<1xf32> to vector<1x1x1xf32>
    %44 = vector.extract %43[0, 0, 0] : f32 from vector<1x1x1xf32>
    %cst_16 = arith.constant 4.8828125E-4 : f32
    %45 = arith.mulf %44, %cst_16 : f32
    %cst_17 = arith.constant 9.99999974E-6 : f32
    %46 = arith.addf %45, %cst_17 : f32
    %47 = math.rsqrt %46 : f32
    %48 = vector.broadcast %47 : f32 to vector<16x128xf32>
    %49 = arith.mulf %39, %48 : vector<16x128xf32>
    %50 = vector.extract_strided_slice %0 {offsets = [2, 0], sizes = [1, 128], strides = [1, 1]} : vector<8x128xf32> to vector<1x128xf32>
    %51 = vector.broadcast %50 : vector<1x128xf32> to vector<16x128xf32>
    %52 = arith.mulf %49, %51 : vector<16x128xf32>
    %53 = vector.extract_strided_slice %0 {offsets = [3, 0], sizes = [1, 128], strides = [1, 1]} : vector<8x128xf32> to vector<1x128xf32>
    %54 = vector.broadcast %53 : vector<1x128xf32> to vector<16x128xf32>
    %55 = arith.addf %52, %54 : vector<16x128xf32>
    %cst_18 = arith.constant 5.000000e-01 : f32
    %56 = vector.broadcast %cst_18 : f32 to vector<16x128xf32>
    %57 = arith.mulf %56, %55 : vector<16x128xf32>
    %cst_19 = arith.constant 4.471500e-02 : f32
    %58 = vector.broadcast %cst_19 : f32 to vector<16x128xf32>
    %59 = arith.mulf %58, %55 : vector<16x128xf32>
    %60 = arith.mulf %59, %55 : vector<16x128xf32>
    %61 = arith.mulf %60, %55 : vector<16x128xf32>
    %62 = arith.addf %55, %61 : vector<16x128xf32>
    %cst_20 = arith.constant 0.797884583 : f32
    %63 = vector.broadcast %cst_20 : f32 to vector<16x128xf32>
    %64 = arith.mulf %63, %62 : vector<16x128xf32>
    %65 = math.tanh %64 : vector<16x128xf32>
    %cst_21 = arith.constant 1.000000e+00 : f32
    %66 = vector.broadcast %cst_21 : f32 to vector<16x128xf32>
    %67 = arith.addf %66, %65 : vector<16x128xf32>
    %68 = arith.mulf %57, %67 : vector<16x128xf32>
    %69 = tpu.iota {dimensions = array<i32: 0>} : vector<16x1xi32>
    %c4_i32 = arith.constant 4 : i32
    %c0_i32 = arith.constant 0 : i32
    %70 = arith.cmpi eq, %c4_i32, %c0_i32 : i32
    %c1_i32 = arith.constant 1 : i32
    %71 = arith.select %70, %c1_i32, %c4_i32 : i32
    %72 = vector.broadcast %71 : i32 to vector<16x1xi32>
    %73 = arith.remsi %69, %72 : vector<16x1xi32>
    %c0_i32_22 = arith.constant 0 : i32
    %74 = vector.broadcast %c0_i32_22 : i32 to vector<16x1xi32>
    %75 = arith.cmpi ne, %73, %74 : vector<16x1xi32>
    %c0_i32_23 = arith.constant 0 : i32
    %76 = vector.broadcast %c0_i32_23 : i32 to vector<16x1xi32>
    %77 = arith.cmpi slt, %73, %76 : vector<16x1xi32>
    %c0_i32_24 = arith.constant 0 : i32
    %78 = arith.cmpi slt, %71, %c0_i32_24 : i32
    %79 = vector.broadcast %78 : i1 to vector<16x1xi1>
    %80 = vector.broadcast %79 : vector<16x1xi1> to vector<16x1xi1>
    %81 = arith.xori %77, %80 : vector<16x1xi1>
    %82 = arith.andi %81, %75 : vector<16x1xi1>
    %83 = vector.broadcast %71 : i32 to vector<16x1xi32>
    %84 = arith.addi %73, %83 : vector<16x1xi32>
    %85 = arith.select %82, %84, %73 : vector<16x1xi1>, vector<16x1xi32>
    %86 = tpu.iota {dimensions = array<i32: 1>} : vector<1x128xi32>
    %c0_i32_25 = arith.constant 0 : i32
    %87 = vector.broadcast %c0_i32_25 : i32 to vector<1x128xi32>
    %88 = arith.cmpi sge, %86, %87 : vector<1x128xi32>
    %c26_i32 = arith.constant 26 : i32
    %89 = vector.broadcast %c26_i32 : i32 to vector<1x128xi32>
    %90 = arith.cmpi slt, %86, %89 : vector<1x128xi32>
    %91 = arith.andi %88, %90 : vector<1x128xi1>
    %c26_i32_26 = arith.constant 26 : i32
    %92 = vector.broadcast %c26_i32_26 : i32 to vector<1x128xi32>
    %93 = arith.cmpi sge, %86, %92 : vector<1x128xi32>
    %c52_i32 = arith.constant 52 : i32
    %94 = vector.broadcast %c52_i32 : i32 to vector<1x128xi32>
    %95 = arith.cmpi slt, %86, %94 : vector<1x128xi32>
    %96 = arith.andi %93, %95 : vector<1x128xi1>
    %c52_i32_27 = arith.constant 52 : i32
    %97 = vector.broadcast %c52_i32_27 : i32 to vector<1x128xi32>
    %98 = arith.cmpi sge, %86, %97 : vector<1x128xi32>
    %c78_i32 = arith.constant 78 : i32
    %99 = vector.broadcast %c78_i32 : i32 to vector<1x128xi32>
    %100 = arith.cmpi slt, %86, %99 : vector<1x128xi32>
    %101 = arith.andi %98, %100 : vector<1x128xi1>
    %c78_i32_28 = arith.constant 78 : i32
    %102 = vector.broadcast %c78_i32_28 : i32 to vector<1x128xi32>
    %103 = arith.cmpi sge, %86, %102 : vector<1x128xi32>
    %c104_i32 = arith.constant 104 : i32
    %104 = vector.broadcast %c104_i32 : i32 to vector<1x128xi32>
    %105 = arith.cmpi slt, %86, %104 : vector<1x128xi32>
    %106 = arith.andi %103, %105 : vector<1x128xi1>
    %c104_i32_29 = arith.constant 104 : i32
    %107 = vector.broadcast %c104_i32_29 : i32 to vector<1x128xi32>
    %108 = arith.cmpi sge, %86, %107 : vector<1x128xi32>
    %c130_i32 = arith.constant 130 : i32
    %109 = vector.broadcast %c130_i32 : i32 to vector<1x128xi32>
    %110 = arith.cmpi slt, %86, %109 : vector<1x128xi32>
    %111 = arith.andi %108, %110 : vector<1x128xi1>
    %cst_30 = arith.constant 0.000000e+00 : f32
    %112 = vector.broadcast %cst_30 : f32 to vector<16x128xf32>
    %c14_i32 = arith.constant 14 : i32
    %113 = tpu.dynamic_rotate %68 by %c14_i32 dim 0 : vector<16x128xf32>, i32 -> vector<16x128xf32>
    %c-2_i32 = arith.constant -2 : i32
    %114 = vector.broadcast %c-2_i32 : i32 to vector<16x1xi32>
    %115 = arith.cmpi sge, %85, %114 : vector<16x1xi32>
    %116 = vector.broadcast %91 : vector<1x128xi1> to vector<16x128xi1>
    %117 = vector.broadcast %115 : vector<16x1xi1> to vector<16x128xi1>
    %118 = arith.andi %116, %117 : vector<16x128xi1>
    %c2_i32 = arith.constant 2 : i32
    %119 = vector.broadcast %c2_i32 : i32 to vector<16x1xi32>
    %120 = arith.cmpi slt, %85, %119 : vector<16x1xi32>
    %121 = vector.broadcast %120 : vector<16x1xi1> to vector<16x128xi1>
    %122 = arith.andi %118, %121 : vector<16x128xi1>
    %123 = arith.select %122, %113, %112 : vector<16x128xi1>, vector<16x128xf32>
    %c15_i32 = arith.constant 15 : i32
    %124 = tpu.dynamic_rotate %68 by %c15_i32 dim 0 : vector<16x128xf32>, i32 -> vector<16x128xf32>
    %c-1_i32 = arith.constant -1 : i32
    %125 = vector.broadcast %c-1_i32 : i32 to vector<16x1xi32>
    %126 = arith.cmpi sge, %85, %125 : vector<16x1xi32>
    %127 = vector.broadcast %96 : vector<1x128xi1> to vector<16x128xi1>
    %128 = vector.broadcast %126 : vector<16x1xi1> to vector<16x128xi1>
    %129 = arith.andi %127, %128 : vector<16x128xi1>
    %c3_i32 = arith.constant 3 : i32
    %130 = vector.broadcast %c3_i32 : i32 to vector<16x1xi32>
    %131 = arith.cmpi slt, %85, %130 : vector<16x1xi32>
    %132 = vector.broadcast %131 : vector<16x1xi1> to vector<16x128xi1>
    %133 = arith.andi %129, %132 : vector<16x128xi1>
    %134 = arith.select %133, %124, %123 : vector<16x128xi1>, vector<16x128xf32>
    %135 = vector.shape_cast %101 : vector<1x128xi1> to vector<1x128xi1>
    %136 = vector.broadcast %135 : vector<1x128xi1> to vector<16x128xi1>
    %137 = arith.select %136, %68, %134 : vector<16x128xi1>, vector<16x128xf32>
    %c1_i32_31 = arith.constant 1 : i32
    %138 = tpu.dynamic_rotate %68 by %c1_i32_31 dim 0 : vector<16x128xf32>, i32 -> vector<16x128xf32>
    %c1_i32_32 = arith.constant 1 : i32
    %139 = vector.broadcast %c1_i32_32 : i32 to vector<16x1xi32>
    %140 = arith.cmpi sge, %85, %139 : vector<16x1xi32>
    %141 = vector.broadcast %106 : vector<1x128xi1> to vector<16x128xi1>
    %142 = vector.broadcast %140 : vector<16x1xi1> to vector<16x128xi1>
    %143 = arith.andi %141, %142 : vector<16x128xi1>
    %c5_i32 = arith.constant 5 : i32
    %144 = vector.broadcast %c5_i32 : i32 to vector<16x1xi32>
    %145 = arith.cmpi slt, %85, %144 : vector<16x1xi32>
    %146 = vector.broadcast %145 : vector<16x1xi1> to vector<16x128xi1>
    %147 = arith.andi %143, %146 : vector<16x128xi1>
    %148 = arith.select %147, %138, %137 : vector<16x128xi1>, vector<16x128xf32>
    %c2_i32_33 = arith.constant 2 : i32
    %149 = tpu.dynamic_rotate %68 by %c2_i32_33 dim 0 : vector<16x128xf32>, i32 -> vector<16x128xf32>
    %c2_i32_34 = arith.constant 2 : i32
    %150 = vector.broadcast %c2_i32_34 : i32 to vector<16x1xi32>
    %151 = arith.cmpi sge, %85, %150 : vector<16x1xi32>
    %152 = vector.broadcast %111 : vector<1x128xi1> to vector<16x128xi1>
    %153 = vector.broadcast %151 : vector<16x1xi1> to vector<16x128xi1>
    %154 = arith.andi %152, %153 : vector<16x128xi1>
    %c6_i32 = arith.constant 6 : i32
    %155 = vector.broadcast %c6_i32 : i32 to vector<16x1xi32>
    %156 = arith.cmpi slt, %85, %155 : vector<16x1xi32>
    %157 = vector.broadcast %156 : vector<16x1xi1> to vector<16x128xi1>
    %158 = arith.andi %154, %157 : vector<16x128xi1>
    %159 = arith.select %158, %149, %148 : vector<16x128xi1>, vector<16x128xf32>
    %cst_35 = arith.constant 0.000000e+00 : f32
    %160 = vector.broadcast %cst_35 : f32 to vector<16x128xf32>
    %c6_i32_36 = arith.constant 6 : i32
    %161 = tpu.dynamic_rotate %68 by %c6_i32_36 dim 0 : vector<16x128xf32>, i32 -> vector<16x128xf32>
    %c-8_i32 = arith.constant -8 : i32
    %162 = vector.broadcast %c-8_i32 : i32 to vector<16x1xi32>
    %163 = arith.cmpi sge, %69, %162 : vector<16x1xi32>
    %164 = vector.broadcast %91 : vector<1x128xi1> to vector<16x128xi1>
    %165 = vector.broadcast %163 : vector<16x1xi1> to vector<16x128xi1>
    %166 = arith.andi %164, %165 : vector<16x128xi1>
    %c8_i32 = arith.constant 8 : i32
    %167 = vector.broadcast %c8_i32 : i32 to vector<16x1xi32>
    %168 = arith.cmpi slt, %69, %167 : vector<16x1xi32>
    %169 = vector.broadcast %168 : vector<16x1xi1> to vector<16x128xi1>
    %170 = arith.andi %166, %169 : vector<16x128xi1>
    %c-2_i32_37 = arith.constant -2 : i32
    %171 = vector.broadcast %c-2_i32_37 : i32 to vector<16x1xi32>
    %172 = arith.cmpi sge, %85, %171 : vector<16x1xi32>
    %173 = vector.broadcast %172 : vector<16x1xi1> to vector<16x128xi1>
    %174 = arith.andi %170, %173 : vector<16x128xi1>
    %c2_i32_38 = arith.constant 2 : i32
    %175 = vector.broadcast %c2_i32_38 : i32 to vector<16x1xi32>
    %176 = arith.cmpi slt, %85, %175 : vector<16x1xi32>
    %177 = vector.broadcast %176 : vector<16x1xi1> to vector<16x128xi1>
    %178 = arith.andi %174, %177 : vector<16x128xi1>
    %179 = arith.select %178, %161, %160 : vector<16x128xi1>, vector<16x128xf32>
    %c11_i32 = arith.constant 11 : i32
    %180 = tpu.dynamic_rotate %68 by %c11_i32 dim 0 : vector<16x128xf32>, i32 -> vector<16x128xf32>
    %c-4_i32 = arith.constant -4 : i32
    %181 = vector.broadcast %c-4_i32 : i32 to vector<16x1xi32>
    %182 = arith.cmpi sge, %69, %181 : vector<16x1xi32>
    %183 = vector.broadcast %96 : vector<1x128xi1> to vector<16x128xi1>
    %184 = vector.broadcast %182 : vector<16x1xi1> to vector<16x128xi1>
    %185 = arith.andi %183, %184 : vector<16x128xi1>
    %c12_i32 = arith.constant 12 : i32
    %186 = vector.broadcast %c12_i32 : i32 to vector<16x1xi32>
    %187 = arith.cmpi slt, %69, %186 : vector<16x1xi32>
    %188 = vector.broadcast %187 : vector<16x1xi1> to vector<16x128xi1>
    %189 = arith.andi %185, %188 : vector<16x128xi1>
    %c-1_i32_39 = arith.constant -1 : i32
    %190 = vector.broadcast %c-1_i32_39 : i32 to vector<16x1xi32>
    %191 = arith.cmpi sge, %85, %190 : vector<16x1xi32>
    %192 = vector.broadcast %191 : vector<16x1xi1> to vector<16x128xi1>
    %193 = arith.andi %189, %192 : vector<16x128xi1>
    %c3_i32_40 = arith.constant 3 : i32
    %194 = vector.broadcast %c3_i32_40 : i32 to vector<16x1xi32>
    %195 = arith.cmpi slt, %85, %194 : vector<16x1xi32>
    %196 = vector.broadcast %195 : vector<16x1xi1> to vector<16x128xi1>
    %197 = arith.andi %193, %196 : vector<16x128xi1>
    %198 = arith.select %197, %180, %179 : vector<16x128xi1>, vector<16x128xf32>
    %199 = vector.shape_cast %101 : vector<1x128xi1> to vector<1x128xi1>
    %200 = vector.broadcast %199 : vector<1x128xi1> to vector<16x128xi1>
    %201 = arith.select %200, %68, %198 : vector<16x128xi1>, vector<16x128xf32>
    %c5_i32_41 = arith.constant 5 : i32
    %202 = tpu.dynamic_rotate %68 by %c5_i32_41 dim 0 : vector<16x128xf32>, i32 -> vector<16x128xf32>
    %c4_i32_42 = arith.constant 4 : i32
    %203 = vector.broadcast %c4_i32_42 : i32 to vector<16x1xi32>
    %204 = arith.cmpi sge, %69, %203 : vector<16x1xi32>
    %205 = vector.broadcast %106 : vector<1x128xi1> to vector<16x128xi1>
    %206 = vector.broadcast %204 : vector<16x1xi1> to vector<16x128xi1>
    %207 = arith.andi %205, %206 : vector<16x128xi1>
    %c20_i32 = arith.constant 20 : i32
    %208 = vector.broadcast %c20_i32 : i32 to vector<16x1xi32>
    %209 = arith.cmpi slt, %69, %208 : vector<16x1xi32>
    %210 = vector.broadcast %209 : vector<16x1xi1> to vector<16x128xi1>
    %211 = arith.andi %207, %210 : vector<16x128xi1>
    %c1_i32_43 = arith.constant 1 : i32
    %212 = vector.broadcast %c1_i32_43 : i32 to vector<16x1xi32>
    %213 = arith.cmpi sge, %85, %212 : vector<16x1xi32>
    %214 = vector.broadcast %213 : vector<16x1xi1> to vector<16x128xi1>
    %215 = arith.andi %211, %214 : vector<16x128xi1>
    %c5_i32_44 = arith.constant 5 : i32
    %216 = vector.broadcast %c5_i32_44 : i32 to vector<16x1xi32>
    %217 = arith.cmpi slt, %85, %216 : vector<16x1xi32>
    %218 = vector.broadcast %217 : vector<16x1xi1> to vector<16x128xi1>
    %219 = arith.andi %215, %218 : vector<16x128xi1>
    %220 = arith.select %219, %202, %201 : vector<16x128xi1>, vector<16x128xf32>
    %c10_i32 = arith.constant 10 : i32
    %221 = tpu.dynamic_rotate %68 by %c10_i32 dim 0 : vector<16x128xf32>, i32 -> vector<16x128xf32>
    %c8_i32_45 = arith.constant 8 : i32
    %222 = vector.broadcast %c8_i32_45 : i32 to vector<16x1xi32>
    %223 = arith.cmpi sge, %69, %222 : vector<16x1xi32>
    %224 = vector.broadcast %111 : vector<1x128xi1> to vector<16x128xi1>
    %225 = vector.broadcast %223 : vector<16x1xi1> to vector<16x128xi1>
    %226 = arith.andi %224, %225 : vector<16x128xi1>
    %c24_i32 = arith.constant 24 : i32
    %227 = vector.broadcast %c24_i32 : i32 to vector<16x1xi32>
    %228 = arith.cmpi slt, %69, %227 : vector<16x1xi32>
    %229 = vector.broadcast %228 : vector<16x1xi1> to vector<16x128xi1>
    %230 = arith.andi %226, %229 : vector<16x128xi1>
    %c2_i32_46 = arith.constant 2 : i32
    %231 = vector.broadcast %c2_i32_46 : i32 to vector<16x1xi32>
    %232 = arith.cmpi sge, %85, %231 : vector<16x1xi32>
    %233 = vector.broadcast %232 : vector<16x1xi1> to vector<16x128xi1>
    %234 = arith.andi %230, %233 : vector<16x128xi1>
    %c6_i32_47 = arith.constant 6 : i32
    %235 = vector.broadcast %c6_i32_47 : i32 to vector<16x1xi32>
    %236 = arith.cmpi slt, %85, %235 : vector<16x1xi32>
    %237 = vector.broadcast %236 : vector<16x1xi1> to vector<16x128xi1>
    %238 = arith.andi %234, %237 : vector<16x128xi1>
    %239 = arith.select %238, %221, %220 : vector<16x128xi1>, vector<16x128xf32>
    %cst_48 = arith.constant 0.000000e+00 : f32
    %240 = vector.broadcast %cst_48 : f32 to vector<16x128xf32>
    %c8_i32_49 = arith.constant 8 : i32
    %241 = tpu.dynamic_rotate %68 by %c8_i32_49 dim 0 : vector<16x128xf32>, i32 -> vector<16x128xf32>
    %c-8_i32_50 = arith.constant -8 : i32
    %242 = vector.broadcast %c-8_i32_50 : i32 to vector<16x1xi32>
    %243 = arith.cmpi sge, %69, %242 : vector<16x1xi32>
    %244 = vector.broadcast %91 : vector<1x128xi1> to vector<16x128xi1>
    %245 = vector.broadcast %243 : vector<16x1xi1> to vector<16x128xi1>
    %246 = arith.andi %244, %245 : vector<16x128xi1>
    %c8_i32_51 = arith.constant 8 : i32
    %247 = vector.broadcast %c8_i32_51 : i32 to vector<16x1xi32>
    %248 = arith.cmpi slt, %69, %247 : vector<16x1xi32>
    %249 = vector.broadcast %248 : vector<16x1xi1> to vector<16x128xi1>
    %250 = arith.andi %246, %249 : vector<16x128xi1>
    %251 = arith.select %250, %241, %240 : vector<16x128xi1>, vector<16x128xf32>
    %c12_i32_52 = arith.constant 12 : i32
    %252 = tpu.dynamic_rotate %68 by %c12_i32_52 dim 0 : vector<16x128xf32>, i32 -> vector<16x128xf32>
    %c-4_i32_53 = arith.constant -4 : i32
    %253 = vector.broadcast %c-4_i32_53 : i32 to vector<16x1xi32>
    %254 = arith.cmpi sge, %69, %253 : vector<16x1xi32>
    %255 = vector.broadcast %96 : vector<1x128xi1> to vector<16x128xi1>
    %256 = vector.broadcast %254 : vector<16x1xi1> to vector<16x128xi1>
    %257 = arith.andi %255, %256 : vector<16x128xi1>
    %c12_i32_54 = arith.constant 12 : i32
    %258 = vector.broadcast %c12_i32_54 : i32 to vector<16x1xi32>
    %259 = arith.cmpi slt, %69, %258 : vector<16x1xi32>
    %260 = vector.broadcast %259 : vector<16x1xi1> to vector<16x128xi1>
    %261 = arith.andi %257, %260 : vector<16x128xi1>
    %262 = arith.select %261, %252, %251 : vector<16x128xi1>, vector<16x128xf32>
    %263 = vector.shape_cast %101 : vector<1x128xi1> to vector<1x128xi1>
    %264 = vector.broadcast %263 : vector<1x128xi1> to vector<16x128xi1>
    %265 = arith.select %264, %68, %262 : vector<16x128xi1>, vector<16x128xf32>
    %c4_i32_55 = arith.constant 4 : i32
    %266 = tpu.dynamic_rotate %68 by %c4_i32_55 dim 0 : vector<16x128xf32>, i32 -> vector<16x128xf32>
    %c4_i32_56 = arith.constant 4 : i32
    %267 = vector.broadcast %c4_i32_56 : i32 to vector<16x1xi32>
    %268 = arith.cmpi sge, %69, %267 : vector<16x1xi32>
    %269 = vector.broadcast %106 : vector<1x128xi1> to vector<16x128xi1>
    %270 = vector.broadcast %268 : vector<16x1xi1> to vector<16x128xi1>
    %271 = arith.andi %269, %270 : vector<16x128xi1>
    %c20_i32_57 = arith.constant 20 : i32
    %272 = vector.broadcast %c20_i32_57 : i32 to vector<16x1xi32>
    %273 = arith.cmpi slt, %69, %272 : vector<16x1xi32>
    %274 = vector.broadcast %273 : vector<16x1xi1> to vector<16x128xi1>
    %275 = arith.andi %271, %274 : vector<16x128xi1>
    %276 = arith.select %275, %266, %265 : vector<16x128xi1>, vector<16x128xf32>
    %c8_i32_58 = arith.constant 8 : i32
    %277 = tpu.dynamic_rotate %68 by %c8_i32_58 dim 0 : vector<16x128xf32>, i32 -> vector<16x128xf32>
    %c8_i32_59 = arith.constant 8 : i32
    %278 = vector.broadcast %c8_i32_59 : i32 to vector<16x1xi32>
    %279 = arith.cmpi sge, %69, %278 : vector<16x1xi32>
    %280 = vector.broadcast %111 : vector<1x128xi1> to vector<16x128xi1>
    %281 = vector.broadcast %279 : vector<16x1xi1> to vector<16x128xi1>
    %282 = arith.andi %280, %281 : vector<16x128xi1>
    %c24_i32_60 = arith.constant 24 : i32
    %283 = vector.broadcast %c24_i32_60 : i32 to vector<16x1xi32>
    %284 = arith.cmpi slt, %69, %283 : vector<16x1xi32>
    %285 = vector.broadcast %284 : vector<16x1xi1> to vector<16x128xi1>
    %286 = arith.andi %282, %285 : vector<16x128xi1>
    %287 = arith.select %286, %277, %276 : vector<16x128xi1>, vector<16x128xf32>
    %cst_61 = arith.constant 0.000000e+00 : f32
    %288 = vector.broadcast %cst_61 : f32 to vector<16x128xf32>
    %c10_i32_62 = arith.constant 10 : i32
    %289 = tpu.dynamic_rotate %68 by %c10_i32_62 dim 0 : vector<16x128xf32>, i32 -> vector<16x128xf32>
    %c-8_i32_63 = arith.constant -8 : i32
    %290 = vector.broadcast %c-8_i32_63 : i32 to vector<16x1xi32>
    %291 = arith.cmpi sge, %69, %290 : vector<16x1xi32>
    %292 = vector.broadcast %91 : vector<1x128xi1> to vector<16x128xi1>
    %293 = vector.broadcast %291 : vector<16x1xi1> to vector<16x128xi1>
    %294 = arith.andi %292, %293 : vector<16x128xi1>
    %c8_i32_64 = arith.constant 8 : i32
    %295 = vector.broadcast %c8_i32_64 : i32 to vector<16x1xi32>
    %296 = arith.cmpi slt, %69, %295 : vector<16x1xi32>
    %297 = vector.broadcast %296 : vector<16x1xi1> to vector<16x128xi1>
    %298 = arith.andi %294, %297 : vector<16x128xi1>
    %c2_i32_65 = arith.constant 2 : i32
    %299 = vector.broadcast %c2_i32_65 : i32 to vector<16x1xi32>
    %300 = arith.cmpi sge, %85, %299 : vector<16x1xi32>
    %301 = vector.broadcast %300 : vector<16x1xi1> to vector<16x128xi1>
    %302 = arith.andi %298, %301 : vector<16x128xi1>
    %c6_i32_66 = arith.constant 6 : i32
    %303 = vector.broadcast %c6_i32_66 : i32 to vector<16x1xi32>
    %304 = arith.cmpi slt, %85, %303 : vector<16x1xi32>
    %305 = vector.broadcast %304 : vector<16x1xi1> to vector<16x128xi1>
    %306 = arith.andi %302, %305 : vector<16x128xi1>
    %307 = arith.select %306, %289, %288 : vector<16x128xi1>, vector<16x128xf32>
    %c13_i32 = arith.constant 13 : i32
    %308 = tpu.dynamic_rotate %68 by %c13_i32 dim 0 : vector<16x128xf32>, i32 -> vector<16x128xf32>
    %c-4_i32_67 = arith.constant -4 : i32
    %309 = vector.broadcast %c-4_i32_67 : i32 to vector<16x1xi32>
    %310 = arith.cmpi sge, %69, %309 : vector<16x1xi32>
    %311 = vector.broadcast %96 : vector<1x128xi1> to vector<16x128xi1>
    %312 = vector.broadcast %310 : vector<16x1xi1> to vector<16x128xi1>
    %313 = arith.andi %311, %312 : vector<16x128xi1>
    %c12_i32_68 = arith.constant 12 : i32
    %314 = vector.broadcast %c12_i32_68 : i32 to vector<16x1xi32>
    %315 = arith.cmpi slt, %69, %314 : vector<16x1xi32>
    %316 = vector.broadcast %315 : vector<16x1xi1> to vector<16x128xi1>
    %317 = arith.andi %313, %316 : vector<16x128xi1>
    %c1_i32_69 = arith.constant 1 : i32
    %318 = vector.broadcast %c1_i32_69 : i32 to vector<16x1xi32>
    %319 = arith.cmpi sge, %85, %318 : vector<16x1xi32>
    %320 = vector.broadcast %319 : vector<16x1xi1> to vector<16x128xi1>
    %321 = arith.andi %317, %320 : vector<16x128xi1>
    %c5_i32_70 = arith.constant 5 : i32
    %322 = vector.broadcast %c5_i32_70 : i32 to vector<16x1xi32>
    %323 = arith.cmpi slt, %85, %322 : vector<16x1xi32>
    %324 = vector.broadcast %323 : vector<16x1xi1> to vector<16x128xi1>
    %325 = arith.andi %321, %324 : vector<16x128xi1>
    %326 = arith.select %325, %308, %307 : vector<16x128xi1>, vector<16x128xf32>
    %327 = vector.shape_cast %101 : vector<1x128xi1> to vector<1x128xi1>
    %328 = vector.broadcast %327 : vector<1x128xi1> to vector<16x128xi1>
    %329 = arith.select %328, %68, %326 : vector<16x128xi1>, vector<16x128xf32>
    %c3_i32_71 = arith.constant 3 : i32
    %330 = tpu.dynamic_rotate %68 by %c3_i32_71 dim 0 : vector<16x128xf32>, i32 -> vector<16x128xf32>
    %c4_i32_72 = arith.constant 4 : i32
    %331 = vector.broadcast %c4_i32_72 : i32 to vector<16x1xi32>
    %332 = arith.cmpi sge, %69, %331 : vector<16x1xi32>
    %333 = vector.broadcast %106 : vector<1x128xi1> to vector<16x128xi1>
    %334 = vector.broadcast %332 : vector<16x1xi1> to vector<16x128xi1>
    %335 = arith.andi %333, %334 : vector<16x128xi1>
    %c20_i32_73 = arith.constant 20 : i32
    %336 = vector.broadcast %c20_i32_73 : i32 to vector<16x1xi32>
    %337 = arith.cmpi slt, %69, %336 : vector<16x1xi32>
    %338 = vector.broadcast %337 : vector<16x1xi1> to vector<16x128xi1>
    %339 = arith.andi %335, %338 : vector<16x128xi1>
    %c-1_i32_74 = arith.constant -1 : i32
    %340 = vector.broadcast %c-1_i32_74 : i32 to vector<16x1xi32>
    %341 = arith.cmpi sge, %85, %340 : vector<16x1xi32>
    %342 = vector.broadcast %341 : vector<16x1xi1> to vector<16x128xi1>
    %343 = arith.andi %339, %342 : vector<16x128xi1>
    %c3_i32_75 = arith.constant 3 : i32
    %344 = vector.broadcast %c3_i32_75 : i32 to vector<16x1xi32>
    %345 = arith.cmpi slt, %85, %344 : vector<16x1xi32>
    %346 = vector.broadcast %345 : vector<16x1xi1> to vector<16x128xi1>
    %347 = arith.andi %343, %346 : vector<16x128xi1>
    %348 = arith.select %347, %330, %329 : vector<16x128xi1>, vector<16x128xf32>
    %c6_i32_76 = arith.constant 6 : i32
    %349 = tpu.dynamic_rotate %68 by %c6_i32_76 dim 0 : vector<16x128xf32>, i32 -> vector<16x128xf32>
    %c8_i32_77 = arith.constant 8 : i32
    %350 = vector.broadcast %c8_i32_77 : i32 to vector<16x1xi32>
    %351 = arith.cmpi sge, %69, %350 : vector<16x1xi32>
    %352 = vector.broadcast %111 : vector<1x128xi1> to vector<16x128xi1>
    %353 = vector.broadcast %351 : vector<16x1xi1> to vector<16x128xi1>
    %354 = arith.andi %352, %353 : vector<16x128xi1>
    %c24_i32_78 = arith.constant 24 : i32
    %355 = vector.broadcast %c24_i32_78 : i32 to vector<16x1xi32>
    %356 = arith.cmpi slt, %69, %355 : vector<16x1xi32>
    %357 = vector.broadcast %356 : vector<16x1xi1> to vector<16x128xi1>
    %358 = arith.andi %354, %357 : vector<16x128xi1>
    %c-2_i32_79 = arith.constant -2 : i32
    %359 = vector.broadcast %c-2_i32_79 : i32 to vector<16x1xi32>
    %360 = arith.cmpi sge, %85, %359 : vector<16x1xi32>
    %361 = vector.broadcast %360 : vector<16x1xi1> to vector<16x128xi1>
    %362 = arith.andi %358, %361 : vector<16x128xi1>
    %c2_i32_80 = arith.constant 2 : i32
    %363 = vector.broadcast %c2_i32_80 : i32 to vector<16x1xi32>
    %364 = arith.cmpi slt, %85, %363 : vector<16x1xi32>
    %365 = vector.broadcast %364 : vector<16x1xi1> to vector<16x128xi1>
    %366 = arith.andi %362, %365 : vector<16x128xi1>
    %367 = arith.select %366, %349, %348 : vector<16x128xi1>, vector<16x128xf32>
    %368 = tpu.concatenate %159, %239 in 0 : vector<16x128xf32>, vector<16x128xf32> -> vector<32x128xf32>
    %369 = arith.truncf %368 : vector<32x128xf32> to vector<32x128xbf16>
    %c0_81 = arith.constant 0 : index
    %c0_82 = arith.constant 0 : index
    %c0_83 = arith.constant 0 : index
    %370 = vector.load %arg4[%c0_81, %c0_82, %c0_83] : memref<2x128x128xbf16, #tpu.memory_space<vmem>>, vector<1x128x128xbf16>
    %371 = vector.shape_cast %370 : vector<1x128x128xbf16> to vector<128x128xbf16>
    %cst_84 = arith.constant dense<0.000000e+00> : vector<32x128xf32>
    %372 = tpu.matmul %369, %371, %cst_84 {dimension_numbers = #tpu.dot_dimension_numbers<[1], [0], [0], [1], [0, 0, 1, 1], [], []>} : vector<32x128xbf16>, vector<128x128xbf16>, vector<32x128xf32> -> vector<32x128xf32>
    %c0_85 = arith.constant 0 : index
    %c0_86 = arith.constant 0 : index
    %c0_87 = arith.constant 0 : index
    %373 = vector.load %arg5[%c0_85, %c0_86, %c0_87] : memref<2x1x128xf32, #tpu.memory_space<vmem>>, vector<1x1x128xf32>
    %374 = vector.shape_cast %373 : vector<1x1x128xf32> to vector<1x128xf32>
    %375 = vector.broadcast %374 : vector<1x128xf32> to vector<32x128xf32>
    %376 = arith.addf %372, %375 : vector<32x128xf32>
    %cst_88 = arith.constant 5.000000e-01 : f32
    %377 = vector.broadcast %cst_88 : f32 to vector<32x128xf32>
    %378 = arith.mulf %377, %376 : vector<32x128xf32>
    %cst_89 = arith.constant 4.471500e-02 : f32
    %379 = vector.broadcast %cst_89 : f32 to vector<32x128xf32>
    %380 = arith.mulf %379, %376 : vector<32x128xf32>
    %381 = arith.mulf %380, %376 : vector<32x128xf32>
    %382 = arith.mulf %381, %376 : vector<32x128xf32>
    %383 = arith.addf %376, %382 : vector<32x128xf32>
    %cst_90 = arith.constant 0.797884583 : f32
    %384 = vector.broadcast %cst_90 : f32 to vector<32x128xf32>
    %385 = arith.mulf %384, %383 : vector<32x128xf32>
    %386 = math.tanh %385 : vector<32x128xf32>
    %cst_91 = arith.constant 1.000000e+00 : f32
    %387 = vector.broadcast %cst_91 : f32 to vector<32x128xf32>
    %388 = arith.addf %387, %386 : vector<32x128xf32>
    %389 = arith.mulf %378, %388 : vector<32x128xf32>
    %390 = vector.extract_strided_slice %389 {offsets = [0, 0], sizes = [16, 128], strides = [1, 1]} : vector<32x128xf32> to vector<16x128xf32>
    %391 = vector.extract_strided_slice %389 {offsets = [16, 0], sizes = [16, 128], strides = [1, 1]} : vector<32x128xf32> to vector<16x128xf32>
    %392 = arith.addf %390, %391 : vector<16x128xf32>
    %393 = tpu.concatenate %287, %367 in 0 : vector<16x128xf32>, vector<16x128xf32> -> vector<32x128xf32>
    %394 = arith.truncf %393 : vector<32x128xf32> to vector<32x128xbf16>
    %c1 = arith.constant 1 : index
    %c0_92 = arith.constant 0 : index
    %c0_93 = arith.constant 0 : index
    %395 = vector.load %arg4[%c1, %c0_92, %c0_93] : memref<2x128x128xbf16, #tpu.memory_space<vmem>>, vector<1x128x128xbf16>
    %396 = vector.shape_cast %395 : vector<1x128x128xbf16> to vector<128x128xbf16>
    %cst_94 = arith.constant dense<0.000000e+00> : vector<32x128xf32>
    %397 = tpu.matmul %394, %396, %cst_94 {dimension_numbers = #tpu.dot_dimension_numbers<[1], [0], [0], [1], [0, 0, 1, 1], [], []>} : vector<32x128xbf16>, vector<128x128xbf16>, vector<32x128xf32> -> vector<32x128xf32>
    %c1_95 = arith.constant 1 : index
    %c0_96 = arith.constant 0 : index
    %c0_97 = arith.constant 0 : index
    %398 = vector.load %arg5[%c1_95, %c0_96, %c0_97] : memref<2x1x128xf32, #tpu.memory_space<vmem>>, vector<1x1x128xf32>
    %399 = vector.shape_cast %398 : vector<1x1x128xf32> to vector<1x128xf32>
    %400 = vector.broadcast %399 : vector<1x128xf32> to vector<32x128xf32>
    %401 = arith.addf %397, %400 : vector<32x128xf32>
    %cst_98 = arith.constant 5.000000e-01 : f32
    %402 = vector.broadcast %cst_98 : f32 to vector<32x128xf32>
    %403 = arith.mulf %402, %401 : vector<32x128xf32>
    %cst_99 = arith.constant 4.471500e-02 : f32
    %404 = vector.broadcast %cst_99 : f32 to vector<32x128xf32>
    %405 = arith.mulf %404, %401 : vector<32x128xf32>
    %406 = arith.mulf %405, %401 : vector<32x128xf32>
    %407 = arith.mulf %406, %401 : vector<32x128xf32>
    %408 = arith.addf %401, %407 : vector<32x128xf32>
    %cst_100 = arith.constant 0.797884583 : f32
    %409 = vector.broadcast %cst_100 : f32 to vector<32x128xf32>
    %410 = arith.mulf %409, %408 : vector<32x128xf32>
    %411 = math.tanh %410 : vector<32x128xf32>
    %cst_101 = arith.constant 1.000000e+00 : f32
    %412 = vector.broadcast %cst_101 : f32 to vector<32x128xf32>
    %413 = arith.addf %412, %411 : vector<32x128xf32>
    %414 = arith.mulf %403, %413 : vector<32x128xf32>
    %415 = vector.extract_strided_slice %414 {offsets = [0, 0], sizes = [16, 128], strides = [1, 1]} : vector<32x128xf32> to vector<16x128xf32>
    %416 = vector.extract_strided_slice %414 {offsets = [16, 0], sizes = [16, 128], strides = [1, 1]} : vector<32x128xf32> to vector<16x128xf32>
    %417 = arith.addf %415, %416 : vector<16x128xf32>
    %418 = arith.addf %392, %417 : vector<16x128xf32>
    %419 = vector.shape_cast %418 : vector<16x128xf32> to vector<1x16x128xf32>
    %cst_102 = arith.constant dense<0.000000e+00> : vector<1xf32>
    %420 = vector.multi_reduction <add>, %419, %cst_102 [1, 2] : vector<1x16x128xf32> to vector<1xf32>
    %421 = vector.shape_cast %420 : vector<1xf32> to vector<1x1x1xf32>
    %422 = vector.extract %421[0, 0, 0] : f32 from vector<1x1x1xf32>
    %cst_103 = arith.constant 4.8828125E-4 : f32
    %423 = arith.mulf %422, %cst_103 : f32
    %424 = vector.broadcast %423 : f32 to vector<16x128xf32>
    %425 = arith.subf %418, %424 : vector<16x128xf32>
    %426 = arith.mulf %425, %425 : vector<16x128xf32>
    %427 = vector.shape_cast %426 : vector<16x128xf32> to vector<1x16x128xf32>
    %cst_104 = arith.constant dense<0.000000e+00> : vector<1xf32>
    %428 = vector.multi_reduction <add>, %427, %cst_104 [1, 2] : vector<1x16x128xf32> to vector<1xf32>
    %429 = vector.shape_cast %428 : vector<1xf32> to vector<1x1x1xf32>
    %430 = vector.extract %429[0, 0, 0] : f32 from vector<1x1x1xf32>
    %cst_105 = arith.constant 4.8828125E-4 : f32
    %431 = arith.mulf %430, %cst_105 : f32
    %cst_106 = arith.constant 9.99999974E-6 : f32
    %432 = arith.addf %431, %cst_106 : f32
    %433 = math.rsqrt %432 : f32
    %434 = vector.broadcast %433 : f32 to vector<16x128xf32>
    %435 = arith.mulf %425, %434 : vector<16x128xf32>
    %436 = vector.extract_strided_slice %0 {offsets = [4, 0], sizes = [1, 128], strides = [1, 1]} : vector<8x128xf32> to vector<1x128xf32>
    %437 = vector.broadcast %436 : vector<1x128xf32> to vector<16x128xf32>
    %438 = arith.mulf %435, %437 : vector<16x128xf32>
    %439 = vector.extract_strided_slice %0 {offsets = [5, 0], sizes = [1, 128], strides = [1, 1]} : vector<8x128xf32> to vector<1x128xf32>
    %440 = vector.broadcast %439 : vector<1x128xf32> to vector<16x128xf32>
    %441 = arith.addf %438, %440 : vector<16x128xf32>
    %c0_107 = arith.constant 0 : index
    %c0_108 = arith.constant 0 : index
    %442 = vector.load %arg7[%c0_107, %c0_108] : memref<1x128xf32, #tpu.memory_space<vmem>>, vector<1x128xf32>
    %443 = arith.truncf %441 : vector<16x128xf32> to vector<16x128xbf16>
    %c0_109 = arith.constant 0 : index
    %c0_110 = arith.constant 0 : index
    %444 = vector.load %arg6[%c0_109, %c0_110] : memref<128x128xbf16, #tpu.memory_space<vmem>>, vector<128x128xbf16>
    %cst_111 = arith.constant dense<0.000000e+00> : vector<16x128xf32>
    %445 = tpu.matmul %443, %444, %cst_111 {dimension_numbers = #tpu.dot_dimension_numbers<[1], [0], [0], [1], [0, 0, 1, 1], [], []>} : vector<16x128xbf16>, vector<128x128xbf16>, vector<16x128xf32> -> vector<16x128xf32>
    %446 = vector.broadcast %442 : vector<1x128xf32> to vector<16x128xf32>
    %447 = arith.addf %445, %446 : vector<16x128xf32>
    %448 = arith.addf %447, %3 : vector<16x128xf32>
    %449 = arith.truncf %448 : vector<16x128xf32> to vector<16x128xbf16>
    %c0_112 = arith.constant 0 : index
    %c0_113 = arith.constant 0 : index
    %c0_114 = arith.constant 0 : index
    %450 = vector.load %arg9[%c0_112, %c0_113, %c0_114] : memref<1x16x128xbf16, #tpu.memory_space<vmem>>, vector<1x16x128xbf16>
    %451 = vector.shape_cast %450 : vector<1x16x128xbf16> to vector<16x128xbf16>
    %452 = vector.shape_cast %449 : vector<16x128xbf16> to vector<1x16x128xbf16>
    tpu.vector_store %arg9[%c0_112, %c0_113, %c0_114], %452 {strides = array<i32>} : memref<1x16x128xbf16, #tpu.memory_space<vmem>>, vector<1x16x128xbf16>,
    %453 = vector.shape_cast %448 : vector<16x128xf32> to vector<1x16x128xf32>
    %cst_115 = arith.constant dense<0.000000e+00> : vector<1xf32>
    %454 = vector.multi_reduction <add>, %453, %cst_115 [1, 2] : vector<1x16x128xf32> to vector<1xf32>
    %455 = vector.shape_cast %454 : vector<1xf32> to vector<1x1x1xf32>
    %456 = vector.extract %455[0, 0, 0] : f32 from vector<1x1x1xf32>
    %cst_116 = arith.constant 4.8828125E-4 : f32
    %457 = arith.mulf %456, %cst_116 : f32
    %458 = vector.broadcast %457 : f32 to vector<16x128xf32>
    %459 = arith.subf %448, %458 : vector<16x128xf32>
    %460 = arith.mulf %459, %459 : vector<16x128xf32>
    %461 = vector.shape_cast %460 : vector<16x128xf32> to vector<1x16x128xf32>
    %cst_117 = arith.constant dense<0.000000e+00> : vector<1xf32>
    %462 = vector.multi_reduction <add>, %461, %cst_117 [1, 2] : vector<1x16x128xf32> to vector<1xf32>
    %463 = vector.shape_cast %462 : vector<1xf32> to vector<1x1x1xf32>
    %464 = vector.extract %463[0, 0, 0] : f32 from vector<1x1x1xf32>
    %cst_118 = arith.constant 4.8828125E-4 : f32
    %465 = arith.mulf %464, %cst_118 : f32
    %cst_119 = arith.constant 9.99999974E-6 : f32
    %466 = arith.addf %465, %cst_119 : f32
    %467 = math.rsqrt %466 : f32
    %468 = vector.broadcast %467 : f32 to vector<16x128xf32>
    %469 = arith.mulf %459, %468 : vector<16x128xf32>
    %470 = vector.extract_strided_slice %0 {offsets = [6, 0], sizes = [1, 128], strides = [1, 1]} : vector<8x128xf32> to vector<1x128xf32>
    %471 = vector.broadcast %470 : vector<1x128xf32> to vector<16x128xf32>
    %472 = arith.mulf %469, %471 : vector<16x128xf32>
    %473 = vector.extract_strided_slice %0 {offsets = [7, 0], sizes = [1, 128], strides = [1, 1]} : vector<8x128xf32> to vector<1x128xf32>
    %474 = vector.broadcast %473 : vector<1x128xf32> to vector<16x128xf32>
    %475 = arith.addf %472, %474 : vector<16x128xf32>
    %476 = arith.truncf %475 : vector<16x128xf32> to vector<16x128xbf16>
    %c0_120 = arith.constant 0 : index
    %c0_121 = arith.constant 0 : index
    %c0_122 = arith.constant 0 : index
    %477 = vector.load %arg10[%c0_120, %c0_121, %c0_122] : memref<1x16x128xbf16, #tpu.memory_space<vmem>>, vector<1x16x128xbf16>
    %478 = vector.shape_cast %477 : vector<1x16x128xbf16> to vector<16x128xbf16>
    %479 = vector.shape_cast %476 : vector<16x128xbf16> to vector<1x16x128xbf16>
    tpu.vector_store %arg10[%c0_120, %c0_121, %c0_122], %479 {strides = array<i32>} : memref<1x16x128xbf16, #tpu.memory_space<vmem>>, vector<1x16x128xbf16>,
    return
  }
  func.func @transform_0(%arg0: i32) -> (i32, i32, i32) {
    %c0_i32 = arith.constant 0 : i32
    %c0_i32_0 = arith.constant 0 : i32
    %c0_i32_1 = arith.constant 0 : i32
    return %arg0, %c0_i32, %c0_i32_0 : i32, i32, i32
  }
  func.func @transform_1(%arg0: i32) -> (i32, i32) {
    %c0_i32 = arith.constant 0 : i32
    %c0_i32_0 = arith.constant 0 : i32
    %c0_i32_1 = arith.constant 0 : i32
    return %c0_i32, %c0_i32_0 : i32, i32
  }
  func.func @transform_2(%arg0: i32) -> (i32, i32) {
    %c0_i32 = arith.constant 0 : i32
    %c0_i32_0 = arith.constant 0 : i32
    %c0_i32_1 = arith.constant 0 : i32
    return %c0_i32, %c0_i32_0 : i32, i32
  }
  func.func @transform_3(%arg0: i32) -> (i32, i32, i32) {
    %c0_i32 = arith.constant 0 : i32
    %c0_i32_0 = arith.constant 0 : i32
    %c0_i32_1 = arith.constant 0 : i32
    %c0_i32_2 = arith.constant 0 : i32
    return %c0_i32, %c0_i32_0, %c0_i32_1 : i32, i32, i32
  }
  func.func @transform_4(%arg0: i32) -> (i32, i32, i32) {
    %c0_i32 = arith.constant 0 : i32
    %c0_i32_0 = arith.constant 0 : i32
    %c0_i32_1 = arith.constant 0 : i32
    %c0_i32_2 = arith.constant 0 : i32
    return %c0_i32, %c0_i32_0, %c0_i32_1 : i32, i32, i32
  }
  func.func @transform_5(%arg0: i32) -> (i32, i32) {
    %c0_i32 = arith.constant 0 : i32
    %c0_i32_0 = arith.constant 0 : i32
    %c0_i32_1 = arith.constant 0 : i32
    return %c0_i32, %c0_i32_0 : i32, i32
  }
  func.func @transform_6(%arg0: i32) -> (i32, i32) {
    %c0_i32 = arith.constant 0 : i32
    %c0_i32_0 = arith.constant 0 : i32
    %c0_i32_1 = arith.constant 0 : i32
    return %c0_i32, %c0_i32_0 : i32, i32
  }
  func.func @transform_7(%arg0: i32) -> (i32, i32) {
    %c0_i32 = arith.constant 0 : i32
    %c0_i32_0 = arith.constant 0 : i32
    %c0_i32_1 = arith.constant 0 : i32
    return %c0_i32, %c0_i32_0 : i32, i32
  }
  func.func @transform_8(%arg0: i32) -> (i32, i32, i32) {
    %c0_i32 = arith.constant 0 : i32
    %c0_i32_0 = arith.constant 0 : i32
    %c0_i32_1 = arith.constant 0 : i32
    return %arg0, %c0_i32, %c0_i32_0 : i32, i32, i32
  }
  func.func @transform_9(%arg0: i32) -> (i32, i32, i32) {
    %c0_i32 = arith.constant 0 : i32
    %c0_i32_0 = arith.constant 0 : i32
    %c0_i32_1 = arith.constant 0 : i32
    return %arg0, %c0_i32, %c0_i32_0 : i32, i32, i32
  }
}

module attributes {stable_mosaic.version = 11 : i64} {
  func.func @_matmul_k1_kernel(%arg0: i32, %arg1: i32, %arg2: i32, %arg3: memref<16x128xbf16, #tpu.memory_space<vmem>>, %arg4: memref<128x3xbf16, #tpu.memory_space<vmem>>, %arg5: memref<1x3xf32, #tpu.memory_space<vmem>>, %arg6: memref<16x3xf32, #tpu.memory_space<vmem>>) attributes {dimension_semantics = [#tpu.dimension_semantics<parallel>, #tpu.dimension_semantics<parallel>, #tpu.dimension_semantics<arbitrary>], iteration_bounds = array<i64: 2, 1, 1>, scalar_prefetch = 0 : i64, scratch_operands = 0 : i64, tpu.core_type = #tpu.core_type<tc>, window_params = [{transform_indices = @transform_0, window_bounds = array<i64: 16, 128>}, {transform_indices = @transform_1, window_bounds = array<i64: 128, 3>}, {transform_indices = @transform_2, window_bounds = array<i64: 1, 3>}, {transform_indices = @transform_3, window_bounds = array<i64: 16, 3>}]} {
    %c0 = arith.constant 0 : index
    %c0_0 = arith.constant 0 : index
    %0 = vector.load %arg3[%c0, %c0_0] : memref<16x128xbf16, #tpu.memory_space<vmem>>, vector<16x128xbf16>
    %c0_1 = arith.constant 0 : index
    %c0_2 = arith.constant 0 : index
    %1 = vector.load %arg4[%c0_1, %c0_2] : memref<128x3xbf16, #tpu.memory_space<vmem>>, vector<128x3xbf16>
    %cst = arith.constant dense<0.000000e+00> : vector<16x3xf32>
    %2 = tpu.matmul %0, %1, %cst {dimension_numbers = #tpu.dot_dimension_numbers<[1], [0], [0], [1], [0, 0, 1, 1], [], []>} : vector<16x128xbf16>, vector<128x3xbf16>, vector<16x3xf32> -> vector<16x3xf32>
    %c0_3 = arith.constant 0 : index
    %c0_4 = arith.constant 0 : index
    %3 = vector.load %arg5[%c0_3, %c0_4] : memref<1x3xf32, #tpu.memory_space<vmem>>, vector<1x3xf32>
    %4 = vector.broadcast %3 : vector<1x3xf32> to vector<16x3xf32>
    %5 = arith.addf %2, %4 : vector<16x3xf32>
    %c0_5 = arith.constant 0 : index
    %c0_6 = arith.constant 0 : index
    %6 = vector.load %arg6[%c0_5, %c0_6] : memref<16x3xf32, #tpu.memory_space<vmem>>, vector<16x3xf32>
    tpu.vector_store %arg6[%c0_5, %c0_6], %5 {strides = array<i32>} : memref<16x3xf32, #tpu.memory_space<vmem>>, vector<16x3xf32>,
    return
  }
  func.func @transform_0(%arg0: i32, %arg1: i32, %arg2: i32) -> (i32, i32) {
    %c0_i32 = arith.constant 0 : i32
    return %arg0, %arg2 : i32, i32
  }
  func.func @transform_1(%arg0: i32, %arg1: i32, %arg2: i32) -> (i32, i32) {
    %c0_i32 = arith.constant 0 : i32
    return %arg2, %arg1 : i32, i32
  }
  func.func @transform_2(%arg0: i32, %arg1: i32, %arg2: i32) -> (i32, i32) {
    %c0_i32 = arith.constant 0 : i32
    %c0_i32_0 = arith.constant 0 : i32
    return %c0_i32, %arg1 : i32, i32
  }
  func.func @transform_3(%arg0: i32, %arg1: i32, %arg2: i32) -> (i32, i32) {
    %c0_i32 = arith.constant 0 : i32
    return %arg0, %arg1 : i32, i32
  }
}

module attributes {stable_mosaic.version = 11 : i64} {
  func.func @_matmul_k1_kernel(%arg0: i32, %arg1: i32, %arg2: i32, %arg3: memref<16x512xbf16, #tpu.memory_space<vmem>>, %arg4: memref<512x128xbf16, #tpu.memory_space<vmem>>, %arg5: memref<1x128xf32, #tpu.memory_space<vmem>>, %arg6: memref<16x128xbf16, #tpu.memory_space<vmem>>, %arg7: memref<16x128xbf16, #tpu.memory_space<vmem>>) attributes {dimension_semantics = [#tpu.dimension_semantics<parallel>, #tpu.dimension_semantics<parallel>, #tpu.dimension_semantics<arbitrary>], iteration_bounds = array<i64: 2, 1, 1>, scalar_prefetch = 0 : i64, scratch_operands = 0 : i64, tpu.core_type = #tpu.core_type<tc>, window_params = [{transform_indices = @transform_0, window_bounds = array<i64: 16, 512>}, {transform_indices = @transform_1, window_bounds = array<i64: 512, 128>}, {transform_indices = @transform_2, window_bounds = array<i64: 1, 128>}, {transform_indices = @transform_3, window_bounds = array<i64: 16, 128>}, {transform_indices = @transform_4, window_bounds = array<i64: 16, 128>}]} {
    %c0 = arith.constant 0 : index
    %c0_0 = arith.constant 0 : index
    %0 = vector.load %arg3[%c0, %c0_0] : memref<16x512xbf16, #tpu.memory_space<vmem>>, vector<16x512xbf16>
    %c0_1 = arith.constant 0 : index
    %c0_2 = arith.constant 0 : index
    %1 = vector.load %arg4[%c0_1, %c0_2] : memref<512x128xbf16, #tpu.memory_space<vmem>>, vector<512x128xbf16>
    %cst = arith.constant dense<0.000000e+00> : vector<16x128xf32>
    %2 = tpu.matmul %0, %1, %cst {dimension_numbers = #tpu.dot_dimension_numbers<[1], [0], [0], [1], [0, 0, 1, 1], [], []>} : vector<16x512xbf16>, vector<512x128xbf16>, vector<16x128xf32> -> vector<16x128xf32>
    %c0_3 = arith.constant 0 : index
    %c0_4 = arith.constant 0 : index
    %3 = vector.load %arg5[%c0_3, %c0_4] : memref<1x128xf32, #tpu.memory_space<vmem>>, vector<1x128xf32>
    %4 = vector.broadcast %3 : vector<1x128xf32> to vector<16x128xf32>
    %5 = arith.addf %2, %4 : vector<16x128xf32>
    %c0_5 = arith.constant 0 : index
    %c0_6 = arith.constant 0 : index
    %6 = vector.load %arg6[%c0_5, %c0_6] : memref<16x128xbf16, #tpu.memory_space<vmem>>, vector<16x128xbf16>
    %7 = arith.extf %6 : vector<16x128xbf16> to vector<16x128xf32>
    %8 = arith.addf %5, %7 : vector<16x128xf32>
    %9 = arith.truncf %8 : vector<16x128xf32> to vector<16x128xbf16>
    %c0_7 = arith.constant 0 : index
    %c0_8 = arith.constant 0 : index
    %10 = vector.load %arg7[%c0_7, %c0_8] : memref<16x128xbf16, #tpu.memory_space<vmem>>, vector<16x128xbf16>
    tpu.vector_store %arg7[%c0_7, %c0_8], %9 {strides = array<i32>} : memref<16x128xbf16, #tpu.memory_space<vmem>>, vector<16x128xbf16>,
    return
  }
  func.func @transform_0(%arg0: i32, %arg1: i32, %arg2: i32) -> (i32, i32) {
    %c0_i32 = arith.constant 0 : i32
    return %arg0, %arg2 : i32, i32
  }
  func.func @transform_1(%arg0: i32, %arg1: i32, %arg2: i32) -> (i32, i32) {
    %c0_i32 = arith.constant 0 : i32
    return %arg2, %arg1 : i32, i32
  }
  func.func @transform_2(%arg0: i32, %arg1: i32, %arg2: i32) -> (i32, i32) {
    %c0_i32 = arith.constant 0 : i32
    %c0_i32_0 = arith.constant 0 : i32
    return %c0_i32, %arg1 : i32, i32
  }
  func.func @transform_3(%arg0: i32, %arg1: i32, %arg2: i32) -> (i32, i32) {
    %c0_i32 = arith.constant 0 : i32
    return %arg0, %arg1 : i32, i32
  }
  func.func @transform_4(%arg0: i32, %arg1: i32, %arg2: i32) -> (i32, i32) {
    %c0_i32 = arith.constant 0 : i32
    return %arg0, %arg1 : i32, i32
  }
}

</mosaic_0001>

<bundles_post_ra>
// kernel: aspmlp_forward.10
= control target key start
LH: loop header
LB: loop body
LE: loop exit
PB: predicated region body
PF: predicated region fallthrough
CT: control target
= control target key end

     0   :  { %s364_s12 = smov 0   ;;  %s394_s0 = inlined_call_operand.vmem [shape: bf16[2,16,128], index: 0, kind: input, shape index: {}]   ;;  %s395_s1 = inlined_call_operand.vmem [shape: f32[1,1,128], index: 1, kind: input, shape index: {}]   ;;  %s396_s2 = inlined_call_operand.vmem [shape: f32[1,1,128], index: 2, kind: input, shape index: {}]   ;;  %s397_s3 = inlined_call_operand.vmem [shape: bf16[2,16,128], index: 3, kind: output, shape index: {}]  }
   0x1 LB: > { %s292_s13 = sadd.s32 4294967295, %s342_s12   ;;  %p296_p0 = scmp.ge.s32.totalorder %s342_s12, 1  ;;  %s342_s12 = sphi %s364_s12, %s13_s12  }
   0x2   : > { %p137_p1 = scmp.lt.s32.totalorder %s342_s12, 3 }
   0x4   : > { %p138_p2 = pnand %p296_p0, %p137_p1 }
   0x5   : > { %p161_p3 = scmp.lt.s32.totalorder (!%p138_p2), %s292_s13, 1  ;;  %v301_v27 = vld [vmem:[%s395_s1] ss:$0 sm:$0xff] (!%p138_p2) }
   0x6   : > { %141 = sbr.rel (%p138_p2) target bundleno = 514 (0x202), region = 32  ;;  %v302_v30 = vld [vmem:[%s396_s2] ss:$0 sm:$0xff] (!%p138_p2) }
   0xd   : > { %s399_s13 = smov (!%p161_p3, %s292_s13), 1 }
   0xe   : > { %s307_s14 = sshll.u32 %s399_s13, 3 }
   0xf   : > { %s165_s17 = scalar_lea.vmem %s394_s0, %s307_s14  ;;  %s170_s30 = scalar_lea.vmem %s397_s3, %s307_s14 }
  0x10   : > { %v312_v0 = vld [vmem:[%s165_s17] sm:$0xff]  }
  0x11   : > { %v313_v1 = vunpack.c.l.bf16 %v312_v0  ;;  %v314_v2 = vunpack.c.h.bf16 %v312_v0 }
  0x13   : > { %v175_v3 = vadd.f32 %v314_v2, %v313_v1 }
  0x15   : > { %176 = vadd.xlane.f32.xlu0 %v175_v3 }
  0xa2   : > { %v177_v4 = vpop.xlane.xlu0 %176 }
  0xa3   : > { %v178_v5 = vrot.slane %v177_v4, 4 }
  0xa5   : > { %v179_v6 = vadd.f32 %v178_v5, %v177_v4 }
  0xa7   : > { %v180_v7 = vrot.slane %v179_v6, 2 }
  0xa9   : > { %v181_v8 = vadd.f32 %v180_v7, %v179_v6 }
  0xab   : > { %v182_v9 = vrot.slane %v181_v8, 1 }
  0xad   : > { %v183_v10 = vadd.f32 %v182_v9, %v181_v8 }
  0xaf   : > { %320 = vpush %v183_v10 }
  0xe0   : > { %s321_s18 = spop %320 }
  0xe1   : > { %s185_s19 = smul.f32 0.00048828125, %s321_s18 }
  0xe3   : > { %v186_v11 = vstv %s185_s19 }
  0xe4   : > { %v187_v12 = vsub.f32 %v313_v1, %v186_v11  ;;  %v188_v13 = vsub.f32 %v314_v2, %v186_v11 }
  0xe6   : > { %v189_v14 = vmul.f32 %v187_v12, %v187_v12  ;;  %v190_v15 = vmul.f32 %v188_v13, %v188_v13 }
  0xe8   : > { %v191_v16 = vadd.f32 %v190_v15, %v189_v14 }
  0xea   : > { %192 = vadd.xlane.f32.xlu0 %v191_v16 }
 0x177   : > { %v193_v17 = vpop.xlane.xlu0 %192 }
 0x178   : > { %v194_v18 = vrot.slane %v193_v17, 4 }
 0x17a   : > { %v195_v19 = vadd.f32 %v194_v18, %v193_v17 }
 0x17c   : > { %v196_v20 = vrot.slane %v195_v19, 2 }
 0x17e   : > { %v197_v21 = vadd.f32 %v196_v20, %v195_v19 }
 0x180   : > { %v198_v22 = vrot.slane %v197_v21, 1 }
 0x182   : > { %v199_v23 = vadd.f32 %v198_v22, %v197_v21 }
 0x184   : > { %322 = vpush %v199_v23 }
 0x1b5   : > { %s323_s20 = spop %322 }
 0x1b6   : > { %s201_s21 = smul.f32 0.00048828125, %s323_s20 }
 0x1b8   : > { %s202_s22 = sadd.f32 1e-05, %s201_s21 }
 0x1ba   : > { %v203_v24 = vstv %s202_s22 }
 0x1bb   : > { %334 = vrsqrt.f32 %v203_v24 }
 0x1c5   : > { %v335_v25 = vpop.eup %334 }
 0x1c6   : > { %324 = vpush %v335_v25 }
 0x1f7   : > { %s325_s23 = spop %324 }
 0x1f8   : > { %v206_v26 = vstv %s325_s23 }
 0x1f9   : > { %v207_v28 = vmul.f32 %v206_v26, %v187_v12  ;;  %v208_v29 = vmul.f32 %v206_v26, %v188_v13 }
 0x1fb   : > { %v216_v31 = vmul.f32 %v301_v27, %v207_v28  ;;  %v217_v32 = vmul.f32 %v301_v27, %v208_v29 }
 0x1fd   : > { %v225_v33 = vadd.f32 %v302_v30, %v216_v31  ;;  %v226_v34 = vadd.f32 %v302_v30, %v217_v32 }
 0x1ff   : > { %v318_v35 = vpack.c.bf16 %v226_v34, %v225_v33 }
 0x201   : > { %319 = vst [vmem:[%s170_s30] sm:$0xff] %v318_v35  }
 0x202 PF: > { %s13_s12 = sadd.s32 1, %s342_s12  }
 0x203   : > { %p10_p4 = scmp.ge.s32.totalorder %s13_s12, 4  }
 0x205   :  { %12 = sbr.rel (!%p10_p4) target bundleno = 1 (0x1), region = 62 }

// kernel: aspmlp_forward.9
= control target key start
LH: loop header
LB: loop body
LE: loop exit
PB: predicated region body
PF: predicated region fallthrough
CT: control target
= control target key end

     0   :  { %s636_s12 = smov 0   ;;  %s638_s13 = smov 0   ;;  %s699_s0 = inlined_call_operand.vmem [shape: f32[32,128], index: 0, kind: input, shape index: {}]   ;;  %s700_s1 = inlined_call_operand.vmem [shape: bf16[128,128], index: 1, kind: input, shape index: {}]   ;;  %s701_s2 = inlined_call_operand.vmem [shape: f32[1,128], index: 2, kind: input, shape index: {}]   ;;  %s702_s3 = inlined_call_operand.vmem [shape: bf16[32,128], index: 3, kind: output, shape index: {}]  }
   0x1   :  { %s640_s14 = smov 0  }
   0x2 LB: > { %s32_s15 = sadd.s32 1, %s608_s13  ;;  %p502_p0 = scmp.ge.s32.totalorder %s612_s14, 1  ;;  %s612_s14 = sphi %s640_s14, %s13_s14   ;;  %s608_s13 = sphi %s638_s13, %s704_s13   ;;  %s604_s12 = sphi %s636_s12, %s703_s12  }
   0x3   : > { %p34_p1 = scmp.ge.s32.totalorder %s32_s15, 2  ;;  %p188_p2 = scmp.lt.s32.totalorder %s612_s14, 3 }
   0x5   : > { %s706_s15 = smov (%p34_p1, %s32_s15), 0  ;;  %p189_p3 = pnand %p502_p0, %p188_p2 }
   0x6   : > { %v582_v0 = vld [vmem:[%s700_s1] sm:$0xff] (!%p189_p3)   ;;  %v614_v1 = vmov (!%p189_p3), 0.0   ;;  %v583_v2 = vld [vmem:[%s700_s1 + $0x8] sm:$0xff] (!%p189_p3)   ;;  %vm615_vm0 = vmmov (!%p189_p3), 0   ;;  %v584_v3 = vld [vmem:[%s700_s1 + $0x10] sm:$0xff] (!%p189_p3)   ;;  %s503_s22 = sshll.u32 (!%p189_p3), %s604_s12, 1 }
   0x7   : > { %192 = sbr.rel (%p189_p3) target bundleno = 258 (0x102), region = 32  ;;  %536 = vmatprep.subr.bf16.mxu0 (!%p189_p3), %v614_v1  ;;  %552 = vmatprep.mubr.msk.bf16.mxu0 (!%p189_p3), %vm615_vm0, %v614_v1  ;;  %v585_v4 = vld [vmem:[%s700_s1 + $0x18] sm:$0xff] (!%p189_p3)   ;;  %p230_p4 = scmp.lt.s32.totalorder (!%p189_p3), %s503_s22, 3  ;;  %v586_v5 = vld [vmem:[%s700_s1 + $0x20] sm:$0xff] (!%p189_p3)   ;;  %v587_v6 = vld [vmem:[%s700_s1 + $0x28] sm:$0xff] (!%p189_p3)  }
   0x8   : > { %537 = vmatpush3.bf16.msra.mxu0 (!%p189_p3), %v582_v0  ;;  %v588_v7 = vld [vmem:[%s700_s1 + $0x30] sm:$0xff] (!%p189_p3)   ;;  %v589_v8 = vld [vmem:[%s700_s1 + $0x38] sm:$0xff] (!%p189_p3)   ;;  %v507_v12 = vld [vmem:[%s701_s2] ss:$0 sm:$0xff] (!%p189_p3) }
   0x9   : > { %538 = vmatprep.subr.bf16.mxu0 (!%p189_p3), %v614_v1 }
   0xc   : > { %539 = vmatpush3.bf16.msra.mxu0 (!%p189_p3), %v583_v2 }
   0xd   : > { %540 = vmatprep.subr.bf16.mxu0 (!%p189_p3), %v614_v1 }
   0xe   : > { %s708_s22 = smov (!%p230_p4, %s503_s22), 3 }
   0xf   : > { %s504_s29 = sshll.u32 %s708_s22, 3  ;;  %s506_s12 = sshll.u32 %s708_s22, 2 }
  0x10   : > { %541 = vmatpush3.bf16.msra.mxu0 %v584_v3  ;;  %s236_s7 = scalar_lea.vmem %s699_s0, %s504_s29  ;;  %s257_s18 = scalar_lea.vmem %s702_s3, %s506_s12 }
  0x11   : > { %542 = vmatprep.subr.bf16.mxu0 %v614_v1  ;;  %v260_v9 = vld [vmem:[%s236_s7] sm:$0xff]  ;;  %v261_v10 = vld [vmem:[%s236_s7 + $0x8] sm:$0xff] }
  0x12   : > { %v262_v11 = vpack.c.bf16 %v261_v10, %v260_v9 }
  0x14   : > { %543 = vmatpush3.bf16.msra.mxu0 %v585_v4 }
  0x15   : > { %544 = vmatprep.subr.bf16.mxu0 %v614_v1 }
  0x18   : > { %545 = vmatpush3.bf16.msra.mxu0 %v586_v5 }
  0x19   : > { %546 = vmatprep.subr.bf16.mxu0 %v614_v1 }
  0x1c   : > { %547 = vmatpush3.bf16.msra.mxu0 %v587_v6 }
  0x1d   : > { %548 = vmatprep.subr.bf16.mxu0 %v614_v1 }
  0x20   : > { %549 = vmatpush3.bf16.msra.mxu0 %v588_v7 }
  0x21   : > { %550 = vmatprep.subr.bf16.mxu0 %v614_v1 }
  0x24   : > { %551 = vmatpush3.bf16.msra.mxu0 %v589_v8 }
  0x27   : > { %553 = vmatmul.mubr.bf16.vlgmr.msra.gmra.mrb[0].mxu0 %v262_v11 }
  0xfa   : > { %v368_v13 = vpop.f32.mrb[0].mxu0 }
  0xfb   : > { %v554_v14 = vpop.f32.mrb[1].mxu0  ;;  %v369_v16 = vadd.f32 %v507_v12, %v368_v13 }
  0xfc   : > { %v371_v15 = vpop.f32.mrb[2].mxu0 }
  0xfd   : > { %v372_v17 = vadd.f32 %v507_v12, %v371_v15  ;;  %v555_v18 = vpop.f32.mrb[3].mxu0 }
  0xff   : > { %v525_v19 = vpack.c.bf16 %v372_v17, %v369_v16 }
 0x101   : > { %526 = vst [vmem:[%s257_s18] sm:$0xff] %v525_v19  }
 0x102 PF: > { %s13_s14 = sadd.s32 1, %s612_s14   ;;  %s703_s12 = smov %s608_s13 }
 0x103   : > { %p10_p5 = scmp.ge.s32.totalorder %s13_s14, 4   ;;  %s704_s13 = smov %s706_s15 }
 0x105   :  { %12 = sbr.rel (!%p10_p5) target bundleno = 2 (0x2), region = 68 }

// kernel: aspmlp_forward.12
= control target key start
LH: loop header
LB: loop body
LE: loop exit
PB: predicated region body
PF: predicated region fallthrough
CT: control target
= control target key end

     0   :  { %s1000_s12 = smov 0   ;;  %s1002_s13 = smov 0   ;;  %s1195_s0 = inlined_call_operand.vmem [shape: bf16[32,128], index: 0, kind: input, shape index: {}]   ;;  %s1196_s1 = inlined_call_operand.vmem [shape: bf16[128,512], index: 1, kind: input, shape index: {}]   ;;  %s1197_s2 = inlined_call_operand.vmem [shape: f32[1,512], index: 2, kind: input, shape index: {}]   ;;  %s1198_s3 = inlined_call_operand.vmem [shape: bf16[32,512], index: 3, kind: output, shape index: {}]  }
   0x1   :  { %s1004_s14 = smov 0  }
   0x2 LB: > { %s32_s15 = sadd.s32 1, %s973_s13  ;;  %p815_p0 = scmp.ge.s32.totalorder %s977_s14, 1  ;;  %s977_s14 = sphi %s1004_s14, %s13_s14   ;;  %s973_s13 = sphi %s1002_s13, %s1200_s13   ;;  %s969_s12 = sphi %s1000_s12, %s1199_s12  }
   0x3   : > { %p34_p1 = scmp.ge.s32.totalorder %s32_s15, 2  ;;  %p193_p2 = scmp.lt.s32.totalorder %s977_s14, 3 }
   0x5   : > { %s1202_s15 = smov (%p34_p1, %s32_s15), 0  ;;  %p194_p3 = pnand %p815_p0, %p193_p2 }
   0x6   : > { %v890_v0 = vld [vmem:[%s1196_s1 + $0x4] ss:$16 sps:$4 sm:$0xff] (!%p194_p3)   ;;  %v892_v1 = vld [vmem:[%s1196_s1 + $0xc] ss:$16 sps:$4 sm:$0xff] (!%p194_p3)   ;;  %v979_v2 = vmov (!%p194_p3), 0   ;;  %s816_s7 = sshll.u32 (!%p194_p3), %s969_s12, 1  ;;  %v314_v34 = vlaneseq (!%p194_p3) }
   0x7   : > { %197 = sbr.rel (%p194_p3) target bundleno = 289 (0x121), region = 32  ;;  %532 = vmatprep.mubr.bf16.mxu0 (!%p194_p3), %v979_v2  ;;  %575 = vmatprep.mubr.bf16.mxu1 (!%p194_p3), %v979_v2  ;;  %v894_v3 = vld [vmem:[%s1196_s1] ss:$16 sps:$4 sm:$0xff] (!%p194_p3)   ;;  %v895_v4 = vld [vmem:[%s1196_s1 + $0x8] ss:$16 sps:$4 sm:$0xff] (!%p194_p3)   ;;  %p240_p4 = scmp.lt.s32.totalorder (!%p194_p3), %s816_s7, 3 }
   0x8   : > { %500 = vmatprep.subr.bf16.mxu0 (!%p194_p3), %v890_v0  ;;  %543 = vmatprep.subr.bf16.mxu1 (!%p194_p3), %v892_v1  ;;  %v896_v5 = vld [vmem:[%s1196_s1 + $0x24] ss:$16 sps:$4 sm:$0xff] (!%p194_p3)   ;;  %v898_v6 = vld [vmem:[%s1196_s1 + $0x2c] ss:$16 sps:$4 sm:$0xff] (!%p194_p3)   ;;  %v900_v7 = vld [vmem:[%s1196_s1 + $0x20] ss:$16 sps:$4 sm:$0xff] (!%p194_p3)  }
   0x9   : > { %501 = vmatpush1.bf16.msra.mxu0 (!%p194_p3), %v894_v3  ;;  %544 = vmatpush1.bf16.msra.mxu1 (!%p194_p3), %v895_v4  ;;  %v901_v8 = vld [vmem:[%s1196_s1 + $0x28] ss:$16 sps:$4 sm:$0xff] (!%p194_p3)   ;;  %v902_v9 = vld [vmem:[%s1196_s1 + $0x44] ss:$16 sps:$4 sm:$0xff] (!%p194_p3)   ;;  %v904_v10 = vld [vmem:[%s1196_s1 + $0x4c] ss:$16 sps:$4 sm:$0xff] (!%p194_p3)  }
   0xa   : > { %502 = vmatprep.subr.bf16.mxu0 (!%p194_p3), %v896_v5  ;;  %545 = vmatprep.subr.bf16.mxu1 (!%p194_p3), %v898_v6  ;;  %v906_v11 = vld [vmem:[%s1196_s1 + $0x40] ss:$16 sps:$4 sm:$0xff] (!%p194_p3)   ;;  %v907_v12 = vld [vmem:[%s1196_s1 + $0x48] ss:$16 sps:$4 sm:$0xff] (!%p194_p3)   ;;  %v908_v13 = vld [vmem:[%s1196_s1 + $0x64] ss:$16 sps:$4 sm:$0xff] (!%p194_p3)  }
   0xb   : > { %v910_v14 = vld [vmem:[%s1196_s1 + $0x6c] ss:$16 sps:$4 sm:$0xff] (!%p194_p3)   ;;  %v912_v15 = vld [vmem:[%s1196_s1 + $0x60] ss:$16 sps:$4 sm:$0xff] (!%p194_p3)   ;;  %v913_v16 = vld [vmem:[%s1196_s1 + $0x68] ss:$16 sps:$4 sm:$0xff] (!%p194_p3)  }
   0xc   : > { %v914_v17 = vld [vmem:[%s1196_s1 + $0x84] ss:$16 sps:$4 sm:$0xff] (!%p194_p3)   ;;  %v916_v18 = vld [vmem:[%s1196_s1 + $0x8c] ss:$16 sps:$4 sm:$0xff] (!%p194_p3)   ;;  %v918_v19 = vld [vmem:[%s1196_s1 + $0x80] ss:$16 sps:$4 sm:$0xff] (!%p194_p3)  }
   0xd   : > { %503 = vmatpush1.bf16.msra.mxu0 (!%p194_p3), %v900_v7  ;;  %546 = vmatpush1.bf16.msra.mxu1 (!%p194_p3), %v901_v8  ;;  %v919_v20 = vld [vmem:[%s1196_s1 + $0x88] ss:$16 sps:$4 sm:$0xff] (!%p194_p3)   ;;  %v920_v21 = vld [vmem:[%s1196_s1 + $0xa4] ss:$16 sps:$4 sm:$0xff] (!%p194_p3)   ;;  %v922_v22 = vld [vmem:[%s1196_s1 + $0xac] ss:$16 sps:$4 sm:$0xff] (!%p194_p3)  }
   0xe   : > { %504 = vmatprep.subr.bf16.mxu0 %v902_v9  ;;  %547 = vmatprep.subr.bf16.mxu1 %v904_v10  ;;  %s1204_s7 = smov (!%p240_p4, %s816_s7), 3  ;;  %v924_v23 = vld [vmem:[%s1196_s1 + $0xa0] ss:$16 sps:$4 sm:$0xff]   ;;  %v925_v24 = vld [vmem:[%s1196_s1 + $0xa8] ss:$16 sps:$4 sm:$0xff]   ;;  %v315_v35 = vshrl.u32 %v314_v34, 7 }
   0xf   : > { %s817_s11 = sshll.u32 %s1204_s7, 2  ;;  %v926_v25 = vld [vmem:[%s1196_s1 + $0xc4] ss:$16 sps:$4 sm:$0xff]   ;;  %v928_v26 = vld [vmem:[%s1196_s1 + $0xcc] ss:$16 sps:$4 sm:$0xff]   ;;  %s860_s18 = sshll.u32 %s1204_s7, 4 }
  0x10   : > { %s246_s23 = scalar_lea.vmem %s1195_s0, %s817_s11  ;;  %v930_v27 = vld [vmem:[%s1196_s1 + $0xc0] ss:$16 sps:$4 sm:$0xff]   ;;  %v931_v28 = vld [vmem:[%s1196_s1 + $0xc8] ss:$16 sps:$4 sm:$0xff]   ;;  %v932_v29 = vld [vmem:[%s1196_s1 + $0xe4] ss:$16 sps:$4 sm:$0xff]   ;;  %s274_s20 = scalar_lea.vmem %s1198_s3, %s860_s18 }
  0x11   : > { %505 = vmatpush1.bf16.msra.mxu0 %v906_v11  ;;  %548 = vmatpush1.bf16.msra.mxu1 %v907_v12  ;;  %v934_v30 = vld [vmem:[%s1196_s1 + $0xec] ss:$16 sps:$4 sm:$0xff]   ;;  %v936_v31 = vld [vmem:[%s1196_s1 + $0xe0] ss:$16 sps:$4 sm:$0xff]   ;;  %v937_v32 = vld [vmem:[%s1196_s1 + $0xe8] ss:$16 sps:$4 sm:$0xff]  }
  0x12   : > { %506 = vmatprep.subr.bf16.mxu0 %v908_v13  ;;  %549 = vmatprep.subr.bf16.mxu1 %v910_v14  ;;  %v938_v33 = vld [vmem:[%s246_s23] sm:$0xff]   ;;  %v316_v36 = vsub.s32 0, %v315_v35  ;;  %v324_v37 = vsub.s32 2, %v315_v35  ;;  %v320_v39 = vsub.s32 1, %v315_v35  ;;  %v328_v40 = vsub.s32 3, %v315_v35 }
  0x13   : > { %v312_v38 = vld [vmem:[%s1197_s2] sm:$0xf] }
  0x14   : > { %v317_v41 = vrot.slane %v312_v38, %v316_v36  ;;  %v325_v42 = vrot.slane %v312_v38, %v324_v37  ;;  %v321_v43 = vrot.slane %v312_v38, %v320_v39  ;;  %v329_v44 = vrot.slane %v312_v38, %v328_v40 }
  0x15   : > { %507 = vmatpush1.bf16.msra.mxu0 %v912_v15  ;;  %550 = vmatpush1.bf16.msra.mxu1 %v913_v16 }
  0x16   : > { %508 = vmatprep.subr.bf16.mxu0 %v914_v17  ;;  %551 = vmatprep.subr.bf16.mxu1 %v916_v18 }
  0x19   : > { %509 = vmatpush1.bf16.msra.mxu0 %v918_v19  ;;  %552 = vmatpush1.bf16.msra.mxu1 %v919_v20 }
  0x1a   : > { %510 = vmatprep.subr.bf16.mxu0 %v920_v21  ;;  %553 = vmatprep.subr.bf16.mxu1 %v922_v22 }
  0x1d   : > { %511 = vmatpush1.bf16.msra.mxu0 %v924_v23  ;;  %554 = vmatpush1.bf16.msra.mxu1 %v925_v24 }
  0x1e   : > { %512 = vmatprep.subr.bf16.mxu0 %v926_v25  ;;  %555 = vmatprep.subr.bf16.mxu1 %v928_v26 }
  0x21   : > { %513 = vmatpush1.bf16.msra.mxu0 %v930_v27  ;;  %556 = vmatpush1.bf16.msra.mxu1 %v931_v28 }
  0x22   : > { %514 = vmatprep.subr.bf16.mxu0 %v932_v29  ;;  %557 = vmatprep.subr.bf16.mxu1 %v934_v30 }
  0x25   : > { %515 = vmatpush1.bf16.msra.mxu0 %v936_v31  ;;  %558 = vmatpush1.bf16.msra.mxu1 %v937_v32 }
  0x28   : > { %533 = vmatmul.mubr.bf16.vlgmr.msra.gmra.mrb[0].mxu0 %v938_v33  ;;  %576 = vmatmul.mubr.bf16.vlgmr.msra.gmra.mrb[0].mxu1 %v938_v33 }
  0xfb   : > { %v534_v45 = vpop.f32.mrb[0].mxu0  ;;  %v577_v46 = vpop.f32.mrb[0].mxu1 }
  0xfc   : > { %v1126_v47 = vadd.f32 %v534_v45, %v317_v41  ;;  %v1128_v48 = vadd.f32 %v577_v46, %v325_v42  ;;  %v536_v49 = vpop.f32.mrb[1].mxu0  ;;  %v579_v50 = vpop.f32.mrb[1].mxu1 }
  0xfd   : > { %v1130_v51 = vadd.f32 %v536_v49, %v321_v43  ;;  %v1132_v52 = vadd.f32 %v579_v50, %v329_v44  ;;  %v538_v53 = vpop.f32.mrb[2].mxu0  ;;  %v581_v54 = vpop.f32.mrb[2].mxu1 }
  0xfe   : > { %v594_v55 = vmul.f32 0.044715, %v1126_v47  ;;  %v596_v56 = vmul.f32 0.044715, %v1128_v48  ;;  %v1140_v61 = vadd.f32 %v538_v53, %v317_v41  ;;  %v1142_v62 = vadd.f32 %v581_v54, %v325_v42  ;;  %v540_v63 = vpop.f32.mrb[3].mxu0  ;;  %v583_v0 = vpop.f32.mrb[3].mxu1 }
  0xff   : > { %v595_v57 = vmul.f32 0.044715, %v1130_v51  ;;  %v597_v58 = vmul.f32 0.044715, %v1132_v52  ;;  %v1146_v3 = vadd.f32 %v540_v63, %v321_v43  ;;  %v1157_v13 = vadd.f32 %v583_v0, %v329_v44 }
 0x100   : > { %v602_v59 = vmul.f32 %v594_v55, %v1126_v47  ;;  %v604_v60 = vmul.f32 %v596_v56, %v1128_v48  ;;  %v598_v6 = vmul.f32 0.044715, %v1140_v61  ;;  %v600_v9 = vmul.f32 0.044715, %v1142_v62 }
 0x101   : > { %v603_v1 = vmul.f32 %v595_v57, %v1130_v51  ;;  %v605_v2 = vmul.f32 %v597_v58, %v1132_v52  ;;  %v599_v17 = vmul.f32 0.044715, %v1146_v3  ;;  %v601_v26 = vmul.f32 0.044715, %v1157_v13 }
 0x102   : > { %v610_v4 = vmul.f32 %v602_v59, %v1126_v47  ;;  %v612_v5 = vmul.f32 %v604_v60, %v1128_v48  ;;  %v606_v12 = vmul.f32 %v598_v6, %v1140_v61  ;;  %v608_v16 = vmul.f32 %v600_v9, %v1142_v62 }
 0x103   : > { %v611_v7 = vmul.f32 %v603_v1, %v1130_v51  ;;  %v613_v8 = vmul.f32 %v605_v2, %v1132_v52  ;;  %v607_v24 = vmul.f32 %v599_v17, %v1146_v3  ;;  %v609_v30 = vmul.f32 %v601_v26, %v1157_v13 }
 0x104   : > { %v618_v10 = vadd.f32 %v610_v4, %v1126_v47  ;;  %v620_v11 = vadd.f32 %v612_v5, %v1128_v48  ;;  %v614_v20 = vmul.f32 %v606_v12, %v1140_v61  ;;  %v616_v23 = vmul.f32 %v608_v16, %v1142_v62 }
 0x105   : > { %v619_v14 = vadd.f32 %v611_v7, %v1130_v51  ;;  %v621_v15 = vadd.f32 %v613_v8, %v1132_v52  ;;  %v615_v28 = vmul.f32 %v607_v24, %v1146_v3  ;;  %v617_v33 = vmul.f32 %v609_v30, %v1157_v13 }
 0x106   : > { %v626_v18 = vmul.f32 0.7978846, %v618_v10  ;;  %v628_v19 = vmul.f32 0.7978846, %v620_v11  ;;  %v622_v25 = vadd.f32 %v614_v20, %v1140_v61  ;;  %v624_v27 = vadd.f32 %v616_v23, %v1142_v62 }
 0x107   : > { %v627_v21 = vmul.f32 0.7978846, %v619_v14  ;;  %v629_v22 = vmul.f32 0.7978846, %v621_v15  ;;  %v623_v32 = vadd.f32 %v615_v28, %v1146_v3  ;;  %v625_v35 = vadd.f32 %v617_v33, %v1157_v13 }
 0x108   : > { %939 = vtanh.f32 %v626_v18  ;;  %v630_v29 = vmul.f32 0.7978846, %v622_v25  ;;  %v632_v31 = vmul.f32 0.7978846, %v624_v27  ;;  %v586_v39 = vmul.f32 0.5, %v1126_v47 }
 0x109   : > { %941 = vtanh.f32 %v628_v19  ;;  %v631_v34 = vmul.f32 0.7978846, %v623_v32  ;;  %v633_v36 = vmul.f32 0.7978846, %v625_v35  ;;  %v588_v42 = vmul.f32 0.5, %v1128_v48 }
 0x10a   : > { %943 = vtanh.f32 %v627_v21  ;;  %v587_v46 = vmul.f32 0.5, %v1130_v51  ;;  %v589_v54 = vmul.f32 0.5, %v1132_v52  ;;  %v590_v48 = vmul.f32 0.5, %v1140_v61 }
 0x10b   : > { %945 = vtanh.f32 %v629_v22  ;;  %v591_v1 = vmul.f32 0.5, %v1146_v3  ;;  %v592_v52 = vmul.f32 0.5, %v1142_v62  ;;  %v593_v7 = vmul.f32 0.5, %v1157_v13 }
 0x10c   : > { %947 = vtanh.f32 %v630_v29 }
 0x10d   : > { %949 = vtanh.f32 %v632_v31 }
 0x10e   : > { %951 = vtanh.f32 %v631_v34 }
 0x10f   : > { %953 = vtanh.f32 %v633_v36 }
 0x112   : > { %v940_v37 = vpop.eup %939 }
 0x113   : > { %v942_v38 = vpop.eup %941  ;;  %v642_v40 = vadd.f32 1.0, %v940_v37 }
 0x114   : > { %v944_v41 = vpop.eup %943  ;;  %v644_v43 = vadd.f32 1.0, %v942_v38 }
 0x115   : > { %v946_v44 = vpop.eup %945  ;;  %v650_v45 = vmul.f32 %v642_v40, %v586_v39  ;;  %v643_v49 = vadd.f32 1.0, %v944_v41 }
 0x116   : > { %v948_v50 = vpop.eup %947  ;;  %v652_v53 = vmul.f32 %v644_v43, %v588_v42  ;;  %v645_v55 = vadd.f32 1.0, %v946_v44 }
 0x117   : > { %v950_v56 = vpop.eup %949  ;;  %v651_v57 = vmul.f32 %v643_v49, %v587_v46  ;;  %v646_v58 = vadd.f32 1.0, %v948_v50 }
 0x118   : > { %v653_v47 = vmul.f32 %v645_v55, %v589_v54  ;;  %v952_v59 = vpop.eup %951  ;;  %v648_v63 = vadd.f32 1.0, %v950_v56 }
 0x119   : > { %v861_v60 = vpack.c.bf16 %v651_v57, %v650_v45  ;;  %v654_v0 = vmul.f32 %v646_v58, %v590_v48  ;;  %v647_v2 = vadd.f32 1.0, %v952_v59  ;;  %v954_v4 = vpop.eup %953 }
 0x11a   : > { %v862_v51 = vpack.c.bf16 %v653_v47, %v652_v53  ;;  %v656_v6 = vmul.f32 %v648_v63, %v592_v52  ;;  %v649_v8 = vadd.f32 1.0, %v954_v4 }
 0x11b   : > { %682 = vst [vmem:[%s274_s20] sm:$0xff] %v861_v60  ;;  %v655_v5 = vmul.f32 %v647_v2, %v591_v1 }
 0x11c   : > { %683 = vst [vmem:[%s274_s20 + $0x8] sm:$0xff] %v862_v51  ;;  %v657_v61 = vmul.f32 %v649_v8, %v593_v7 }
 0x11d   : > { %v863_v9 = vpack.c.bf16 %v655_v5, %v654_v0 }
 0x11e   : > { %v864_v10 = vpack.c.bf16 %v657_v61, %v656_v6 }
 0x11f   : > { %684 = vst [vmem:[%s274_s20 + $0x10] sm:$0xff] %v863_v9 }
 0x120   : > { %685 = vst [vmem:[%s274_s20 + $0x18] sm:$0xff] %v864_v10 }
 0x121 PF: > { %s13_s14 = sadd.s32 1, %s977_s14   ;;  %s1199_s12 = smov %s973_s13 }
 0x122   : > { %p10_p5 = scmp.ge.s32.totalorder %s13_s14, 4   ;;  %s1200_s13 = smov %s1202_s15 }
 0x124   :  { %12 = sbr.rel (!%p10_p5) target bundleno = 2 (0x2), region = 68 }

// kernel: aspmlp_forward.17
= control target key start
LH: loop header
LB: loop body
LE: loop exit
PB: predicated region body
PF: predicated region fallthrough
CT: control target
= control target key end

     0   :  { %s627_s12 = smov 0   ;;  %s629_s13 = smov 0   ;;  %s687_s0 = inlined_call_operand.vmem [shape: bf16[32,128], index: 0, kind: input, shape index: {}]   ;;  %s688_s1 = inlined_call_operand.vmem [shape: bf16[128,3], index: 1, kind: input, shape index: {}]   ;;  %s689_s2 = inlined_call_operand.vmem [shape: f32[1,3], index: 2, kind: input, shape index: {}]   ;;  %s690_s3 = inlined_call_operand.vmem [shape: f32[32,3], index: 3, kind: output, shape index: {}]  }
   0x1   :  { %s631_s14 = smov 0  }
   0x2 LB: > { %s32_s15 = sadd.s32 1, %s599_s13  ;;  %p500_p0 = scmp.ge.s32.totalorder %s603_s14, 1  ;;  %s603_s14 = sphi %s631_s14, %s13_s14   ;;  %s599_s13 = sphi %s629_s13, %s692_s13   ;;  %s595_s12 = sphi %s627_s12, %s691_s12  }
   0x3   : > { %p34_p1 = scmp.ge.s32.totalorder %s32_s15, 2  ;;  %p188_p2 = scmp.lt.s32.totalorder %s603_s14, 3 }
   0x5   : > { %s694_s15 = smov (%p34_p1, %s32_s15), 0  ;;  %p189_p3 = pnand %p500_p0, %p188_p2 }
   0x6   : > { %v572_v0 = vld [vmem:[%s688_s1] sm:$0xff] (!%p189_p3)   ;;  %v605_v1 = vmov (!%p189_p3), 0.0   ;;  %v573_v2 = vld [vmem:[%s688_s1 + $0x8] sm:$0xff] (!%p189_p3)   ;;  %vm606_vm0 = vmmov (!%p189_p3), 0   ;;  %s501_s20 = sshll.u32 (!%p189_p3), %s595_s12, 1  ;;  %v574_v3 = vld [vmem:[%s688_s1 + $0x10] sm:$0xff] (!%p189_p3)  }
   0x7   : > { %192 = sbr.rel (%p189_p3) target bundleno = 256 (0x100), region = 32  ;;  %526 = vmatprep.subr.bf16.mxu0 (!%p189_p3), %v605_v1  ;;  %542 = vmatprep.mubr.msk.bf16.mxu0 (!%p189_p3), %vm606_vm0, %v605_v1  ;;  %p230_p4 = scmp.lt.s32.totalorder (!%p189_p3), %s501_s20, 3  ;;  %v575_v4 = vld [vmem:[%s688_s1 + $0x18] sm:$0xff] (!%p189_p3)   ;;  %v576_v5 = vld [vmem:[%s688_s1 + $0x20] sm:$0xff] (!%p189_p3)   ;;  %v577_v6 = vld [vmem:[%s688_s1 + $0x28] sm:$0xff] (!%p189_p3)   ;;  %vm380_vm1 = vcmask (!%p189_p3), 23552  }
   0x8   : > { %527 = vmatpush3.bf16.msra.mxu0 (!%p189_p3), %v572_v0  ;;  %v578_v7 = vld [vmem:[%s688_s1 + $0x30] sm:$0xff] (!%p189_p3)   ;;  %v579_v8 = vld [vmem:[%s688_s1 + $0x38] sm:$0xff] (!%p189_p3)   ;;  %v505_v10 = vld [vmem:[%s689_s2] ss:$0 sm:$0xff] (!%p189_p3) }
   0x9   : > { %528 = vmatprep.subr.bf16.mxu0 (!%p189_p3), %v605_v1 }
   0xc   : > { %529 = vmatpush3.bf16.msra.mxu0 (!%p189_p3), %v573_v2 }
   0xd   : > { %530 = vmatprep.subr.bf16.mxu0 (!%p189_p3), %v605_v1 }
   0xe   : > { %s696_s20 = smov (!%p230_p4, %s501_s20), 3 }
   0xf   : > { %s502_s23 = sshll.u32 %s696_s20, 2  ;;  %s504_s10 = sshll.u32 %s696_s20, 3 }
  0x10   : > { %s236_s26 = scalar_lea.vmem %s687_s0, %s502_s23  ;;  %531 = vmatpush3.bf16.msra.mxu0 %v574_v3  ;;  %s257_s18 = scalar_lea.vmem %s690_s3, %s504_s10 }
  0x11   : > { %532 = vmatprep.subr.bf16.mxu0 %v605_v1  ;;  %v580_v9 = vld [vmem:[%s236_s26] sm:$0xff]  }
  0x14   : > { %533 = vmatpush3.bf16.msra.mxu0 %v575_v4 }
  0x15   : > { %534 = vmatprep.subr.bf16.mxu0 %v605_v1 }
  0x18   : > { %535 = vmatpush3.bf16.msra.mxu0 %v576_v5 }
  0x19   : > { %536 = vmatprep.subr.bf16.mxu0 %v605_v1 }
  0x1c   : > { %537 = vmatpush3.bf16.msra.mxu0 %v577_v6 }
  0x1d   : > { %538 = vmatprep.subr.bf16.mxu0 %v605_v1 }
  0x20   : > { %539 = vmatpush3.bf16.msra.mxu0 %v578_v7 }
  0x21   : > { %540 = vmatprep.subr.bf16.mxu0 %v605_v1 }
  0x24   : > { %541 = vmatpush3.bf16.msra.mxu0 %v579_v8 }
  0x27   : > { %543 = vmatmul.mubr.bf16.vlgmr.msra.gmra.mrb[0].mxu0 %v580_v9 }
  0xfa   : > { %v373_v11 = vpop.f32.mrb[0].mxu0 }
  0xfb   : > { %v374_v12 = vadd.f32 %v505_v10, %v373_v11  ;;  %v544_v13 = vpop.f32.mrb[1].mxu0 }
  0xfc   : > { %v376_v14 = vpop.f32.mrb[2].mxu0 }
  0xfd   : > { %381 = vst.msk [vmem:[%s257_s18] sm:$0xff] %vm380_vm1, %v374_v12  ;;  %v377_v15 = vadd.f32 %v505_v10, %v376_v14  ;;  %v545_v16 = vpop.f32.mrb[3].mxu0 }
  0xff   : > { %382 = vst.msk [vmem:[%s257_s18 + $0x8] sm:$0xff] %vm380_vm1, %v377_v15 }
 0x100 PF: > { %s13_s14 = sadd.s32 1, %s603_s14   ;;  %s691_s12 = smov %s599_s13 }
 0x101   : > { %p10_p5 = scmp.ge.s32.totalorder %s13_s14, 4   ;;  %s692_s13 = smov %s694_s15 }
 0x103   :  { %12 = sbr.rel (!%p10_p5) target bundleno = 2 (0x2), region = 68 }

// kernel: aspmlp_forward.13
= control target key start
LH: loop header
LB: loop body
LE: loop exit
PB: predicated region body
PF: predicated region fallthrough
CT: control target
= control target key end

     0   :  { %s1064_s15 = smov 0   ;;  %s1066_s16 = smov 0   ;;  %s1206_s0 = inlined_call_operand.vmem [shape: bf16[32,512], index: 0, kind: input, shape index: {}]   ;;  %s1207_s1 = inlined_call_operand.vmem [shape: bf16[512,128], index: 1, kind: input, shape index: {}]   ;;  %s1208_s2 = inlined_call_operand.vmem [shape: f32[1,128], index: 2, kind: input, shape index: {}]   ;;  %s1209_s3 = inlined_call_operand.vmem [shape: bf16[32,128], index: 3, kind: input, shape index: {}]   ;;  %s1210_s4 = inlined_call_operand.vmem [shape: bf16[32,128], index: 4, kind: output, shape index: {}]  }
   0x1   :  { %s1068_s17 = smov 0  }
   0x2 LB: > { %s33_s18 = sadd.s32 1, %s1033_s16  ;;  %p848_p0 = scmp.ge.s32.totalorder %s1037_s17, 1  ;;  %s1037_s17 = sphi %s1068_s17, %s14_s17   ;;  %s1033_s16 = sphi %s1066_s16, %s1212_s16   ;;  %s1029_s15 = sphi %s1064_s15, %s1211_s15  }
   0x3   : > { %p35_p1 = scmp.ge.s32.totalorder %s33_s18, 2  ;;  %p232_p2 = scmp.lt.s32.totalorder %s1037_s17, 3 }
   0x5   : > { %s1214_s18 = smov (%p35_p1, %s33_s18), 0  ;;  %p233_p3 = pnand %p848_p0, %p232_p2 }
   0x6   : > { %v977_v0 = vld [vmem:[%s1207_s1 + $0x40] sm:$0xff] (!%p233_p3)   ;;  %v981_v4 = vld [vmem:[%s1207_s1 + $0x48] sm:$0xff] (!%p233_p3)   ;;  %v985_v8 = vld [vmem:[%s1207_s1 + $0x50] sm:$0xff] (!%p233_p3)   ;;  %s849_s29 = sshll.u32 (!%p233_p3), %s1029_s15, 1 }
   0x7   : > { %236 = sbr.rel (%p233_p3) target bundleno = 266 (0x10a), region = 36  ;;  %v978_v1 = vld [vmem:[%s1207_s1 + $0xc0] sm:$0xff] (!%p233_p3)   ;;  %909 = vmatprep.subr.bf16.mxu0 (!%p233_p3), %v977_v0  ;;  %v982_v5 = vld [vmem:[%s1207_s1 + $0xc8] sm:$0xff] (!%p233_p3)   ;;  %v986_v9 = vld [vmem:[%s1207_s1 + $0xd0] sm:$0xff] (!%p233_p3)   ;;  %p287_p4 = scmp.lt.s32.totalorder (!%p233_p3), %s849_s29, 3 }
   0x8   : > { %v979_v2 = vld [vmem:[%s1207_s1] sm:$0xff] (!%p233_p3)   ;;  %931 = vmatprep.subr.bf16.mxu1 (!%p233_p3), %v978_v1  ;;  %v983_v6 = vld [vmem:[%s1207_s1 + $0x8] sm:$0xff] (!%p233_p3)   ;;  %v987_v10 = vld [vmem:[%s1207_s1 + $0x10] sm:$0xff] (!%p233_p3)  }
   0x9   : > { %v980_v3 = vld [vmem:[%s1207_s1 + $0x80] sm:$0xff] (!%p233_p3)   ;;  %910 = vmatpush3.bf16.msra.mxu0 (!%p233_p3), %v979_v2  ;;  %v984_v7 = vld [vmem:[%s1207_s1 + $0x88] sm:$0xff] (!%p233_p3)   ;;  %v988_v11 = vld [vmem:[%s1207_s1 + $0x90] sm:$0xff] (!%p233_p3)  }
   0xa   : > { %932 = vmatpush3.bf16.msra.mxu1 (!%p233_p3), %v980_v3  ;;  %911 = vmatprep.subr.bf16.mxu0 (!%p233_p3), %v981_v4  ;;  %v989_v12 = vld [vmem:[%s1207_s1 + $0x58] sm:$0xff] (!%p233_p3)   ;;  %v993_v16 = vld [vmem:[%s1207_s1 + $0x60] sm:$0xff] (!%p233_p3)   ;;  %v997_v20 = vld [vmem:[%s1207_s1 + $0x68] sm:$0xff] (!%p233_p3)  }
   0xb   : > { %933 = vmatprep.subr.bf16.mxu1 (!%p233_p3), %v982_v5  ;;  %v990_v13 = vld [vmem:[%s1207_s1 + $0xd8] sm:$0xff] (!%p233_p3)   ;;  %v994_v17 = vld [vmem:[%s1207_s1 + $0xe0] sm:$0xff] (!%p233_p3)   ;;  %v998_v21 = vld [vmem:[%s1207_s1 + $0xe8] sm:$0xff] (!%p233_p3)  }
   0xc   : > { %v991_v14 = vld [vmem:[%s1207_s1 + $0x18] sm:$0xff] (!%p233_p3)   ;;  %v995_v18 = vld [vmem:[%s1207_s1 + $0x20] sm:$0xff] (!%p233_p3)   ;;  %v999_v22 = vld [vmem:[%s1207_s1 + $0x28] sm:$0xff] (!%p233_p3)  }
   0xd   : > { %912 = vmatpush3.bf16.msra.mxu0 (!%p233_p3), %v983_v6  ;;  %v992_v15 = vld [vmem:[%s1207_s1 + $0x98] sm:$0xff] (!%p233_p3)   ;;  %v996_v19 = vld [vmem:[%s1207_s1 + $0xa0] sm:$0xff] (!%p233_p3)   ;;  %v1000_v23 = vld [vmem:[%s1207_s1 + $0xa8] sm:$0xff] (!%p233_p3)  }
   0xe   : > { %934 = vmatpush3.bf16.msra.mxu1 %v984_v7  ;;  %913 = vmatprep.subr.bf16.mxu0 %v985_v8  ;;  %s1216_s29 = smov (!%p287_p4, %s849_s29), 3  ;;  %v1001_v24 = vld [vmem:[%s1207_s1 + $0x70] sm:$0xff]   ;;  %v1005_v28 = vld [vmem:[%s1207_s1 + $0x78] sm:$0xff]   ;;  %v856_v38 = vld [vmem:[%s1208_s2] ss:$0 sm:$0xff] }
   0xf   : > { %935 = vmatprep.subr.bf16.mxu1 %v986_v9  ;;  %v1002_v25 = vld [vmem:[%s1207_s1 + $0xf0] sm:$0xff]   ;;  %s897_s30 = sshll.u32 %s1216_s29, 4  ;;  %v1006_v29 = vld [vmem:[%s1207_s1 + $0xf8] sm:$0xff]   ;;  %s853_s21 = sshll.u32 %s1216_s29, 2 }
  0x10   : > { %v1003_v26 = vld [vmem:[%s1207_s1 + $0x30] sm:$0xff]   ;;  %s294_s12 = scalar_lea.vmem %s1206_s0, %s897_s30  ;;  %v1007_v30 = vld [vmem:[%s1207_s1 + $0x38] sm:$0xff]   ;;  %s316_s24 = scalar_lea.vmem %s1209_s3, %s853_s21 }
  0x11   : > { %914 = vmatpush3.bf16.msra.mxu0 %v987_v10  ;;  %v1004_v27 = vld [vmem:[%s1207_s1 + $0xb0] sm:$0xff]   ;;  %v1008_v31 = vld [vmem:[%s1207_s1 + $0xb8] sm:$0xff]   ;;  %v901_v44 = vld [vmem:[%s316_s24] sm:$0xff]   ;;  %s325_s28 = scalar_lea.vmem %s1210_s4, %s853_s21 }
  0x12   : > { %936 = vmatpush3.bf16.msra.mxu1 %v988_v11  ;;  %915 = vmatprep.subr.bf16.mxu0 %v989_v12  ;;  %v1009_v32 = vld [vmem:[%s294_s12] ss:$16 sps:$4 sm:$0xff]   ;;  %v1011_v33 = vld [vmem:[%s294_s12 + $0x4] ss:$16 sps:$4 sm:$0xff]   ;;  %v1012_v34 = vld [vmem:[%s294_s12 + $0x8] ss:$16 sps:$4 sm:$0xff]   ;;  %v902_v52 = vunpack.c.l.bf16 %v901_v44  ;;  %v903_v54 = vunpack.c.h.bf16 %v901_v44 }
  0x13   : > { %937 = vmatprep.subr.bf16.mxu1 %v990_v13  ;;  %v1014_v35 = vld [vmem:[%s294_s12 + $0xc] ss:$16 sps:$4 sm:$0xff]   ;;  %647 = vmatprep.mubr.bf16.mxu0 %v1011_v33 }
  0x14   : > { %688 = vmatprep.mubr.bf16.mxu1 %v1014_v35 }
  0x15   : > { %916 = vmatpush3.bf16.msra.mxu0 %v991_v14 }
  0x16   : > { %938 = vmatpush3.bf16.msra.mxu1 %v992_v15  ;;  %917 = vmatprep.subr.bf16.mxu0 %v993_v16 }
  0x17   : > { %939 = vmatprep.subr.bf16.mxu1 %v994_v17 }
  0x19   : > { %918 = vmatpush3.bf16.msra.mxu0 %v995_v18 }
  0x1a   : > { %940 = vmatpush3.bf16.msra.mxu1 %v996_v19  ;;  %919 = vmatprep.subr.bf16.mxu0 %v997_v20 }
  0x1b   : > { %941 = vmatprep.subr.bf16.mxu1 %v998_v21 }
  0x1d   : > { %920 = vmatpush3.bf16.msra.mxu0 %v999_v22 }
  0x1e   : > { %942 = vmatpush3.bf16.msra.mxu1 %v1000_v23  ;;  %921 = vmatprep.subr.bf16.mxu0 %v1001_v24 }
  0x1f   : > { %943 = vmatprep.subr.bf16.mxu1 %v1002_v25 }
  0x21   : > { %922 = vmatpush3.bf16.msra.mxu0 %v1003_v26 }
  0x22   : > { %944 = vmatpush3.bf16.msra.mxu1 %v1004_v27  ;;  %923 = vmatprep.subr.bf16.mxu0 %v1005_v28 }
  0x23   : > { %945 = vmatprep.subr.bf16.mxu1 %v1006_v29 }
  0x25   : > { %924 = vmatpush3.bf16.msra.mxu0 %v1007_v30 }
  0x26   : > { %946 = vmatpush3.bf16.msra.mxu1 %v1008_v31 }
  0x28   : > { %648 = vmatmul.mubr.bf16.vlgmr.msra.gmra.mrb[0].mxu0 %v1009_v32 }
  0x29   : > { %689 = vmatmul.mubr.bf16.vlgmr.msra.gmra.mrb[0].mxu1 %v1012_v34 }
  0xfb   : > { %v925_v36 = vpop.f32.mrb[0].mxu0 }
  0xfc   : > { %v947_v37 = vpop.f32.mrb[0].mxu1  ;;  %v926_v39 = vpop.f32.mrb[1].mxu0 }
  0xfd   : > { %v927_v40 = vadd.f32 %v926_v39, %v925_v36  ;;  %v948_v41 = vpop.f32.mrb[1].mxu1  ;;  %v928_v42 = vpop.f32.mrb[2].mxu0 }
  0xfe   : > { %v949_v43 = vadd.f32 %v948_v41, %v947_v37  ;;  %v950_v45 = vpop.f32.mrb[2].mxu1  ;;  %v929_v46 = vpop.f32.mrb[3].mxu0 }
  0xff   : > { %v650_v47 = vadd.f32 %v927_v40, %v856_v38  ;;  %v930_v48 = vadd.f32 %v929_v46, %v928_v42  ;;  %v951_v49 = vpop.f32.mrb[3].mxu1 }
 0x100   : > { %v952_v50 = vadd.f32 %v951_v49, %v950_v45 }
 0x101   : > { %v691_v51 = vadd.f32 %v949_v43, %v650_v47  ;;  %v653_v53 = vadd.f32 %v930_v48, %v856_v38 }
 0x103   : > { %v694_v55 = vadd.f32 %v952_v50, %v653_v53  ;;  %v701_v56 = vadd.f32 %v902_v52, %v691_v51 }
 0x105   : > { %v702_v57 = vadd.f32 %v903_v54, %v694_v55 }
 0x107   : > { %v907_v58 = vpack.c.bf16 %v702_v57, %v701_v56 }
 0x109   : > { %908 = vst [vmem:[%s325_s28] sm:$0xff] %v907_v58  }
 0x10a PF: > { %s14_s17 = sadd.s32 1, %s1037_s17   ;;  %s1211_s15 = smov %s1033_s16 }
 0x10b   : > { %p11_p5 = scmp.ge.s32.totalorder %s14_s17, 4   ;;  %s1212_s16 = smov %s1214_s18 }
 0x10d   :  { %13 = sbr.rel (!%p11_p5) target bundleno = 2 (0x2), region = 75 }

// kernel: aspmlp_forward.11
= control target key start
LH: loop header
LB: loop body
LE: loop exit
PB: predicated region body
PF: predicated region fallthrough
CT: control target
= control target key end

     0   :  { %s1866_s30 = smov 0   ;;  %s2401_s0 = inlined_call_operand.vmem [shape: bf16[2,16,128], index: 0, kind: input, shape index: {}]   ;;  %s2402_s1 = inlined_call_operand.vmem [shape: bf16[128,128], index: 1, kind: input, shape index: {}]   ;;  %s2403_s2 = inlined_call_operand.vmem [shape: f32[1,128], index: 2, kind: input, shape index: {}]   ;;  %s2404_s3 = inlined_call_operand.vmem [shape: bf16[2,128,128], index: 3, kind: input, shape index: {}]   ;;  %s2405_s4 = inlined_call_operand.vmem [shape: f32[2,1,128], index: 4, kind: input, shape index: {}]   ;;  %s2406_s5 = inlined_call_operand.vmem [shape: bf16[128,128], index: 5, kind: input, shape index: {}]   ;;  %s2407_s6 = inlined_call_operand.vmem [shape: f32[1,128], index: 6, kind: input, shape index: {}]   ;;  %s2408_s7 = inlined_call_operand.vmem [shape: f32[8,128], index: 7, kind: input, shape index: {}]   ;;  %s2409_s8 = inlined_call_operand.vmem [shape: bf16[2,16,128], index: 8, kind: output, shape index: {0}]   ;;  %s2410_s9 = inlined_call_operand.vmem [shape: bf16[2,16,128], index: 9, kind: output, shape index: {1}]  }
   0x1 LB: > { %s1503_s10 = sadd.s32 4294967295, %s1812_s30   ;;  %p1507_p0 = scmp.ge.s32.totalorder %s1812_s30, 1  ;;  %s1812_s30 = sphi %s1866_s30, %s20_s30  }
   0x2   : > { %p290_p1 = scmp.lt.s32.totalorder %s1812_s30, 3 }
   0x4   : > { %p291_p2 = pnand %p1507_p0, %p290_p1 }
   0x5   : > { %p331_p3 = scmp.lt.s32.totalorder (!%p291_p2), %s1503_s10, 1  ;;  %v1746_v17 = vld [vmem:[%s2402_s1] sm:$0xff] (!%p291_p2)   ;;  %v1814_v18 = vmov (!%p291_p2), 0.0   ;;  %v1747_v19 = vld [vmem:[%s2402_s1 + $0x8] sm:$0xff] (!%p291_p2)   ;;  %v1748_v20 = vld [vmem:[%s2402_s1 + $0x10] sm:$0xff] (!%p291_p2)   ;;  %vm2411_vm0 = vmmov (!%p291_p2), 0   ;;  %v386_v35 = vlaneseq (!%p291_p2) }
   0x6   : > { %294 = sbr.rel (%p291_p2) target bundleno = 2733 (0xaad), region = 52  ;;  %1632 = vmatprep.subr.bf16.mxu0 (!%p291_p2), %v1814_v18  ;;  %v1749_v21 = vld [vmem:[%s2402_s1 + $0x18] sm:$0xff] (!%p291_p2)   ;;  %v1750_v22 = vld [vmem:[%s2402_s1 + $0x20] sm:$0xff] (!%p291_p2)   ;;  %v1751_v23 = vld [vmem:[%s2402_s1 + $0x28] sm:$0xff] (!%p291_p2)   ;;  %1648 = vmatprep.mubr.msk.bf16.mxu0 (!%p291_p2), %vm2411_vm0, %v1814_v18 }
   0x7   : > { %1633 = vmatpush3.bf16.msra.mxu0 (!%p291_p2), %v1746_v17  ;;  %v1752_v26 = vld [vmem:[%s2402_s1 + $0x30] sm:$0xff] (!%p291_p2)   ;;  %v1753_v29 = vld [vmem:[%s2402_s1 + $0x38] sm:$0xff] (!%p291_p2)   ;;  %v1923_v36 = vshrl.u32 (!%p291_p2), %v386_v35, 7  ;;  %v1929_v38 = vld [vmem:[%s2408_s7] sm:$0xff] (!%p291_p2) }
   0x8   : > { %1634 = vmatprep.subr.bf16.mxu0 (!%p291_p2), %v1814_v18  ;;  %v1514_v50 = vld [vmem:[%s2403_s2] ss:$0 sm:$0xff] (!%p291_p2) }
   0x9   : > { %v388_v37 = vsub.s32 (!%p291_p2), 0, %v1923_v36  ;;  %v394_v39 = vsub.s32 (!%p291_p2), 1, %v1923_v36  ;;  %v1755_v17 = vld [vmem:[%s2404_s3] sm:$0xff] (!%p291_p2)   ;;  %vm779_vm11 = vcmp.ge.s32.totalorder (!%p291_p2), %v1923_v36, 4  ;;  %vm2441_vm15 = vcmp.lt.s32.totalorder (!%p291_p2), %v1923_v36, 6 }
   0xa   : > { %1652 = vmatprep.subr.bf16.mxu1 (!%p291_p2), %v1755_v17 }
   0xb   : > { %1635 = vmatpush3.bf16.msra.mxu0 (!%p291_p2), %v1747_v19  ;;  %v389_v40 = vrot.slane (!%p291_p2), %v1929_v38, %v388_v37  ;;  %v395_v44 = vrot.slane (!%p291_p2), %v1929_v38, %v394_v39  ;;  %1653 = vmatpush3.bf16.msra.mxu1 (!%p291_p2), %v1755_v17  ;;  %v1756_v19 = vld [vmem:[%s2404_s3 + $0x48] sm:$0xff] (!%p291_p2)   ;;  %v547_v37 = vsub.s32 (!%p291_p2), 2, %v1923_v36  ;;  %v553_v39 = vsub.s32 (!%p291_p2), 3, %v1923_v36 }
   0xc   : > { %1636 = vmatprep.subr.bf16.mxu0 (!%p291_p2), %v1814_v18 }
   0xd   : > { %s2490_s10 = smov (!%p331_p3, %s1503_s10), 1 }
   0xe   : > { %s1874_s11 = sshll.u32 %s2490_s10, 3 }
   0xf   : > { %s335_s14 = scalar_lea.vmem %s2401_s0, %s1874_s11  ;;  %1637 = vmatpush3.bf16.msra.mxu0 %v1748_v20  ;;  %v1757_v20 = vld [vmem:[%s2404_s3 + $0x8] sm:$0xff]  }
  0x10   : > { %v1581_v0 = vld [vmem:[%s335_s14] sm:$0xff]   ;;  %1638 = vmatprep.subr.bf16.mxu0 %v1814_v18  ;;  %1654 = vmatprep.subr.bf16.mxu1 %v1757_v20 }
  0x11   : > { %v1880_v1 = vunpack.c.l.bf16 %v1581_v0  ;;  %v1882_v2 = vunpack.c.h.bf16 %v1581_v0  ;;  %1655 = vmatpush3.bf16.msra.mxu1 %v1757_v20 }
  0x13   : > { %v352_v3 = vadd.f32 %v1882_v2, %v1880_v1  ;;  %1639 = vmatpush3.bf16.msra.mxu0 %v1749_v21  ;;  %v1758_v21 = vld [vmem:[%s2404_s3 + $0x50] sm:$0xff]  }
  0x14   : > { %1640 = vmatprep.subr.bf16.mxu0 %v1814_v18 }
  0x15   : > { %353 = vadd.xlane.f32.xlu0 %v352_v3 }
  0x17   : > { %1641 = vmatpush3.bf16.msra.mxu0 %v1750_v22  ;;  %v1759_v22 = vld [vmem:[%s2404_s3 + $0x10] sm:$0xff]  }
  0x18   : > { %1642 = vmatprep.subr.bf16.mxu0 %v1814_v18  ;;  %1656 = vmatprep.subr.bf16.mxu1 %v1759_v22 }
  0x19   : > { %1657 = vmatpush3.bf16.msra.mxu1 %v1759_v22 }
  0x1b   : > { %1643 = vmatpush3.bf16.msra.mxu0 %v1751_v23  ;;  %v1760_v23 = vld [vmem:[%s2404_s3 + $0x58] sm:$0xff]  }
  0x1c   : > { %1644 = vmatprep.subr.bf16.mxu0 %v1814_v18 }
  0x1f   : > { %1645 = vmatpush3.bf16.msra.mxu0 %v1752_v26  ;;  %v1763_v26 = vld [vmem:[%s2404_s3 + $0x20] sm:$0xff]  }
  0x20   : > { %1646 = vmatprep.subr.bf16.mxu0 %v1814_v18 }
  0x23   : > { %1647 = vmatpush3.bf16.msra.mxu0 %v1753_v29  ;;  %v1766_v29 = vld [vmem:[%s2404_s3 + $0x70] sm:$0xff]  }
  0xa2   : > { %v354_v4 = vpop.xlane.xlu0 %353 }
  0xa3   : > { %v355_v5 = vrot.slane %v354_v4, 4 }
  0xa5   : > { %v356_v6 = vadd.f32 %v355_v5, %v354_v4 }
  0xa7   : > { %v357_v7 = vrot.slane %v356_v6, 2 }
  0xa9   : > { %v358_v8 = vadd.f32 %v357_v7, %v356_v6 }
  0xab   : > { %v359_v9 = vrot.slane %v358_v8, 1 }
  0xad   : > { %v360_v10 = vadd.f32 %v359_v9, %v358_v8 }
  0xaf   : > { %1712 = vpush %v360_v10 }
  0xe0   : > { %s1713_s15 = spop %1712 }
  0xe1   : > { %s362_s16 = smul.f32 0.00048828125, %s1713_s15 }
  0xe3   : > { %v363_v11 = vstv %s362_s16 }
  0xe4   : > { %v364_v12 = vsub.f32 %v1880_v1, %v363_v11  ;;  %v365_v13 = vsub.f32 %v1882_v2, %v363_v11 }
  0xe6   : > { %v366_v14 = vmul.f32 %v364_v12, %v364_v12  ;;  %v367_v15 = vmul.f32 %v365_v13, %v365_v13 }
  0xe8   : > { %v368_v16 = vadd.f32 %v367_v15, %v366_v14  ;;  %v1754_v15 = vld [vmem:[%s2404_s3 + $0x40] sm:$0xff]  }
  0xe9   : > { %1672 = vmatprep.subr.bf16.mxu0 %v1754_v15 }
  0xea   : > { %369 = vadd.xlane.f32.xlu0 %v368_v16 }
 0x177   : > { %v370_v24 = vpop.xlane.xlu0 %369 }
 0x178   : > { %v371_v25 = vrot.slane %v370_v24, 4 }
 0x17a   : > { %v372_v27 = vadd.f32 %v371_v25, %v370_v24  ;;  %v1761_v24 = vld [vmem:[%s2404_s3 + $0x18] sm:$0xff]   ;;  %v1762_v25 = vld [vmem:[%s2404_s3 + $0x60] sm:$0xff]  }
 0x17b   : > { %1658 = vmatprep.subr.bf16.mxu1 %v1761_v24 }
 0x17c   : > { %v373_v28 = vrot.slane %v372_v27, 2  ;;  %1659 = vmatpush3.bf16.msra.mxu1 %v1761_v24 }
 0x17d   : > { %1660 = vmatprep.subr.bf16.mxu1 %v1763_v26 }
 0x17e   : > { %v374_v30 = vadd.f32 %v373_v28, %v372_v27  ;;  %v1764_v27 = vld [vmem:[%s2404_s3 + $0x68] sm:$0xff]  }
 0x17f   : > { %v1765_v28 = vld [vmem:[%s2404_s3 + $0x28] sm:$0xff]  }
 0x180   : > { %v375_v31 = vrot.slane %v374_v30, 1  ;;  %1661 = vmatpush3.bf16.msra.mxu1 %v1763_v26 }
 0x181   : > { %1662 = vmatprep.subr.bf16.mxu1 %v1765_v28 }
 0x182   : > { %v376_v32 = vadd.f32 %v375_v31, %v374_v30  ;;  %v1767_v30 = vld [vmem:[%s2404_s3 + $0x30] sm:$0xff]   ;;  %v1768_v31 = vld [vmem:[%s2404_s3 + $0x78] sm:$0xff]  }
 0x184   : > { %1714 = vpush %v376_v32  ;;  %1663 = vmatpush3.bf16.msra.mxu1 %v1765_v28  ;;  %v1769_v32 = vld [vmem:[%s2404_s3 + $0x38] sm:$0xff]  }
 0x185   : > { %1664 = vmatprep.subr.bf16.mxu1 %v1767_v30 }
 0x188   : > { %1665 = vmatpush3.bf16.msra.mxu1 %v1767_v30 }
 0x189   : > { %1666 = vmatprep.subr.bf16.mxu1 %v1769_v32 }
 0x18c   : > { %1667 = vmatpush3.bf16.msra.mxu1 %v1769_v32 }
 0x18d   : > { %1692 = vmatprep.subr.bf16.mxu1 %v1814_v18 }
 0x1b5   : > { %s1715_s14 = spop %1714 }
 0x1b6   : > { %s378_s15 = smul.f32 0.00048828125, %s1715_s14  ;;  %s340_s14 = scalar_lea.vmem %s2409_s8, %s1874_s11 }
 0x1b8   : > { %s379_s16 = sadd.f32 1e-05, %s378_s15 }
 0x1ba   : > { %v380_v33 = vstv %s379_s16 }
 0x1bb   : > { %1778 = vrsqrt.f32 %v380_v33 }
 0x1c5   : > { %v1779_v34 = vpop.eup %1778 }
 0x1c6   : > { %1716 = vpush %v1779_v34 }
 0x1f7   : > { %s1717_s19 = spop %1716 }
 0x1f8   : > { %v383_v41 = vstv %s1717_s19 }
 0x1f9   : > { %v384_v42 = vmul.f32 %v383_v41, %v364_v12  ;;  %v385_v43 = vmul.f32 %v383_v41, %v365_v13 }
 0x1fb   : > { %v390_v45 = vmul.f32 %v389_v40, %v384_v42  ;;  %v391_v46 = vmul.f32 %v389_v40, %v385_v43  ;;  %v548_v40 = vrot.slane %v1929_v38, %v547_v37 }
 0x1fd   : > { %v396_v47 = vadd.f32 %v395_v44, %v390_v45  ;;  %v397_v48 = vadd.f32 %v395_v44, %v391_v46  ;;  %v554_v44 = vrot.slane %v1929_v38, %v553_v39 }
 0x1ff   : > { %v399_v49 = vpack.c.bf16 %v397_v48, %v396_v47 }
 0x201   : > { %1649 = vmatmul.mubr.bf16.vlgmr.msra.gmra.mrb[0].mxu0 %v399_v49 }
 0x202   : > { %1673 = vmatpush3.bf16.msra.mxu0 %v1754_v15 }
 0x203   : > { %1674 = vmatprep.subr.bf16.mxu0 %v1756_v19 }
 0x206   : > { %1675 = vmatpush3.bf16.msra.mxu0 %v1756_v19  ;;  %v2431_v19 = vmov 0 }
 0x207   : > { %1676 = vmatprep.subr.bf16.mxu0 %v1758_v21 }
 0x20a   : > { %1677 = vmatpush3.bf16.msra.mxu0 %v1758_v21 }
 0x20b   : > { %1678 = vmatprep.subr.bf16.mxu0 %v1760_v23 }
 0x20e   : > { %1679 = vmatpush3.bf16.msra.mxu0 %v1760_v23 }
 0x20f   : > { %1680 = vmatprep.subr.bf16.mxu0 %v1762_v25 }
 0x212   : > { %1681 = vmatpush3.bf16.msra.mxu0 %v1762_v25 }
 0x213   : > { %1682 = vmatprep.subr.bf16.mxu0 %v1764_v27 }
 0x216   : > { %1683 = vmatpush3.bf16.msra.mxu0 %v1764_v27  ;;  %v2435_v27 = vmov 0 }
 0x217   : > { %1684 = vmatprep.subr.bf16.mxu0 %v1766_v29 }
 0x21a   : > { %1685 = vmatpush3.bf16.msra.mxu0 %v1766_v29 }
 0x21b   : > { %1686 = vmatprep.subr.bf16.mxu0 %v1768_v31 }
 0x21e   : > { %1687 = vmatpush3.bf16.msra.mxu0 %v1768_v31 }
 0x2d4   : > { %v504_v51 = vpop.f32.mrb[0].mxu0 }
 0x2d5   : > { %v1650_v52 = vpop.f32.mrb[1].mxu0  ;;  %v505_v54 = vadd.f32 %v1514_v50, %v504_v51 }
 0x2d6   : > { %v507_v53 = vpop.f32.mrb[2].mxu0 }
 0x2d7   : > { %v508_v55 = vadd.f32 %v1514_v50, %v507_v53  ;;  %v1651_v56 = vpop.f32.mrb[3].mxu0 }
 0x2d9   : > { %v511_v57 = vadd.f32 %v508_v55, %v505_v54 }
 0x2db   : > { %512 = vadd.xlane.f32.xlu1 %v511_v57 }
 0x368   : > { %v513_v58 = vpop.xlane.xlu1 %512 }
 0x369   : > { %v514_v59 = vrot.slane %v513_v58, 4 }
 0x36b   : > { %v515_v60 = vadd.f32 %v514_v59, %v513_v58  ;;  %v2001_v59 = vand.u32 127, %v386_v35 }
 0x36d   : > { %v516_v61 = vrot.slane %v515_v60, 2  ;;  %vm607_vm1 = vcmp.ge.s32.totalorder %v2001_v59, 26  ;;  %vm608_vm2 = vcmp.lt.s32.totalorder %v2001_v59, 52  ;;  %vm613_vm3 = vcmp.ge.s32.totalorder %v2001_v59, 78 }
 0x36e   : > { %vm614_vm4 = vcmp.lt.s32.totalorder %v2001_v59, 104  ;;  %vm610_vm5 = vcmp.ge.s32.totalorder %v2001_v59, 52  ;;  %vm611_vm6 = vcmp.lt.s32.totalorder %v2001_v59, 78  ;;  %vm2015_vm7 = vmand %vm607_vm1, %vm608_vm2  ;;  %vm2413_vm9 = vcmp.lt.s32.totalorder %v2001_v59, 26 }
 0x36f   : > { %v517_v62 = vadd.f32 %v516_v61, %v515_v60  ;;  %v577_v60 = vadd.s32 8, %v1923_v36  ;;  %v2007_v61 = vand.u32 3, %v1923_v36  ;;  %vm2020_vm10 = vmand %vm613_vm3, %vm614_vm4 }
 0x370   : > { %vm2025_vm12 = vmand %vm610_vm5, %vm611_vm6 }
 0x371   : > { %v518_v63 = vrot.slane %v517_v62, 1  ;;  %vm759_vm8 = vcmp.lt.s32.totalorder %v577_v60, 12  ;;  %vm659_vm14 = vcmp.lt.s32.totalorder %v2007_v61, 3  ;;  %vm634_vm1 = vcmp.lt.s32.totalorder %v2007_v61, 2  ;;  %vm2045_vm5 = vmand %vm2020_vm10, %vm779_vm11 }
 0x372   : > { %vm2035_vm2 = vmand %vm2015_vm7, %vm759_vm8 }
 0x373   : > { %v519_v0 = vadd.f32 %v518_v63, %v517_v62  ;;  %v2013_v62 = vand.u32 3, %v577_v60  ;;  %vm2055_vm0 = vmand %vm2413_vm9, %vm634_vm1  ;;  %vm2415_vm1 = vcmp.ge.s32.totalorder %v2007_v61, 1 }
 0x374   : > { %vm2442_vm3 = vmmov %vm2441_vm15 }
 0x375   : > { %1718 = vpush %v519_v0  ;;  %vm2412_vm4 = vcmp.lt.s32.totalorder %v2013_v62, 2  ;;  %vm2414_vm8 = vcmp.lt.s32.totalorder %v2013_v62, 3 }
 0x376   : > { %vm2068_vm6 = vmand %vm2413_vm9, %vm2412_vm4 }
 0x377   : > { %vm2082_vm4 = vmand %vm2015_vm7, %vm659_vm14 }
 0x378   : > { %v2432_v19 = vsel %vm2082_vm4, 4294967295, %v2431_v19  ;;  %vm2098_vm13 = vmand %vm2015_vm7, %vm2414_vm8  ;;  %vm2437_vm8 = vcmp.lt.s32.totalorder %v1923_v36, 4 }
 0x379   : > { %vm2438_vm11 = vmmov %vm2437_vm8 }
 0x3a6   : > { %s1719_s22 = spop %1718 }
 0x3a7   : > { %s521_s23 = smul.f32 0.00048828125, %s1719_s22 }
 0x3a9   : > { %v522_v3 = vstv %s521_s23  ;;  %s345_s23 = scalar_lea.vmem %s2410_s9, %s1874_s11 }
 0x3aa   : > { %v1937_v4 = vsub.f32 %v505_v54, %v522_v3  ;;  %v1939_v5 = vsub.f32 %v508_v55, %v522_v3  ;;  %v1549_v3 = vld [vmem:[%s2405_s4 + $0x1] ss:$0 sm:$0xff] }
 0x3ac   : > { %v525_v6 = vmul.f32 %v1937_v4, %v1937_v4  ;;  %v526_v7 = vmul.f32 %v1939_v5, %v1939_v5 }
 0x3ae   : > { %v527_v8 = vadd.f32 %v526_v7, %v525_v6 }
 0x3b0   : > { %528 = vadd.xlane.f32.xlu1 %v527_v8 }
 0x43d   : > { %v529_v9 = vpop.xlane.xlu1 %528 }
 0x43e   : > { %v530_v10 = vrot.slane %v529_v9, 4 }
 0x440   : > { %v531_v11 = vadd.f32 %v530_v10, %v529_v9 }
 0x442   : > { %v532_v12 = vrot.slane %v531_v11, 2 }
 0x444   : > { %v533_v13 = vadd.f32 %v532_v12, %v531_v11 }
 0x446   : > { %v534_v14 = vrot.slane %v533_v13, 1 }
 0x448   : > { %v535_v16 = vadd.f32 %v534_v14, %v533_v13 }
 0x44a   : > { %1720 = vpush %v535_v16 }
 0x47b   : > { %s1721_s18 = spop %1720 }
 0x47c   : > { %s537_s19 = smul.f32 0.00048828125, %s1721_s18 }
 0x47e   : > { %s538_s20 = sadd.f32 1e-05, %s537_s19 }
 0x480   : > { %v539_v33 = vstv %s538_s20 }
 0x481   : > { %1780 = vrsqrt.f32 %v539_v33  ;;  %v2439_v33 = vmov 0 }
 0x48b   : > { %v1781_v34 = vpop.eup %1780 }
 0x48c   : > { %1722 = vpush %v1781_v34 }
 0x4bd   : > { %s1723_s21 = spop %1722 }
 0x4be   : > { %v542_v41 = vstv %s1723_s21 }
 0x4bf   : > { %v543_v42 = vmul.f32 %v542_v41, %v1937_v4  ;;  %v544_v43 = vmul.f32 %v542_v41, %v1939_v5 }
 0x4c1   : > { %v549_v45 = vmul.f32 %v548_v40, %v543_v42  ;;  %v550_v46 = vmul.f32 %v548_v40, %v544_v43 }
 0x4c3   : > { %v555_v47 = vadd.f32 %v554_v44, %v549_v45  ;;  %v556_v48 = vadd.f32 %v554_v44, %v550_v46 }
 0x4c5   : > { %v559_v49 = vmul.f32 0.044715, %v555_v47  ;;  %v560_v50 = vmul.f32 0.044715, %v556_v48  ;;  %v557_v5 = vmul.f32 0.5, %v555_v47  ;;  %v558_v8 = vmul.f32 0.5, %v556_v48 }
 0x4c7   : > { %v561_v51 = vmul.f32 %v559_v49, %v555_v47  ;;  %v562_v52 = vmul.f32 %v560_v50, %v556_v48 }
 0x4c9   : > { %v563_v53 = vmul.f32 %v561_v51, %v555_v47  ;;  %v564_v54 = vmul.f32 %v562_v52, %v556_v48 }
 0x4cb   : > { %v565_v55 = vadd.f32 %v563_v53, %v555_v47  ;;  %v566_v56 = vadd.f32 %v564_v54, %v556_v48 }
 0x4cd   : > { %v567_v57 = vmul.f32 0.7978846, %v565_v55  ;;  %v568_v58 = vmul.f32 0.7978846, %v566_v56 }
 0x4cf   : > { %1782 = vtanh.f32 %v567_v57 }
 0x4d0   : > { %1784 = vtanh.f32 %v568_v58 }
 0x4d9   : > { %v1783_v0 = vpop.eup %1782 }
 0x4da   : > { %v1785_v4 = vpop.eup %1784  ;;  %v571_v6 = vadd.f32 1.0, %v1783_v0 }
 0x4db   : > { %v572_v9 = vadd.f32 1.0, %v1785_v4 }
 0x4dc   : > { %v2051_v11 = vmul.f32 %v571_v6, %v557_v5 }
 0x4dd   : > { %v2062_v13 = vmul.f32 %v572_v9, %v558_v8 }
 0x4de   : > { %v825_v15 = vrot.slane %v2051_v11, 4  ;;  %v619_v16 = vrot.slane %v2051_v11, 2  ;;  %v644_v17 = vrot.slane %v2051_v11, 1  ;;  %v673_v20 = vrot.slane %v2051_v11, 7 }
 0x4df   : > { %v823_v21 = vsel %vm2413_vm9, %v2062_v13, 0.0  ;;  %v826_v22 = vrot.slane %v2062_v13, 4  ;;  %v620_v23 = vrot.slane %v2062_v13, 2  ;;  %v645_v24 = vrot.slane %v2062_v13, 1  ;;  %vm2108_vm9 = vmand %vm2020_vm10, %vm2415_vm1 }
 0x4e0   : > { %v674_v26 = vrot.slane %v2062_v13, 7  ;;  %v2436_v27 = vsel %vm2108_vm9, 4294967295, %v2435_v27  ;;  %v698_v28 = vrot.slane %v2051_v11, 6  ;;  %v699_v29 = vrot.slane %v2062_v13, 6  ;;  %vm2123_vm1 = vmand %vm2045_vm5, %vm659_vm14 }
 0x4e1   : > { %v774_v30 = vrot.slane %v2051_v11, 3  ;;  %v828_v31 = vsel %vm2437_vm8, %v825_v15, %v826_v22  ;;  %v829_v32 = vsel %vm2438_vm11, %v826_v22, %v825_v15  ;;  %v2440_v33 = vsel %vm2123_vm1, 4294967295, %v2439_v33 }
 0x4e2   : > { %v622_v34 = vsel %vm2441_vm15, %v619_v16, %v620_v23  ;;  %v623_v37 = vsel %vm2442_vm3, %v620_v23, %v619_v16  ;;  %vm2443_vm9 = vcmp.ge.s32.totalorder %v2013_v62, 1  ;;  %v830_v40 = vsel %vm2015_vm7, %v828_v31, %v823_v21 }
 0x4e3   : > { %vm2135_vm8 = vmand %vm2020_vm10, %vm2443_vm9  ;;  %v831_v41 = vsel %vm2035_vm2, %v829_v32, 0.0  ;;  %v642_v42 = vsel %vm2055_vm0, %v622_v34, 0.0  ;;  %v643_v43 = vsel %vm2068_vm6, %v623_v37, 0.0  ;;  %vm2446_vm14 = vcmp.ge.s32.totalorder %v2007_v61, 2 }
 0x4e4   : > { %vm2447_vm15 = vcmp.ge.s32.totalorder %v2001_v59, 104  ;;  %v832_v45 = vsel %vm2025_vm12, %v2051_v11, %v830_v40  ;;  %v833_v46 = vsel %vm2025_vm12, %v2062_v13, %v831_v41  ;;  %vm2450_vm3 = vcmp.lt.s32.totalorder %v1923_v36, 7 }
 0x4e5   : > { %vm2151_vm9 = vmand %vm2447_vm15, %vm2446_vm14  ;;  %v647_v47 = vsel %vm2450_vm3, %v644_v17, %v645_v24  ;;  %vm2452_vm11 = vcmp.ge.s32.totalorder %v2013_v62, 2  ;;  %v834_v50 = vsel %vm2045_vm5, %v829_v32, %v832_v45  ;;  %v835_v51 = vsel %vm2020_vm10, %v828_v31, %v833_v46 }
 0x4e6   : > { %vm2451_vm6 = vmmov %vm2450_vm3  ;;  %v667_v52 = vsel %vm2082_vm4, %v647_v47, %v642_v42  ;;  %vm2456_vm3 = vcmp.ge.s32.totalorder %v2007_v61, 2  ;;  %vm2465_vm1 = vcmp.lt.s32.totalorder %v1923_v36, 2  ;;  %v775_v15 = vrot.slane %v2062_v13, 3 }
 0x4e7   : > { %v648_v48 = vsel %vm2451_vm6, %v645_v24, %v644_v17  ;;  %vm2453_vm14 = vmmov %vm2447_vm15  ;;  %vm2457_vm6 = vcmp.lt.s32.totalorder %v2001_v59, 26  ;;  %v671_v56 = vsel %vm2025_vm12, %v2051_v11, %v667_v52  ;;  %v701_v6 = vsel %vm2465_vm1, %v698_v28, %v699_v29 }
 0x4e8   : > { %vm2169_vm15 = vmand %vm2453_vm14, %vm2452_vm11  ;;  %v668_v53 = vsel %vm2098_vm13, %v648_v48, %v643_v43  ;;  %v837_v55 = vsel %vm2453_vm14, %v2051_v11, %v835_v51  ;;  %vm2460_vm13 = vcmp.lt.s32.totalorder %v1923_v36, 1  ;;  %v745_v21 = vrot.slane %v2051_v11, 5 }
 0x4e9   : > { %vm2185_vm11 = vmand %vm2457_vm6, %vm2456_vm3  ;;  %v672_v57 = vsel %vm2025_vm12, %v2062_v13, %v668_v53  ;;  %v676_v58 = vsel %vm2460_vm13, %v673_v20, %v674_v26  ;;  %vm2461_vm3 = vcmp.ge.s32.totalorder %v2007_v61, 1  ;;  %v1024_v0 = vpack.c.bf16 %v837_v55, %v834_v50 }
 0x4ea   : > { %vm2204_vm6 = vmand %vm2015_vm7, %vm2461_vm3  ;;  %v697_v5 = vsel %vm2135_vm8, %v676_v58, %v672_v57  ;;  %vm2469_vm7 = vnez %v2436_v27  ;;  %v746_v22 = vrot.slane %v2062_v13, 5  ;;  %v743_v7 = vsel %vm2055_vm0, %v623_v37, 0.0 }
 0x4eb   : > { %vm2464_vm14 = vmmov %vm2460_vm13  ;;  %vm2466_vm13 = vcmp.ge.s32.totalorder %v2013_v62, 1  ;;  %v722_v14 = vsel %vm2169_vm15, %v701_v6, %v697_v5  ;;  %1688 = vmatprep.mubr.bf16.mxu0 %v1024_v0  ;;  %vm2486_vm0 = vnez %v2432_v19 }
 0x4ec   : > { %v677_v4 = vsel %vm2464_vm14, %v674_v26, %v673_v20  ;;  %vm2218_vm4 = vmand %vm2035_vm2, %vm2466_vm13  ;;  %v842_v20 = vsel %vm2185_vm11, %v701_v6, 0.0  ;;  %vm2479_vm11 = vcmp.lt.s32.totalorder %v2013_v62, 2 }
 0x4ed   : > { %v696_v8 = vsel %vm2469_vm7, %v677_v4, %v671_v56  ;;  %vm2470_vm3 = vmmov %vm2465_vm1  ;;  %vm2471_vm1 = vcmp.lt.s32.totalorder %v2013_v62, 3 }
 0x4ee   : > { %v702_v9 = vsel %vm2470_vm3, %v699_v29, %v698_v28  ;;  %vm2233_vm14 = vmand %vm2020_vm10, %vm2471_vm1  ;;  %vm2477_vm10 = vcmp.lt.s32.totalorder %v1923_v36, 5  ;;  %vm2480_vm3 = vcmp.ge.s32.totalorder %v2001_v59, 104 }
 0x4ef   : > { %v721_v17 = vsel %vm2151_vm9, %v702_v9, %v696_v8  ;;  %vm2474_vm13 = vmmov %vm2471_vm1  ;;  %v777_v23 = vsel %vm2477_vm10, %v774_v30, %v775_v15 }
 0x4f0   : > { %vm2247_vm7 = vmand %vm2035_vm2, %vm2474_vm13  ;;  %v864_v25 = vpack.c.bf16 %v722_v14, %v721_v17  ;;  %v848_v27 = vsel %vm2204_vm6, %v777_v23, %v842_v20  ;;  %vm2483_vm2 = vcmp.lt.s32.totalorder %v1923_v36, 3 }
 0x4f1   : > { %vm2478_vm9 = vmmov %vm2477_vm10  ;;  %v748_v29 = vsel %vm2483_vm2, %v745_v21, %v746_v22  ;;  %vm2485_vm10 = vcmp.ge.s32.totalorder %v2007_v61, 1  ;;  %v850_v59 = vsel %vm2025_vm12, %v2051_v11, %v848_v27 }
 0x4f2   : > { %v778_v24 = vsel %vm2478_vm9, %v775_v15, %v774_v30  ;;  %vm2259_vm1 = vmand %vm2480_vm3, %vm2479_vm11  ;;  %1668 = vmatprep.mubr.bf16.mxu1 %v864_v25  ;;  %v770_v30 = vsel %vm2486_vm0, %v748_v29, %v743_v7 }
 0x4f3   : > { %v849_v28 = vsel %vm2218_vm4, %v778_v24, 0.0  ;;  %vm2484_vm13 = vmmov %vm2483_vm2  ;;  %vm2487_vm4 = vnez %v2440_v33  ;;  %v772_v32 = vsel %vm2025_vm12, %v2051_v11, %v770_v30  ;;  %v1523_v11 = vld [vmem:[%s2405_s4] ss:$0 sm:$0xff] }
 0x4f4   : > { %v749_v62 = vsel %vm2484_vm13, %v746_v22, %v745_v21  ;;  %vm795_vm9 = vmand %vm2045_vm5, %vm2485_vm10  ;;  %v851_v12 = vsel %vm2025_vm12, %v2062_v13, %v849_v28  ;;  %vm2488_vm5 = vmmov 0  }
 0x4f5   : > { %v771_v31 = vsel %vm2247_vm7, %v749_v62, 0.0  ;;  %v856_v61 = vsel %vm2487_vm4, %v749_v62, %v850_v59  ;;  %v857_v10 = vsel %vm2233_vm14, %v748_v29, %v851_v12  ;;  %v799_v40 = vsel %vm795_vm9, %v778_v24, %v772_v32 }
 0x4f6   : > { %v773_v37 = vsel %vm2025_vm12, %v2062_v13, %v771_v31  ;;  %v863_v19 = vsel %vm2259_vm1, %v622_v34, %v857_v10 }
 0x4f7   : > { %v800_v41 = vsel %vm2135_vm8, %v777_v23, %v773_v37  ;;  %v1025_v33 = vpack.c.bf16 %v863_v19, %v856_v61 }
 0x4f8   : > { %v822_v42 = vsel %vm2169_vm15, %v702_v9, %v800_v41 }
 0x4f9   : > { %v865_v43 = vpack.c.bf16 %v822_v42, %v799_v40  ;;  %1689 = vmatmul.mubr.bf16.vlgmr.msra.gmra.mrb[4].mxu0 %v1025_v33 }
 0x4fb   : > { %1669 = vmatmul.mubr.bf16.vlgmr.msra.gmra.mrb[0].mxu1 %v865_v43 }
 0x4fc   : > { %1708 = vmatprep.mubr.msk.bf16.mxu1 %vm2488_vm5, %v1814_v18 }
 0x5cc   : > { %v1690_v13 = vpop.f32.mrb[4].mxu0 }
 0x5cd   : > { %v2311_v34 = vadd.f32 %v1690_v13, %v1549_v3  ;;  %v1133_v44 = vpop.f32.mrb[5].mxu0 }
 0x5ce   : > { %v1670_v39 = vpop.f32.mrb[0].mxu1  ;;  %v2315_v46 = vadd.f32 %v1549_v3, %v1133_v44  ;;  %v1691_v48 = vpop.f32.mrb[6].mxu0 }
 0x5cf   : > { %v2313_v45 = vadd.f32 %v1670_v39, %v1523_v11  ;;  %v971_v47 = vpop.f32.mrb[1].mxu1  ;;  %v1154_v49 = vmul.f32 0.044715, %v2311_v34  ;;  %v2318_v51 = vadd.f32 %v1691_v48, %v1549_v3  ;;  %v1136_v53 = vpop.f32.mrb[7].mxu0 }
 0x5d0   : > { %v972_v50 = vadd.f32 %v1523_v11, %v971_v47  ;;  %v1671_v52 = vpop.f32.mrb[2].mxu1  ;;  %v1152_v55 = vmul.f32 0.044715, %v2315_v46  ;;  %v2322_v57 = vadd.f32 %v1549_v3, %v1136_v53 }
 0x5d1   : > { %v992_v54 = vmul.f32 0.044715, %v2313_v45  ;;  %v983_v56 = vadd.f32 %v1671_v52, %v1523_v11  ;;  %v974_v58 = vpop.f32.mrb[3].mxu1  ;;  %v1158_v60 = vmul.f32 %v1154_v49, %v2311_v34  ;;  %v1155_v4 = vmul.f32 0.044715, %v2318_v51 }
 0x5d2   : > { %v990_v0 = vmul.f32 0.044715, %v972_v50  ;;  %v975_v5 = vadd.f32 %v1523_v11, %v974_v58  ;;  %v1156_v35 = vmul.f32 %v1152_v55, %v2315_v46  ;;  %v1153_v9 = vmul.f32 0.044715, %v2322_v57 }
 0x5d3   : > { %v996_v6 = vmul.f32 %v992_v54, %v2313_v45  ;;  %v993_v8 = vmul.f32 0.044715, %v983_v56  ;;  %v1159_v15 = vmul.f32 %v1155_v4, %v2318_v51  ;;  %v1162_v63 = vmul.f32 %v1158_v60, %v2311_v34 }
 0x5d4   : > { %v994_v14 = vmul.f32 %v990_v0, %v972_v50  ;;  %v991_v16 = vmul.f32 0.044715, %v975_v5  ;;  %v1160_v20 = vmul.f32 %v1156_v35, %v2315_v46  ;;  %v1157_v22 = vmul.f32 %v1153_v9, %v2322_v57 }
 0x5d5   : > { %v1000_v17 = vmul.f32 %v996_v6, %v2313_v45  ;;  %v997_v21 = vmul.f32 %v993_v8, %v983_v56  ;;  %v1163_v26 = vmul.f32 %v1159_v15, %v2318_v51  ;;  %v1166_v30 = vadd.f32 %v1162_v63, %v2311_v34 }
 0x5d6   : > { %v998_v23 = vmul.f32 %v994_v14, %v972_v50  ;;  %v995_v24 = vmul.f32 %v991_v16, %v975_v5  ;;  %v1161_v27 = vmul.f32 %v1157_v22, %v2322_v57  ;;  %v1164_v28 = vadd.f32 %v1160_v20, %v2315_v46 }
 0x5d7   : > { %v1004_v25 = vadd.f32 %v1000_v17, %v2313_v45  ;;  %v1001_v7 = vmul.f32 %v997_v21, %v983_v56  ;;  %v1167_v32 = vadd.f32 %v1163_v26, %v2318_v51  ;;  %v1170_v33 = vmul.f32 0.7978846, %v1166_v30 }
 0x5d8   : > { %v1002_v29 = vadd.f32 %v998_v23, %v972_v50  ;;  %v999_v62 = vmul.f32 %v995_v24, %v975_v5  ;;  %v1165_v12 = vadd.f32 %v1161_v27, %v2322_v57  ;;  %v1168_v40 = vmul.f32 0.7978846, %v1164_v28 }
 0x5d9   : > { %v1005_v59 = vadd.f32 %v1001_v7, %v983_v56  ;;  %v1008_v10 = vmul.f32 0.7978846, %v1004_v25  ;;  %v1171_v42 = vmul.f32 0.7978846, %v1167_v32  ;;  %v986_v11 = vmul.f32 0.5, %v972_v50  ;;  %v1770_v32 = vld [vmem:[%s2406_s5] sm:$0xff]  }
 0x5da   : > { %v1003_v31 = vadd.f32 %v999_v62, %v975_v5  ;;  %v1006_v61 = vmul.f32 0.7978846, %v1002_v29  ;;  %v1169_v41 = vmul.f32 0.7978846, %v1165_v12  ;;  %v988_v44 = vmul.f32 0.5, %v2313_v45  ;;  %1693 = vmatpush3.bf16.msra.mxu1 %v1770_v32 }
 0x5db   : > { %v1009_v37 = vmul.f32 0.7978846, %v1005_v59  ;;  %v987_v49 = vmul.f32 0.5, %v975_v5  ;;  %v989_v55 = vmul.f32 0.5, %v983_v56  ;;  %v1148_v6 = vmul.f32 0.5, %v2315_v46  ;;  %1694 = vmatprep.subr.bf16.mxu1 %v1814_v18 }
 0x5dc   : > { %v1007_v19 = vmul.f32 0.7978846, %v1003_v31  ;;  %1786 = vtanh.f32 %v1006_v61  ;;  %v1149_v14 = vmul.f32 0.5, %v2322_v57  ;;  %v1150_v5 = vmul.f32 0.5, %v2311_v34 }
 0x5dd   : > { %1788 = vtanh.f32 %v1008_v10  ;;  %v1151_v56 = vmul.f32 0.5, %v2318_v51  ;;  %v1395_v32 = vsub.s32 6, %v1923_v36 }
 0x5de   : > { %1790 = vtanh.f32 %v1007_v19  ;;  %v1772_v19 = vld [vmem:[%s2406_s5 + $0x10] sm:$0xff]  }
 0x5df   : > { %1792 = vtanh.f32 %v1009_v37  ;;  %v1771_v37 = vld [vmem:[%s2406_s5 + $0x8] sm:$0xff]  }
 0x5e0   : > { %1794 = vtanh.f32 %v1168_v40  ;;  %1695 = vmatpush3.bf16.msra.mxu1 %v1771_v37  ;;  %v1773_v40 = vld [vmem:[%s2406_s5 + $0x18] sm:$0xff]   ;;  %v1401_v37 = vsub.s32 7, %v1923_v36 }
 0x5e1   : > { %1796 = vtanh.f32 %v1169_v41  ;;  %1696 = vmatprep.subr.bf16.mxu1 %v1814_v18  ;;  %v1774_v41 = vld [vmem:[%s2406_s5 + $0x20] sm:$0xff]  }
 0x5e2   : > { %1798 = vtanh.f32 %v1170_v33  ;;  %v1775_v33 = vld [vmem:[%s2406_s5 + $0x28] sm:$0xff]  }
 0x5e3   : > { %1800 = vtanh.f32 %v1171_v42 }
 0x5e4   : > { %1697 = vmatpush3.bf16.msra.mxu1 %v1772_v19  ;;  %v1396_v19 = vrot.slane %v1929_v38, %v1395_v32 }
 0x5e5   : > { %1698 = vmatprep.subr.bf16.mxu1 %v1814_v18 }
 0x5e6   : > { %v1787_v43 = vpop.eup %1786 }
 0x5e7   : > { %v1789_v3 = vpop.eup %1788  ;;  %v1014_v13 = vadd.f32 1.0, %v1787_v43 }
 0x5e8   : > { %v1791_v39 = vpop.eup %1790  ;;  %v1016_v47 = vadd.f32 1.0, %v1789_v3  ;;  %1699 = vmatpush3.bf16.msra.mxu1 %v1773_v40 }
 0x5e9   : > { %v1793_v48 = vpop.eup %1792  ;;  %v1015_v52 = vadd.f32 1.0, %v1791_v39  ;;  %v1018_v53 = vmul.f32 %v1014_v13, %v986_v11  ;;  %1700 = vmatprep.subr.bf16.mxu1 %v1814_v18  ;;  %v1776_v13 = vld [vmem:[%s2406_s5 + $0x30] sm:$0xff]  }
 0x5ea   : > { %v1795_v54 = vpop.eup %1794  ;;  %v1017_v58 = vadd.f32 1.0, %v1793_v48  ;;  %v1020_v60 = vmul.f32 %v1016_v47, %v988_v44  ;;  %v1777_v44 = vld [vmem:[%s2406_s5 + $0x38] sm:$0xff]  }
 0x5eb   : > { %v1797_v0 = vpop.eup %1796  ;;  %v1019_v4 = vmul.f32 %v1015_v52, %v987_v49  ;;  %v1176_v35 = vadd.f32 1.0, %v1795_v54  ;;  %v1230_v54 = vsub.s32 5, %v1923_v36 }
 0x5ec   : > { %v1799_v8 = vpop.eup %1798  ;;  %v1021_v50 = vmul.f32 %v1017_v58, %v989_v55  ;;  %v1022_v9 = vadd.f32 %v1020_v60, %v1018_v53  ;;  %v1177_v45 = vadd.f32 1.0, %v1797_v0  ;;  %1701 = vmatpush3.bf16.msra.mxu1 %v1774_v41  ;;  %v1224_v53 = vsub.s32 4, %v1923_v36 }
 0x5ed   : > { %v1801_v15 = vpop.eup %1800  ;;  %v1178_v16 = vadd.f32 1.0, %v1799_v8  ;;  %v1180_v17 = vmul.f32 %v1176_v35, %v1148_v6  ;;  %1702 = vmatprep.subr.bf16.mxu1 %v1814_v18  ;;  %v1231_v0 = vrot.slane %v1929_v38, %v1230_v54 }
 0x5ee   : > { %v1023_v20 = vadd.f32 %v1021_v50, %v1019_v4  ;;  %v1179_v21 = vadd.f32 1.0, %v1801_v15  ;;  %v1181_v22 = vmul.f32 %v1177_v45, %v1149_v14  ;;  %v1225_v55 = vrot.slane %v1929_v38, %v1224_v53 }
 0x5ef   : > { %v1182_v63 = vmul.f32 %v1178_v16, %v1150_v5 }
 0x5f0   : > { %v1183_v23 = vmul.f32 %v1179_v21, %v1151_v56  ;;  %1703 = vmatpush3.bf16.msra.mxu1 %v1775_v33 }
 0x5f1   : > { %v1184_v46 = vadd.f32 %v1182_v63, %v1180_v17  ;;  %1704 = vmatprep.subr.bf16.mxu1 %v1814_v18 }
 0x5f2   : > { %v1185_v24 = vadd.f32 %v1183_v23, %v1181_v22 }
 0x5f3   : > { %v1186_v25 = vadd.f32 %v1184_v46, %v1022_v9  ;;  %v1558_v9 = vld [vmem:[%s2407_s6] ss:$0 sm:$0xff] }
 0x5f4   : > { %v1187_v26 = vadd.f32 %v1185_v24, %v1023_v20  ;;  %1705 = vmatpush3.bf16.msra.mxu1 %v1776_v13 }
 0x5f5   : > { %1706 = vmatprep.subr.bf16.mxu1 %v1814_v18 }
 0x5f6   : > { %v1188_v7 = vadd.f32 %v1187_v26, %v1186_v25 }
 0x5f8   : > { %1189 = vadd.xlane.f32.xlu0 %v1188_v7  ;;  %1707 = vmatpush3.bf16.msra.mxu1 %v1777_v44 }
 0x685   : > { %v1190_v57 = vpop.xlane.xlu0 %1189 }
 0x686   : > { %v1191_v27 = vrot.slane %v1190_v57, 4 }
 0x688   : > { %v1192_v28 = vadd.f32 %v1191_v27, %v1190_v57 }
 0x68a   : > { %v1193_v29 = vrot.slane %v1192_v28, 2 }
 0x68c   : > { %v1194_v34 = vadd.f32 %v1193_v29, %v1192_v28 }
 0x68e   : > { %v1195_v62 = vrot.slane %v1194_v34, 1 }
 0x690   : > { %v1196_v59 = vadd.f32 %v1195_v62, %v1194_v34 }
 0x692   : > { %1724 = vpush %v1196_v59 }
 0x6c3   : > { %s1725_s26 = spop %1724 }
 0x6c4   : > { %s1198_s27 = smul.f32 0.00048828125, %s1725_s26 }
 0x6c6   : > { %v1199_v51 = vstv %s1198_s27 }
 0x6c7   : > { %v1200_v12 = vsub.f32 %v1186_v25, %v1199_v51  ;;  %v1201_v30 = vsub.f32 %v1187_v26, %v1199_v51 }
 0x6c9   : > { %v1202_v31 = vmul.f32 %v1200_v12, %v1200_v12  ;;  %v1203_v61 = vmul.f32 %v1201_v30, %v1201_v30 }
 0x6cb   : > { %v1204_v10 = vadd.f32 %v1203_v61, %v1202_v31 }
 0x6cd   : > { %1205 = vadd.xlane.f32.xlu1 %v1204_v10 }
 0x75a   : > { %v1206_v42 = vpop.xlane.xlu1 %1205 }
 0x75b   : > { %v1207_v43 = vrot.slane %v1206_v42, 4 }
 0x75d   : > { %v1208_v3 = vadd.f32 %v1207_v43, %v1206_v42  ;;  %v1402_v42 = vrot.slane %v1929_v38, %v1401_v37 }
 0x75f   : > { %v1209_v11 = vrot.slane %v1208_v3, 2 }
 0x761   : > { %v1210_v39 = vadd.f32 %v1209_v11, %v1208_v3 }
 0x763   : > { %v1211_v47 = vrot.slane %v1210_v39, 1 }
 0x765   : > { %v1212_v48 = vadd.f32 %v1211_v47, %v1210_v39 }
 0x767   : > { %1726 = vpush %v1212_v48 }
 0x798   : > { %s1727_s25 = spop %1726 }
 0x799   : > { %s1214_s26 = smul.f32 0.00048828125, %s1727_s25 }
 0x79b   : > { %s1215_s27 = sadd.f32 1e-05, %s1214_s26 }
 0x79d   : > { %v1216_v49 = vstv %s1215_s27 }
 0x79e   : > { %1802 = vrsqrt.f32 %v1216_v49 }
 0x7a8   : > { %v1803_v52 = vpop.eup %1802 }
 0x7a9   : > { %1728 = vpush %v1803_v52 }
 0x7da   : > { %s1729_s28 = spop %1728 }
 0x7db   : > { %v1219_v58 = vstv %s1729_s28 }
 0x7dc   : > { %v1220_v60 = vmul.f32 %v1219_v58, %v1200_v12  ;;  %v1221_v18 = vmul.f32 %v1219_v58, %v1201_v30 }
 0x7de   : > { %v1226_v4 = vmul.f32 %v1225_v55, %v1220_v60  ;;  %v1227_v6 = vmul.f32 %v1225_v55, %v1221_v18 }
 0x7e0   : > { %v1232_v35 = vadd.f32 %v1231_v0, %v1226_v4  ;;  %v1233_v8 = vadd.f32 %v1231_v0, %v1227_v6 }
 0x7e2   : > { %v1235_v50 = vpack.c.bf16 %v1233_v8, %v1232_v35 }
 0x7e4   : > { %1709 = vmatmul.mubr.bf16.vlgmr.msra.gmra.mrb[4].mxu1 %v1235_v50 }
 0x8b7   : > { %v1340_v14 = vpop.f32.mrb[4].mxu1 }
 0x8b8   : > { %v1341_v45 = vadd.f32 %v1558_v9, %v1340_v14  ;;  %v1710_v15 = vpop.f32.mrb[5].mxu1 }
 0x8b9   : > { %v1343_v5 = vpop.f32.mrb[6].mxu1 }
 0x8ba   : > { %v1344_v16 = vadd.f32 %v1558_v9, %v1343_v5  ;;  %v1711_v17 = vpop.f32.mrb[7].mxu1  ;;  %v1347_v20 = vadd.f32 %v1880_v1, %v1341_v45 }
 0x8bc   : > { %v1348_v56 = vadd.f32 %v1882_v2, %v1344_v16 }
 0x8be   : > { %v1587_v21 = vpack.c.bf16 %v1348_v56, %v1347_v20  ;;  %v1359_v22 = vadd.f32 %v1348_v56, %v1347_v20 }
 0x8c0   : > { %1588 = vst [vmem:[%s340_s14] sm:$0xff] %v1587_v21   ;;  %1360 = vadd.xlane.f32.xlu0 %v1359_v22 }
 0x94d   : > { %v1361_v63 = vpop.xlane.xlu0 %1360 }
 0x94e   : > { %v1362_v23 = vrot.slane %v1361_v63, 4 }
 0x950   : > { %v1363_v46 = vadd.f32 %v1362_v23, %v1361_v63 }
 0x952   : > { %v1364_v24 = vrot.slane %v1363_v46, 2 }
 0x954   : > { %v1365_v25 = vadd.f32 %v1364_v24, %v1363_v46 }
 0x956   : > { %v1366_v26 = vrot.slane %v1365_v25, 1 }
 0x958   : > { %v1367_v7 = vadd.f32 %v1366_v26, %v1365_v25 }
 0x95a   : > { %1730 = vpush %v1367_v7 }
 0x98b   : > { %s1731_s15 = spop %1730 }
 0x98c   : > { %s1369_s16 = smul.f32 0.00048828125, %s1731_s15 }
 0x98e   : > { %v1370_v1 = vstv %s1369_s16 }
 0x98f   : > { %v1371_v2 = vsub.f32 %v1347_v20, %v1370_v1  ;;  %v1372_v57 = vsub.f32 %v1348_v56, %v1370_v1 }
 0x991   : > { %v1373_v27 = vmul.f32 %v1371_v2, %v1371_v2  ;;  %v1374_v28 = vmul.f32 %v1372_v57, %v1372_v57 }
 0x993   : > { %v1375_v29 = vadd.f32 %v1374_v28, %v1373_v27 }
 0x995   : > { %1376 = vadd.xlane.f32.xlu1 %v1375_v29 }
 0xa22   : > { %v1377_v34 = vpop.xlane.xlu1 %1376 }
 0xa23   : > { %v1378_v62 = vrot.slane %v1377_v34, 4 }
 0xa25   : > { %v1379_v59 = vadd.f32 %v1378_v62, %v1377_v34 }
 0xa27   : > { %v1380_v51 = vrot.slane %v1379_v59, 2 }
 0xa29   : > { %v1381_v12 = vadd.f32 %v1380_v51, %v1379_v59 }
 0xa2b   : > { %v1382_v30 = vrot.slane %v1381_v12, 1 }
 0xa2d   : > { %v1383_v31 = vadd.f32 %v1382_v30, %v1381_v12 }
 0xa2f   : > { %1732 = vpush %v1383_v31 }
 0xa60   : > { %s1733_s17 = spop %1732 }
 0xa61   : > { %s1385_s18 = smul.f32 0.00048828125, %s1733_s17 }
 0xa63   : > { %s1386_s19 = sadd.f32 1e-05, %s1385_s18 }
 0xa65   : > { %v1387_v61 = vstv %s1386_s19 }
 0xa66   : > { %1804 = vrsqrt.f32 %v1387_v61 }
 0xa70   : > { %v1805_v10 = vpop.eup %1804 }
 0xa71   : > { %1734 = vpush %v1805_v10 }
 0xaa2   : > { %s1735_s20 = spop %1734 }
 0xaa3   : > { %v1390_v40 = vstv %s1735_s20 }
 0xaa4   : > { %v1391_v41 = vmul.f32 %v1390_v40, %v1371_v2  ;;  %v1392_v33 = vmul.f32 %v1390_v40, %v1372_v57 }
 0xaa6   : > { %v1397_v43 = vmul.f32 %v1396_v19, %v1391_v41  ;;  %v1398_v3 = vmul.f32 %v1396_v19, %v1392_v33 }
 0xaa8   : > { %v1403_v11 = vadd.f32 %v1402_v42, %v1397_v43  ;;  %v1404_v13 = vadd.f32 %v1402_v42, %v1398_v3 }
 0xaaa   : > { %v1592_v39 = vpack.c.bf16 %v1404_v13, %v1403_v11 }
 0xaac   : > { %1593 = vst [vmem:[%s345_s23] sm:$0xff] %v1592_v39  }
 0xaad PF: > { %s20_s30 = sadd.s32 1, %s1812_s30  }
 0xaae   : > { %p17_p4 = scmp.ge.s32.totalorder %s20_s30, 4  }
 0xab0   :  { %19 = sbr.rel (!%p17_p4) target bundleno = 1 (0x1), region = 96 }

</bundles_post_ra>
